<compile_context>
chip_gen: v5e
topology: v5e:2x2
jax: 0.10.0
libtpu: 0.0.40
codegen_flags: <defaults>
</compile_context>

<pallas_src>
import math

import jax
import jax.numpy as jnp
import numpy as np
from jax import lax
from jax.experimental import pallas as pl
from jax.experimental.pallas import tpu as pltpu

# ------------------------- constants from the PyTorch module -------------------------
NEURON_VTH = 0.5
TAU_M = 0.03
TAU_S = TAU_M / 4.0
BETA = TAU_M / TAU_S
V0_PARAM = 1.0 / (BETA - 1.0) * BETA ** (BETA / (BETA - 1.0))

# f32-faithful MXU passes, used identically in kernel and reference so spike
# thresholds (mem > 0.5) see the same values.
MATMUL_PRECISION = jax.lax.Precision.HIGHEST

LANE = 128
BATCH_ALIGN = 16                 # bf16 packs 16 rows per sublane tile
UNROLL_TS_LIMIT = 16
UNROLL_STATE_BYTES_LIMIT = 64 * 1024   # ~1/4 of the 256 KiB vreg file


def _round_up(x, m):
    return (x + m - 1) // m * m


# ------------------------------------ kernel ------------------------------------
def make_spike_mlp_kernel(spike_ts, hidden_num, unroll):
    def kernel(*refs):
        # ref order: spikes, W_hidden[0..h-1], Wout, Ph, Po, out, lin0 scratch
        spikes_ref = refs[0]
        w_refs = refs[1:1 + hidden_num]
        wout_ref = refs[1 + hidden_num]
        ph_ref = refs[2 + hidden_num]
        po_ref = refs[3 + hidden_num]
        out_ref = refs[4 + hidden_num]
        lin0_ref = refs[5 + hidden_num]          # VMEM scratch (T, bb, hs)

        T = spike_ts
        bb = out_ref.shape[0]
        n_in = spikes_ref.shape[2]
        hs = ph_ref.shape[1]                     # padded hidden width
        n_out = po_ref.shape[1]                  # padded output population dim

        Ph = ph_ref[...]   # rows: h_np, h_cd, h_vd, b_h[0..h-1]   (V0-folded biases)
        Po = po_ref[...]   # rows: o_np, o_cd, o_vd, b_out          (V0-folded bias)

        # Hoist every (1, n) -> (bb, n) broadcast out of the time loop (JAX does
        # not CSE broadcast_in_dim across unrolled iterations).
        h_np = jnp.broadcast_to(Ph[0:1, :], (bb, hs))
        h_cd = jnp.broadcast_to(Ph[1:2, :], (bb, hs))
        h_vd = jnp.broadcast_to(Ph[2:3, :], (bb, hs))
        b_h = {l: jnp.broadcast_to(Ph[3 + l:4 + l, :], (bb, hs))
               for l in range(1, hidden_num)}
        o_np = jnp.broadcast_to(Po[0:1, :], (bb, n_out))
        o_cd = jnp.broadcast_to(Po[1:2, :], (bb, n_out))
        o_vd = jnp.broadcast_to(Po[2:3, :], (bb, n_out))
        b_o = jnp.broadcast_to(Po[3:4, :], (bb, n_out))

        Ws = [w_refs[l][...] for l in range(1, hidden_num)]   # recurrent-path weights
        Wout = wout_ref[...]

        # ---- Hoisted input-layer matmul over ALL timesteps (no recurrence on the
        # ---- input side): one MXU call with M = T*bb, off the serial chain.
        spikes = spikes_ref[...].astype(jnp.float32)           # (T, bb, n_in), 0/1
        lin0 = jnp.dot(spikes.reshape(T * bb, n_in), w_refs[0][...],
                       preferred_element_type=jnp.float32,
                       precision=MATMUL_PRECISION)
        lin0 = lin0 + jnp.broadcast_to(Ph[3:4, :], (T * bb, hs))   # layer-0 bias
        lin0_ref[...] = lin0.reshape(T, bb, hs)

        zeros_h = jnp.zeros((bb, hs), jnp.float32)
        zeros_o = jnp.zeros((bb, n_out), jnp.float32)
        init_state = (
            (zeros_h,) * hidden_num,   # current
            (zeros_h,) * hidden_num,   # mem
            (zeros_h,) * hidden_num,   # spike
            zeros_o, zeros_o, zeros_o,  # out current / mem / spike
            zeros_o,                    # sum_spike
        )

        def step(t, state):
            hcur, hmem, hspk, ocur, omem, ospk, ssum = state
            ncur, nmem, nspk = [], [], []
            prev = None
            for l in range(hidden_num):
                # varyR_update with V0 folded into W/b: exact rewrite of
                #   cur*cd + (1 - np*mem) * V0 * (x@W + b)
                if l == 0:
                    lin = lin0_ref[t]            # precomputed linear part
                else:
                    lin = jnp.dot(prev, Ws[l - 1],
                                  preferred_element_type=jnp.float32,
                                  precision=MATMUL_PRECISION) + b_h[l]
                cur = hcur[l] * h_cd + (1.0 - h_np * hmem[l]) * lin
                mem = h_vd * hmem[l] * (1.0 - hspk[l]) + cur
                spk = (mem > NEURON_VTH).astype(jnp.float32)
                ncur.append(cur)
                nmem.append(mem)
                nspk.append(spk)
                prev = spk
            lin = jnp.dot(prev, Wout, preferred_element_type=jnp.float32,
                          precision=MATMUL_PRECISION) + b_o
            ocur = ocur * o_cd + (1.0 - o_np * omem) * lin
            omem = o_vd * omem * (1.0 - ospk) + ocur
            ospk = (omem > NEURON_VTH).astype(jnp.float32)
            ssum = ssum + ospk
            return (tuple(ncur), tuple(nmem), tuple(nspk), ocur, omem, ospk, ssum)

        if unroll:
            state = init_state
            for t in range(spike_ts):            # static unroll: full LLO visibility
                state = step(t, state)
        else:
            state = lax.fori_loop(0, spike_ts, step, init_state)  # bounded live ranges

        out_ref[...] = state[-1] * (1.0 / float(spike_ts))

    return kernel


# --------------------------------- wrapper / glue ---------------------------------
def spike_mlp_forward(input_spikes, packed, *, spike_ts, batch_block=None):
    """input_spikes: (B, in_pop_dim, spike_ts) f32 0/1 (PyTorch layout).
    packed: output of pack_params().  Returns (B, out_pop_dim)."""
    B, n_in, T = input_spikes.shape
    assert T == spike_ts
    hidden_num = len(packed["W"])
    hs = packed["Ph"].shape[1]
    n_out_pad = packed["Po"].shape[1]
    n_out = packed["out_dim"]

    # ---- batch padding / block choice (sublane-aligned, >=2 blocks when possible
    # ---- so v7x's two TensorCores both get work) --------------------------------
    B_al = _round_up(B, BATCH_ALIGN)
    if batch_block is None:
        if B_al >= 2 * BATCH_ALIGN:
            bb = min(256, _round_up(pl.cdiv(B_al, 2), BATCH_ALIGN))
        else:
            bb = B_al
    else:
        bb = min(_round_up(batch_block, BATCH_ALIGN), B_al)
    assert bb % 8 == 0
    B_pad = _round_up(B_al, bb)
    nb = B_pad // bb

    # Layout plumbing in one fused XLA op: time-major + 0/1-exact bf16 storage
    # (halves the spike HBM->VMEM DMA and the double-buffered VMEM slab).
    spikes_t = jnp.transpose(input_spikes, (2, 0, 1)).astype(jnp.bfloat16)  # (T,B,n_in)
    if B_pad != B:
        spikes_t = jnp.pad(spikes_t, ((0, 0), (0, B_pad - B), (0, 0)))

    def full_spec(shape):
        return pl.BlockSpec(shape, lambda i, _n=len(shape): (0,) * _n)

    in_specs = [pl.BlockSpec((T, bb, n_in), lambda i: (0, i, 0))]
    in_specs += [full_spec(W.shape) for W in packed["W"]]
    in_specs += [full_spec(packed["Wout"].shape),
                 full_spec(packed["Ph"].shape),
                 full_spec(packed["Po"].shape)]
    out_spec = pl.BlockSpec((bb, n_out_pad), lambda i: (i, 0))

    # Unroll only while the recurrent state comfortably fits the vreg file.
    state_bytes = (3 * hidden_num * hs + 4 * n_out_pad) * bb * 4
    unroll = (spike_ts <= UNROLL_TS_LIMIT) and (state_bytes <= UNROLL_STATE_BYTES_LIMIT)

    # Explicit VMEM budget (x3 slack for compiler scratch / tile padding), capped
    # so it also fits v7x's 64 MiB physical VMEM.
    est = (2 * T * bb * n_in * 2                                              # spikes (bf16, dbl-buf)
           + 2 * 4 * (n_in * hs + max(hidden_num - 1, 0) * hs * hs + hs * n_out_pad)
           + 2 * 4 * (8 * hs + 8 * n_out_pad)                                 # Ph / Po tiles
           + 2 * 4 * bb * n_out_pad                                           # output
           + 4 * T * bb * hs                                                  # lin0 scratch
           + state_bytes)
    vmem_limit = int(min(48 * 1024 * 1024, max(16 * 1024 * 1024, 3 * est)))

    kernel = make_spike_mlp_kernel(spike_ts, hidden_num, unroll)
    out = pl.pallas_call(
        kernel,
        out_shape=jax.ShapeDtypeStruct((B_pad, n_out_pad), jnp.float32),
        grid=(nb,),
        in_specs=in_specs,
        out_specs=out_spec,
        scratch_shapes=[pltpu.VMEM((T, bb, hs), jnp.float32)],
        compiler_params=pltpu.CompilerParams(
            dimension_semantics=("parallel",),
            vmem_limit_bytes=vmem_limit),
    )(spikes_t, *packed["W"], packed["Wout"], packed["Ph"], packed["Po"])
    return out[:B, :n_out]


def init_params(key, *, in_pop_dim, out_pop_dim, hidden_sizes):
    """Raw parameters with shapes matching the PyTorch SpikeMLP module."""
    def linear(k, fan_in, fan_out):
        bound = 1.0 / math.sqrt(fan_in)
        kw, kb = jax.random.split(k)
        W = jax.random.uniform(kw, (fan_in, fan_out), jnp.float32, -bound, bound)
        b = jax.random.uniform(kb, (1, fan_out), jnp.float32, -bound, bound)
        return W, b

    keys = jax.random.split(key, len(hidden_sizes) + 1)
    Ws, bs = [], []
    prev = in_pop_dim
    for k, hsz in zip(keys[:-1], hidden_sizes):
        W, b = linear(k, prev, hsz)
        Ws.append(W)
        bs.append(b)
        prev = hsz
    Wout, bout = linear(keys[-1], prev, out_pop_dim)

    h0 = hidden_sizes[0]
    return {
        "W": Ws, "b": bs, "Wout": Wout, "bout": bout,
        # varyR_update params (shared across hidden layers, as in the module)
        "h_np": jnp.full((1, h0), 0.1, jnp.float32),
        "h_cd": jnp.full((1, h0), 0.5, jnp.float32),
        "h_vd": jnp.full((1, h0), 0.75, jnp.float32),
        "o_np": jnp.full((1, out_pop_dim), 0.1, jnp.float32),
        "o_cd": jnp.full((1, out_pop_dim), 0.5, jnp.float32),
        "o_vd": jnp.full((1, out_pop_dim), 0.75, jnp.float32),
    }


def pack_params(params):
    """One-time parameter transform (NOT in the per-call path):
       * fold V0_PARAM into every Linear weight/bias (exact rewrite of varyR_update:
         (1-np*mem)*V0*(xW+b) == (1-np*mem)*(x(V0 W)+V0 b));
       * zero-pad hidden / output widths to multiples of 128 (padded neurons get
         zero weights and biases, so lin=0, cur=mem=0, spike=0 forever -> silent);
       * pack the tiny (1, n) vectors into two contiguous tables (two small DMAs)."""
    widths = [W.shape[1] for W in params["W"]]
    assert all(w == widths[0] for w in widths), \
        "shared varyR params require all hidden layers to have equal width"
    hs = widths[0]
    n_out = params["Wout"].shape[1]
    hs_p = _round_up(hs, LANE)
    n_out_p = _round_up(n_out, LANE)

    def pad2(a, rows, cols):
        return jnp.pad(a, ((0, rows - a.shape[0]), (0, cols - a.shape[1])))

    Wh = []
    for l, W in enumerate(params["W"]):
        rows = W.shape[0] if l == 0 else hs_p       # layer 0 keeps n_in rows
        Wh.append(pad2(V0_PARAM * W, rows, hs_p))
    Wout = pad2(V0_PARAM * params["Wout"], hs_p, n_out_p)
    bh = [pad2(V0_PARAM * b, 1, hs_p) for b in params["b"]]
    bout = pad2(V0_PARAM * params["bout"], 1, n_out_p)

    Ph = jnp.concatenate([pad2(params["h_np"], 1, hs_p),
                          pad2(params["h_cd"], 1, hs_p),
                          pad2(params["h_vd"], 1, hs_p)] + bh, axis=0)
    Po = jnp.concatenate([pad2(params["o_np"], 1, n_out_p),
                          pad2(params["o_cd"], 1, n_out_p),
                          pad2(params["o_vd"], 1, n_out_p), bout], axis=0)
    return {"W": Wh, "Wout": Wout, "Ph": Ph, "Po": Po, "out_dim": n_out}


# ------------------------------- pure-JAX reference -------------------------------
def reference_forward(input_spikes, packed, *, spike_ts):
    """Pure-JAX mirror of SpikeMLP.forward on the same V0-folded, padded params."""
    B = input_spikes.shape[0]
    hidden_num = len(packed["W"])
    hs = packed["Ph"].shape[1]
    n_out_pad = packed["Po"].shape[1]
    Ph, Po = packed["Ph"], packed["Po"]
    h_np, h_cd, h_vd = Ph[0:1], Ph[1:2], Ph[2:3]
    b_h = [Ph[3 + l:4 + l] for l in range(hidden_num)]
    o_np, o_cd, o_vd, b_o = Po[0:1], Po[1:2], Po[2:3], Po[3:4]

    hid = [[jnp.zeros((B, hs), jnp.float32) for _ in range(3)] for _ in range(hidden_num)]
    ocur = omem = ospk = jnp.zeros((B, n_out_pad), jnp.float32)
    ssum = jnp.zeros((B, n_out_pad), jnp.float32)
    for t in range(spike_ts):
        prev = input_spikes[:, :, t]
        for l in range(hidden_num):
            cur, mem, spk = hid[l]
            lin = jnp.dot(prev, packed["W"][l], preferred_element_type=jnp.float32,
                          precision=MATMUL_PRECISION) + b_h[l]
            cur = cur * h_cd + (1.0 - h_np * mem) * lin
            mem = h_vd * mem * (1.0 - spk) + cur
            spk = (mem > NEURON_VTH).astype(jnp.float32)
            hid[l] = [cur, mem, spk]
            prev = spk
        lin = jnp.dot(prev, packed["Wout"], preferred_element_type=jnp.float32,
                      precision=MATMUL_PRECISION) + b_o
        ocur = ocur * o_cd + (1.0 - o_np * omem) * lin
        omem = o_vd * omem * (1.0 - ospk) + ocur
        ospk = (omem > NEURON_VTH).astype(jnp.float32)
        ssum = ssum + ospk
    return (ssum / float(spike_ts))[:, :packed["out_dim"]]


# ------------------------------------- main -------------------------------------
if __name__ == "__main__":
    # TODO(synk): PseudoSpikeRect surrogate gradient (backward) is training-only and
    #             not implemented; this kernel covers the forward pass only.
    key = jax.random.PRNGKey(0)

    # ---- case 1: module-default small shapes (B=2, 1 hidden layer, unrolled) ----
    cfg = dict(in_pop_dim=32, out_pop_dim=8, hidden_sizes=[32], spike_ts=8)
    batch = 2
    kp, ks, key = jax.random.split(key, 3)
    params = init_params(kp, in_pop_dim=cfg["in_pop_dim"], out_pop_dim=cfg["out_pop_dim"],
                         hidden_sizes=cfg["hidden_sizes"])
    packed = pack_params(params)
    input_spikes = (jax.random.uniform(
        ks, (batch, cfg["in_pop_dim"], cfg["spike_ts"])) < 0.5).astype(jnp.float32)

    out = jax.block_until_ready(
        spike_mlp_forward(input_spikes, packed, spike_ts=cfg["spike_ts"]))
    ref = reference_forward(input_spikes, packed, spike_ts=cfg["spike_ts"])
    np.testing.assert_allclose(np.asarray(out), np.asarray(ref), rtol=1e-5, atol=1e-5)
    assert out.shape == (batch, cfg["out_pop_dim"])

    # ---- case 2: two hidden layers, batch big enough for a 2-block (megacore) grid,
    # ----          fori_loop state-carry path ----
    cfg2 = dict(in_pop_dim=32, out_pop_dim=8, hidden_sizes=[32, 32], spike_ts=8)
    batch2 = 20
    kp2, ks2, key = jax.random.split(key, 3)
    params2 = init_params(kp2, in_pop_dim=cfg2["in_pop_dim"], out_pop_dim=cfg2["out_pop_dim"],
                          hidden_sizes=cfg2["hidden_sizes"])
    packed2 = pack_params(params2)
    input_spikes2 = (jax.random.uniform(
        ks2, (batch2, cfg2["in_pop_dim"], cfg2["spike_ts"])) < 0.5).astype(jnp.float32)

    out2 = jax.block_until_ready(
        spike_mlp_forward(input_spikes2, packed2, spike_ts=cfg2["spike_ts"]))
    ref2 = reference_forward(input_spikes2, packed2, spike_ts=cfg2["spike_ts"])
    np.testing.assert_allclose(np.asarray(out2), np.asarray(ref2), rtol=1e-5, atol=1e-5)
    assert out2.shape == (batch2, cfg2["out_pop_dim"])

    print("KERNEL_OK")
</pallas_src>

<mosaic_0001>
module attributes {stable_mosaic.version = 11 : i64} {
  func.func @kernel(%arg0: i32, %arg1: memref<8x16x32xbf16, #tpu.memory_space<vmem>>, %arg2: memref<32x128xf32, #tpu.memory_space<vmem>>, %arg3: memref<128x128xf32, #tpu.memory_space<vmem>>, %arg4: memref<4x128xf32, #tpu.memory_space<vmem>>, %arg5: memref<4x128xf32, #tpu.memory_space<vmem>>, %arg6: memref<16x128xf32, #tpu.memory_space<vmem>>, %arg7: memref<8x16x128xf32, #tpu.memory_space<vmem>>) attributes {dimension_semantics = [#tpu.dimension_semantics<parallel>], iteration_bounds = array<i64: 1>, scalar_prefetch = 0 : i64, scratch_operands = 1 : i64, tpu.core_type = #tpu.core_type<tc>, window_params = [{transform_indices = @transform_0, window_bounds = array<i64: 8, 16, 32>}, {pipeline_mode = #tpu.pipeline_mode<synchronous>, transform_indices = @transform_1, window_bounds = array<i64: 32, 128>}, {pipeline_mode = #tpu.pipeline_mode<synchronous>, transform_indices = @transform_2, window_bounds = array<i64: 128, 128>}, {pipeline_mode = #tpu.pipeline_mode<synchronous>, transform_indices = @transform_3, window_bounds = array<i64: 4, 128>}, {pipeline_mode = #tpu.pipeline_mode<synchronous>, transform_indices = @transform_4, window_bounds = array<i64: 4, 128>}, {transform_indices = @transform_5, window_bounds = array<i64: 16, 128>}]} {
    %c0 = arith.constant 0 : index
    %c0_0 = arith.constant 0 : index
    %0 = vector.load %arg4[%c0, %c0_0] : memref<4x128xf32, #tpu.memory_space<vmem>>, vector<4x128xf32>
    %c0_1 = arith.constant 0 : index
    %c0_2 = arith.constant 0 : index
    %1 = vector.load %arg5[%c0_1, %c0_2] : memref<4x128xf32, #tpu.memory_space<vmem>>, vector<4x128xf32>
    %2 = vector.extract_strided_slice %0 {offsets = [0, 0], sizes = [1, 128], strides = [1, 1]} : vector<4x128xf32> to vector<1x128xf32>
    %3 = vector.shape_cast %2 : vector<1x128xf32> to vector<1x128xf32>
    %4 = vector.broadcast %3 : vector<1x128xf32> to vector<16x128xf32>
    %5 = vector.extract_strided_slice %0 {offsets = [1, 0], sizes = [1, 128], strides = [1, 1]} : vector<4x128xf32> to vector<1x128xf32>
    %6 = vector.shape_cast %5 : vector<1x128xf32> to vector<1x128xf32>
    %7 = vector.broadcast %6 : vector<1x128xf32> to vector<16x128xf32>
    %8 = vector.extract_strided_slice %0 {offsets = [2, 0], sizes = [1, 128], strides = [1, 1]} : vector<4x128xf32> to vector<1x128xf32>
    %9 = vector.shape_cast %8 : vector<1x128xf32> to vector<1x128xf32>
    %10 = vector.broadcast %9 : vector<1x128xf32> to vector<16x128xf32>
    %11 = vector.extract_strided_slice %1 {offsets = [0, 0], sizes = [1, 128], strides = [1, 1]} : vector<4x128xf32> to vector<1x128xf32>
    %12 = vector.shape_cast %11 : vector<1x128xf32> to vector<1x128xf32>
    %13 = vector.broadcast %12 : vector<1x128xf32> to vector<16x128xf32>
    %14 = vector.extract_strided_slice %1 {offsets = [1, 0], sizes = [1, 128], strides = [1, 1]} : vector<4x128xf32> to vector<1x128xf32>
    %15 = vector.shape_cast %14 : vector<1x128xf32> to vector<1x128xf32>
    %16 = vector.broadcast %15 : vector<1x128xf32> to vector<16x128xf32>
    %17 = vector.extract_strided_slice %1 {offsets = [2, 0], sizes = [1, 128], strides = [1, 1]} : vector<4x128xf32> to vector<1x128xf32>
    %18 = vector.shape_cast %17 : vector<1x128xf32> to vector<1x128xf32>
    %19 = vector.broadcast %18 : vector<1x128xf32> to vector<16x128xf32>
    %20 = vector.extract_strided_slice %1 {offsets = [3, 0], sizes = [1, 128], strides = [1, 1]} : vector<4x128xf32> to vector<1x128xf32>
    %21 = vector.shape_cast %20 : vector<1x128xf32> to vector<1x128xf32>
    %22 = vector.broadcast %21 : vector<1x128xf32> to vector<16x128xf32>
    %c0_3 = arith.constant 0 : index
    %c0_4 = arith.constant 0 : index
    %23 = vector.load %arg3[%c0_3, %c0_4] : memref<128x128xf32, #tpu.memory_space<vmem>>, vector<128x128xf32>
    %c0_5 = arith.constant 0 : index
    %c0_6 = arith.constant 0 : index
    %c0_7 = arith.constant 0 : index
    %24 = vector.load %arg1[%c0_5, %c0_6, %c0_7] : memref<8x16x32xbf16, #tpu.memory_space<vmem>>, vector<8x16x32xbf16>
    %25 = arith.extf %24 : vector<8x16x32xbf16> to vector<8x16x32xf32>
    %26 = vector.shape_cast %25 : vector<8x16x32xf32> to vector<128x32xf32>
    %c0_8 = arith.constant 0 : index
    %c0_9 = arith.constant 0 : index
    %27 = vector.load %arg2[%c0_8, %c0_9] : memref<32x128xf32, #tpu.memory_space<vmem>>, vector<32x128xf32>
    %cst = arith.constant dense<0.000000e+00> : vector<128x128xf32>
    %28 = tpu.matmul %26, %27, %cst {dimension_numbers = #tpu.dot_dimension_numbers<[1], [0], [0], [1], [0, 0, 1, 1], [], []>, precision = #tpu.contract_precision<fp32>} : vector<128x32xf32>, vector<32x128xf32>, vector<128x128xf32> -> vector<128x128xf32>
    %29 = vector.extract_strided_slice %0 {offsets = [3, 0], sizes = [1, 128], strides = [1, 1]} : vector<4x128xf32> to vector<1x128xf32>
    %30 = vector.shape_cast %29 : vector<1x128xf32> to vector<1x128xf32>
    %31 = vector.broadcast %30 : vector<1x128xf32> to vector<128x128xf32>
    %32 = arith.addf %28, %31 : vector<128x128xf32>
    %33 = vector.shape_cast %32 : vector<128x128xf32> to vector<8x16x128xf32>
    %c0_10 = arith.constant 0 : index
    %c0_11 = arith.constant 0 : index
    %c0_12 = arith.constant 0 : index
    %34 = vector.load %arg7[%c0_10, %c0_11, %c0_12] : memref<8x16x128xf32, #tpu.memory_space<vmem>>, vector<8x16x128xf32>
    tpu.vector_store %arg7[%c0_10, %c0_11, %c0_12], %33 {strides = array<i32>} : memref<8x16x128xf32, #tpu.memory_space<vmem>>, vector<8x16x128xf32>,
    %cst_13 = arith.constant 0.000000e+00 : f32
    %35 = vector.broadcast %cst_13 : f32 to vector<16x128xf32>
    %cst_14 = arith.constant 0.000000e+00 : f32
    %36 = vector.broadcast %cst_14 : f32 to vector<16x128xf32>
    %c0_15 = arith.constant 0 : index
    %c0_16 = arith.constant 0 : index
    %c0_17 = arith.constant 0 : index
    %37 = vector.load %arg7[%c0_15, %c0_16, %c0_17] : memref<8x16x128xf32, #tpu.memory_space<vmem>>, vector<1x16x128xf32>
    %38 = vector.shape_cast %37 : vector<1x16x128xf32> to vector<16x128xf32>
    %39 = arith.mulf %35, %7 : vector<16x128xf32>
    %40 = arith.mulf %4, %35 : vector<16x128xf32>
    %cst_18 = arith.constant 1.000000e+00 : f32
    %41 = vector.broadcast %cst_18 : f32 to vector<16x128xf32>
    %42 = arith.subf %41, %40 : vector<16x128xf32>
    %43 = arith.mulf %42, %38 : vector<16x128xf32>
    %44 = arith.addf %39, %43 : vector<16x128xf32>
    %45 = arith.mulf %10, %35 : vector<16x128xf32>
    %cst_19 = arith.constant 1.000000e+00 : f32
    %46 = vector.broadcast %cst_19 : f32 to vector<16x128xf32>
    %47 = arith.subf %46, %35 : vector<16x128xf32>
    %48 = arith.mulf %45, %47 : vector<16x128xf32>
    %49 = arith.addf %48, %44 : vector<16x128xf32>
    %cst_20 = arith.constant 5.000000e-01 : f32
    %50 = vector.broadcast %cst_20 : f32 to vector<16x128xf32>
    %51 = arith.cmpf ogt, %49, %50 : vector<16x128xf32>
    %52 = arith.extui %51 : vector<16x128xi1> to vector<16x128xi32>
    %53 = arith.sitofp %52 : vector<16x128xi32> to vector<16x128xf32>
    %cst_21 = arith.constant dense<0.000000e+00> : vector<16x128xf32>
    %54 = tpu.matmul %53, %23, %cst_21 {dimension_numbers = #tpu.dot_dimension_numbers<[1], [0], [0], [1], [0, 0, 1, 1], [], []>, precision = #tpu.contract_precision<fp32>} : vector<16x128xf32>, vector<128x128xf32>, vector<16x128xf32> -> vector<16x128xf32>
    %55 = arith.addf %54, %22 : vector<16x128xf32>
    %56 = arith.mulf %36, %16 : vector<16x128xf32>
    %57 = arith.mulf %13, %36 : vector<16x128xf32>
    %cst_22 = arith.constant 1.000000e+00 : f32
    %58 = vector.broadcast %cst_22 : f32 to vector<16x128xf32>
    %59 = arith.subf %58, %57 : vector<16x128xf32>
    %60 = arith.mulf %59, %55 : vector<16x128xf32>
    %61 = arith.addf %56, %60 : vector<16x128xf32>
    %62 = arith.mulf %19, %36 : vector<16x128xf32>
    %cst_23 = arith.constant 1.000000e+00 : f32
    %63 = vector.broadcast %cst_23 : f32 to vector<16x128xf32>
    %64 = arith.subf %63, %36 : vector<16x128xf32>
    %65 = arith.mulf %62, %64 : vector<16x128xf32>
    %66 = arith.addf %65, %61 : vector<16x128xf32>
    %cst_24 = arith.constant 5.000000e-01 : f32
    %67 = vector.broadcast %cst_24 : f32 to vector<16x128xf32>
    %68 = arith.cmpf ogt, %66, %67 : vector<16x128xf32>
    %69 = arith.extui %68 : vector<16x128xi1> to vector<16x128xi32>
    %70 = arith.sitofp %69 : vector<16x128xi32> to vector<16x128xf32>
    %71 = arith.addf %36, %70 : vector<16x128xf32>
    %c1 = arith.constant 1 : index
    %c0_25 = arith.constant 0 : index
    %c0_26 = arith.constant 0 : index
    %72 = vector.load %arg7[%c1, %c0_25, %c0_26] : memref<8x16x128xf32, #tpu.memory_space<vmem>>, vector<1x16x128xf32>
    %73 = vector.shape_cast %72 : vector<1x16x128xf32> to vector<16x128xf32>
    %74 = arith.mulf %44, %7 : vector<16x128xf32>
    %75 = arith.mulf %4, %49 : vector<16x128xf32>
    %cst_27 = arith.constant 1.000000e+00 : f32
    %76 = vector.broadcast %cst_27 : f32 to vector<16x128xf32>
    %77 = arith.subf %76, %75 : vector<16x128xf32>
    %78 = arith.mulf %77, %73 : vector<16x128xf32>
    %79 = arith.addf %74, %78 : vector<16x128xf32>
    %80 = arith.mulf %10, %49 : vector<16x128xf32>
    %cst_28 = arith.constant 1.000000e+00 : f32
    %81 = vector.broadcast %cst_28 : f32 to vector<16x128xf32>
    %82 = arith.subf %81, %53 : vector<16x128xf32>
    %83 = arith.mulf %80, %82 : vector<16x128xf32>
    %84 = arith.addf %83, %79 : vector<16x128xf32>
    %cst_29 = arith.constant 5.000000e-01 : f32
    %85 = vector.broadcast %cst_29 : f32 to vector<16x128xf32>
    %86 = arith.cmpf ogt, %84, %85 : vector<16x128xf32>
    %87 = arith.extui %86 : vector<16x128xi1> to vector<16x128xi32>
    %88 = arith.sitofp %87 : vector<16x128xi32> to vector<16x128xf32>
    %cst_30 = arith.constant dense<0.000000e+00> : vector<16x128xf32>
    %89 = tpu.matmul %88, %23, %cst_30 {dimension_numbers = #tpu.dot_dimension_numbers<[1], [0], [0], [1], [0, 0, 1, 1], [], []>, precision = #tpu.contract_precision<fp32>} : vector<16x128xf32>, vector<128x128xf32>, vector<16x128xf32> -> vector<16x128xf32>
    %90 = arith.addf %89, %22 : vector<16x128xf32>
    %91 = arith.mulf %61, %16 : vector<16x128xf32>
    %92 = arith.mulf %13, %66 : vector<16x128xf32>
    %cst_31 = arith.constant 1.000000e+00 : f32
    %93 = vector.broadcast %cst_31 : f32 to vector<16x128xf32>
    %94 = arith.subf %93, %92 : vector<16x128xf32>
    %95 = arith.mulf %94, %90 : vector<16x128xf32>
    %96 = arith.addf %91, %95 : vector<16x128xf32>
    %97 = arith.mulf %19, %66 : vector<16x128xf32>
    %cst_32 = arith.constant 1.000000e+00 : f32
    %98 = vector.broadcast %cst_32 : f32 to vector<16x128xf32>
    %99 = arith.subf %98, %70 : vector<16x128xf32>
    %100 = arith.mulf %97, %99 : vector<16x128xf32>
    %101 = arith.addf %100, %96 : vector<16x128xf32>
    %cst_33 = arith.constant 5.000000e-01 : f32
    %102 = vector.broadcast %cst_33 : f32 to vector<16x128xf32>
    %103 = arith.cmpf ogt, %101, %102 : vector<16x128xf32>
    %104 = arith.extui %103 : vector<16x128xi1> to vector<16x128xi32>
    %105 = arith.sitofp %104 : vector<16x128xi32> to vector<16x128xf32>
    %106 = arith.addf %71, %105 : vector<16x128xf32>
    %c2 = arith.constant 2 : index
    %c0_34 = arith.constant 0 : index
    %c0_35 = arith.constant 0 : index
    %107 = vector.load %arg7[%c2, %c0_34, %c0_35] : memref<8x16x128xf32, #tpu.memory_space<vmem>>, vector<1x16x128xf32>
    %108 = vector.shape_cast %107 : vector<1x16x128xf32> to vector<16x128xf32>
    %109 = arith.mulf %79, %7 : vector<16x128xf32>
    %110 = arith.mulf %4, %84 : vector<16x128xf32>
    %cst_36 = arith.constant 1.000000e+00 : f32
    %111 = vector.broadcast %cst_36 : f32 to vector<16x128xf32>
    %112 = arith.subf %111, %110 : vector<16x128xf32>
    %113 = arith.mulf %112, %108 : vector<16x128xf32>
    %114 = arith.addf %109, %113 : vector<16x128xf32>
    %115 = arith.mulf %10, %84 : vector<16x128xf32>
    %cst_37 = arith.constant 1.000000e+00 : f32
    %116 = vector.broadcast %cst_37 : f32 to vector<16x128xf32>
    %117 = arith.subf %116, %88 : vector<16x128xf32>
    %118 = arith.mulf %115, %117 : vector<16x128xf32>
    %119 = arith.addf %118, %114 : vector<16x128xf32>
    %cst_38 = arith.constant 5.000000e-01 : f32
    %120 = vector.broadcast %cst_38 : f32 to vector<16x128xf32>
    %121 = arith.cmpf ogt, %119, %120 : vector<16x128xf32>
    %122 = arith.extui %121 : vector<16x128xi1> to vector<16x128xi32>
    %123 = arith.sitofp %122 : vector<16x128xi32> to vector<16x128xf32>
    %cst_39 = arith.constant dense<0.000000e+00> : vector<16x128xf32>
    %124 = tpu.matmul %123, %23, %cst_39 {dimension_numbers = #tpu.dot_dimension_numbers<[1], [0], [0], [1], [0, 0, 1, 1], [], []>, precision = #tpu.contract_precision<fp32>} : vector<16x128xf32>, vector<128x128xf32>, vector<16x128xf32> -> vector<16x128xf32>
    %125 = arith.addf %124, %22 : vector<16x128xf32>
    %126 = arith.mulf %96, %16 : vector<16x128xf32>
    %127 = arith.mulf %13, %101 : vector<16x128xf32>
    %cst_40 = arith.constant 1.000000e+00 : f32
    %128 = vector.broadcast %cst_40 : f32 to vector<16x128xf32>
    %129 = arith.subf %128, %127 : vector<16x128xf32>
    %130 = arith.mulf %129, %125 : vector<16x128xf32>
    %131 = arith.addf %126, %130 : vector<16x128xf32>
    %132 = arith.mulf %19, %101 : vector<16x128xf32>
    %cst_41 = arith.constant 1.000000e+00 : f32
    %133 = vector.broadcast %cst_41 : f32 to vector<16x128xf32>
    %134 = arith.subf %133, %105 : vector<16x128xf32>
    %135 = arith.mulf %132, %134 : vector<16x128xf32>
    %136 = arith.addf %135, %131 : vector<16x128xf32>
    %cst_42 = arith.constant 5.000000e-01 : f32
    %137 = vector.broadcast %cst_42 : f32 to vector<16x128xf32>
    %138 = arith.cmpf ogt, %136, %137 : vector<16x128xf32>
    %139 = arith.extui %138 : vector<16x128xi1> to vector<16x128xi32>
    %140 = arith.sitofp %139 : vector<16x128xi32> to vector<16x128xf32>
    %141 = arith.addf %106, %140 : vector<16x128xf32>
    %c3 = arith.constant 3 : index
    %c0_43 = arith.constant 0 : index
    %c0_44 = arith.constant 0 : index
    %142 = vector.load %arg7[%c3, %c0_43, %c0_44] : memref<8x16x128xf32, #tpu.memory_space<vmem>>, vector<1x16x128xf32>
    %143 = vector.shape_cast %142 : vector<1x16x128xf32> to vector<16x128xf32>
    %144 = arith.mulf %114, %7 : vector<16x128xf32>
    %145 = arith.mulf %4, %119 : vector<16x128xf32>
    %cst_45 = arith.constant 1.000000e+00 : f32
    %146 = vector.broadcast %cst_45 : f32 to vector<16x128xf32>
    %147 = arith.subf %146, %145 : vector<16x128xf32>
    %148 = arith.mulf %147, %143 : vector<16x128xf32>
    %149 = arith.addf %144, %148 : vector<16x128xf32>
    %150 = arith.mulf %10, %119 : vector<16x128xf32>
    %cst_46 = arith.constant 1.000000e+00 : f32
    %151 = vector.broadcast %cst_46 : f32 to vector<16x128xf32>
    %152 = arith.subf %151, %123 : vector<16x128xf32>
    %153 = arith.mulf %150, %152 : vector<16x128xf32>
    %154 = arith.addf %153, %149 : vector<16x128xf32>
    %cst_47 = arith.constant 5.000000e-01 : f32
    %155 = vector.broadcast %cst_47 : f32 to vector<16x128xf32>
    %156 = arith.cmpf ogt, %154, %155 : vector<16x128xf32>
    %157 = arith.extui %156 : vector<16x128xi1> to vector<16x128xi32>
    %158 = arith.sitofp %157 : vector<16x128xi32> to vector<16x128xf32>
    %cst_48 = arith.constant dense<0.000000e+00> : vector<16x128xf32>
    %159 = tpu.matmul %158, %23, %cst_48 {dimension_numbers = #tpu.dot_dimension_numbers<[1], [0], [0], [1], [0, 0, 1, 1], [], []>, precision = #tpu.contract_precision<fp32>} : vector<16x128xf32>, vector<128x128xf32>, vector<16x128xf32> -> vector<16x128xf32>
    %160 = arith.addf %159, %22 : vector<16x128xf32>
    %161 = arith.mulf %131, %16 : vector<16x128xf32>
    %162 = arith.mulf %13, %136 : vector<16x128xf32>
    %cst_49 = arith.constant 1.000000e+00 : f32
    %163 = vector.broadcast %cst_49 : f32 to vector<16x128xf32>
    %164 = arith.subf %163, %162 : vector<16x128xf32>
    %165 = arith.mulf %164, %160 : vector<16x128xf32>
    %166 = arith.addf %161, %165 : vector<16x128xf32>
    %167 = arith.mulf %19, %136 : vector<16x128xf32>
    %cst_50 = arith.constant 1.000000e+00 : f32
    %168 = vector.broadcast %cst_50 : f32 to vector<16x128xf32>
    %169 = arith.subf %168, %140 : vector<16x128xf32>
    %170 = arith.mulf %167, %169 : vector<16x128xf32>
    %171 = arith.addf %170, %166 : vector<16x128xf32>
    %cst_51 = arith.constant 5.000000e-01 : f32
    %172 = vector.broadcast %cst_51 : f32 to vector<16x128xf32>
    %173 = arith.cmpf ogt, %171, %172 : vector<16x128xf32>
    %174 = arith.extui %173 : vector<16x128xi1> to vector<16x128xi32>
    %175 = arith.sitofp %174 : vector<16x128xi32> to vector<16x128xf32>
    %176 = arith.addf %141, %175 : vector<16x128xf32>
    %c4 = arith.constant 4 : index
    %c0_52 = arith.constant 0 : index
    %c0_53 = arith.constant 0 : index
    %177 = vector.load %arg7[%c4, %c0_52, %c0_53] : memref<8x16x128xf32, #tpu.memory_space<vmem>>, vector<1x16x128xf32>
    %178 = vector.shape_cast %177 : vector<1x16x128xf32> to vector<16x128xf32>
    %179 = arith.mulf %149, %7 : vector<16x128xf32>
    %180 = arith.mulf %4, %154 : vector<16x128xf32>
    %cst_54 = arith.constant 1.000000e+00 : f32
    %181 = vector.broadcast %cst_54 : f32 to vector<16x128xf32>
    %182 = arith.subf %181, %180 : vector<16x128xf32>
    %183 = arith.mulf %182, %178 : vector<16x128xf32>
    %184 = arith.addf %179, %183 : vector<16x128xf32>
    %185 = arith.mulf %10, %154 : vector<16x128xf32>
    %cst_55 = arith.constant 1.000000e+00 : f32
    %186 = vector.broadcast %cst_55 : f32 to vector<16x128xf32>
    %187 = arith.subf %186, %158 : vector<16x128xf32>
    %188 = arith.mulf %185, %187 : vector<16x128xf32>
    %189 = arith.addf %188, %184 : vector<16x128xf32>
    %cst_56 = arith.constant 5.000000e-01 : f32
    %190 = vector.broadcast %cst_56 : f32 to vector<16x128xf32>
    %191 = arith.cmpf ogt, %189, %190 : vector<16x128xf32>
    %192 = arith.extui %191 : vector<16x128xi1> to vector<16x128xi32>
    %193 = arith.sitofp %192 : vector<16x128xi32> to vector<16x128xf32>
    %cst_57 = arith.constant dense<0.000000e+00> : vector<16x128xf32>
    %194 = tpu.matmul %193, %23, %cst_57 {dimension_numbers = #tpu.dot_dimension_numbers<[1], [0], [0], [1], [0, 0, 1, 1], [], []>, precision = #tpu.contract_precision<fp32>} : vector<16x128xf32>, vector<128x128xf32>, vector<16x128xf32> -> vector<16x128xf32>
    %195 = arith.addf %194, %22 : vector<16x128xf32>
    %196 = arith.mulf %166, %16 : vector<16x128xf32>
    %197 = arith.mulf %13, %171 : vector<16x128xf32>
    %cst_58 = arith.constant 1.000000e+00 : f32
    %198 = vector.broadcast %cst_58 : f32 to vector<16x128xf32>
    %199 = arith.subf %198, %197 : vector<16x128xf32>
    %200 = arith.mulf %199, %195 : vector<16x128xf32>
    %201 = arith.addf %196, %200 : vector<16x128xf32>
    %202 = arith.mulf %19, %171 : vector<16x128xf32>
    %cst_59 = arith.constant 1.000000e+00 : f32
    %203 = vector.broadcast %cst_59 : f32 to vector<16x128xf32>
    %204 = arith.subf %203, %175 : vector<16x128xf32>
    %205 = arith.mulf %202, %204 : vector<16x128xf32>
    %206 = arith.addf %205, %201 : vector<16x128xf32>
    %cst_60 = arith.constant 5.000000e-01 : f32
    %207 = vector.broadcast %cst_60 : f32 to vector<16x128xf32>
    %208 = arith.cmpf ogt, %206, %207 : vector<16x128xf32>
    %209 = arith.extui %208 : vector<16x128xi1> to vector<16x128xi32>
    %210 = arith.sitofp %209 : vector<16x128xi32> to vector<16x128xf32>
    %211 = arith.addf %176, %210 : vector<16x128xf32>
    %c5 = arith.constant 5 : index
    %c0_61 = arith.constant 0 : index
    %c0_62 = arith.constant 0 : index
    %212 = vector.load %arg7[%c5, %c0_61, %c0_62] : memref<8x16x128xf32, #tpu.memory_space<vmem>>, vector<1x16x128xf32>
    %213 = vector.shape_cast %212 : vector<1x16x128xf32> to vector<16x128xf32>
    %214 = arith.mulf %184, %7 : vector<16x128xf32>
    %215 = arith.mulf %4, %189 : vector<16x128xf32>
    %cst_63 = arith.constant 1.000000e+00 : f32
    %216 = vector.broadcast %cst_63 : f32 to vector<16x128xf32>
    %217 = arith.subf %216, %215 : vector<16x128xf32>
    %218 = arith.mulf %217, %213 : vector<16x128xf32>
    %219 = arith.addf %214, %218 : vector<16x128xf32>
    %220 = arith.mulf %10, %189 : vector<16x128xf32>
    %cst_64 = arith.constant 1.000000e+00 : f32
    %221 = vector.broadcast %cst_64 : f32 to vector<16x128xf32>
    %222 = arith.subf %221, %193 : vector<16x128xf32>
    %223 = arith.mulf %220, %222 : vector<16x128xf32>
    %224 = arith.addf %223, %219 : vector<16x128xf32>
    %cst_65 = arith.constant 5.000000e-01 : f32
    %225 = vector.broadcast %cst_65 : f32 to vector<16x128xf32>
    %226 = arith.cmpf ogt, %224, %225 : vector<16x128xf32>
    %227 = arith.extui %226 : vector<16x128xi1> to vector<16x128xi32>
    %228 = arith.sitofp %227 : vector<16x128xi32> to vector<16x128xf32>
    %cst_66 = arith.constant dense<0.000000e+00> : vector<16x128xf32>
    %229 = tpu.matmul %228, %23, %cst_66 {dimension_numbers = #tpu.dot_dimension_numbers<[1], [0], [0], [1], [0, 0, 1, 1], [], []>, precision = #tpu.contract_precision<fp32>} : vector<16x128xf32>, vector<128x128xf32>, vector<16x128xf32> -> vector<16x128xf32>
    %230 = arith.addf %229, %22 : vector<16x128xf32>
    %231 = arith.mulf %201, %16 : vector<16x128xf32>
    %232 = arith.mulf %13, %206 : vector<16x128xf32>
    %cst_67 = arith.constant 1.000000e+00 : f32
    %233 = vector.broadcast %cst_67 : f32 to vector<16x128xf32>
    %234 = arith.subf %233, %232 : vector<16x128xf32>
    %235 = arith.mulf %234, %230 : vector<16x128xf32>
    %236 = arith.addf %231, %235 : vector<16x128xf32>
    %237 = arith.mulf %19, %206 : vector<16x128xf32>
    %cst_68 = arith.constant 1.000000e+00 : f32
    %238 = vector.broadcast %cst_68 : f32 to vector<16x128xf32>
    %239 = arith.subf %238, %210 : vector<16x128xf32>
    %240 = arith.mulf %237, %239 : vector<16x128xf32>
    %241 = arith.addf %240, %236 : vector<16x128xf32>
    %cst_69 = arith.constant 5.000000e-01 : f32
    %242 = vector.broadcast %cst_69 : f32 to vector<16x128xf32>
    %243 = arith.cmpf ogt, %241, %242 : vector<16x128xf32>
    %244 = arith.extui %243 : vector<16x128xi1> to vector<16x128xi32>
    %245 = arith.sitofp %244 : vector<16x128xi32> to vector<16x128xf32>
    %246 = arith.addf %211, %245 : vector<16x128xf32>
    %c6 = arith.constant 6 : index
    %c0_70 = arith.constant 0 : index
    %c0_71 = arith.constant 0 : index
    %247 = vector.load %arg7[%c6, %c0_70, %c0_71] : memref<8x16x128xf32, #tpu.memory_space<vmem>>, vector<1x16x128xf32>
    %248 = vector.shape_cast %247 : vector<1x16x128xf32> to vector<16x128xf32>
    %249 = arith.mulf %219, %7 : vector<16x128xf32>
    %250 = arith.mulf %4, %224 : vector<16x128xf32>
    %cst_72 = arith.constant 1.000000e+00 : f32
    %251 = vector.broadcast %cst_72 : f32 to vector<16x128xf32>
    %252 = arith.subf %251, %250 : vector<16x128xf32>
    %253 = arith.mulf %252, %248 : vector<16x128xf32>
    %254 = arith.addf %249, %253 : vector<16x128xf32>
    %255 = arith.mulf %10, %224 : vector<16x128xf32>
    %cst_73 = arith.constant 1.000000e+00 : f32
    %256 = vector.broadcast %cst_73 : f32 to vector<16x128xf32>
    %257 = arith.subf %256, %228 : vector<16x128xf32>
    %258 = arith.mulf %255, %257 : vector<16x128xf32>
    %259 = arith.addf %258, %254 : vector<16x128xf32>
    %cst_74 = arith.constant 5.000000e-01 : f32
    %260 = vector.broadcast %cst_74 : f32 to vector<16x128xf32>
    %261 = arith.cmpf ogt, %259, %260 : vector<16x128xf32>
    %262 = arith.extui %261 : vector<16x128xi1> to vector<16x128xi32>
    %263 = arith.sitofp %262 : vector<16x128xi32> to vector<16x128xf32>
    %cst_75 = arith.constant dense<0.000000e+00> : vector<16x128xf32>
    %264 = tpu.matmul %263, %23, %cst_75 {dimension_numbers = #tpu.dot_dimension_numbers<[1], [0], [0], [1], [0, 0, 1, 1], [], []>, precision = #tpu.contract_precision<fp32>} : vector<16x128xf32>, vector<128x128xf32>, vector<16x128xf32> -> vector<16x128xf32>
    %265 = arith.addf %264, %22 : vector<16x128xf32>
    %266 = arith.mulf %236, %16 : vector<16x128xf32>
    %267 = arith.mulf %13, %241 : vector<16x128xf32>
    %cst_76 = arith.constant 1.000000e+00 : f32
    %268 = vector.broadcast %cst_76 : f32 to vector<16x128xf32>
    %269 = arith.subf %268, %267 : vector<16x128xf32>
    %270 = arith.mulf %269, %265 : vector<16x128xf32>
    %271 = arith.addf %266, %270 : vector<16x128xf32>
    %272 = arith.mulf %19, %241 : vector<16x128xf32>
    %cst_77 = arith.constant 1.000000e+00 : f32
    %273 = vector.broadcast %cst_77 : f32 to vector<16x128xf32>
    %274 = arith.subf %273, %245 : vector<16x128xf32>
    %275 = arith.mulf %272, %274 : vector<16x128xf32>
    %276 = arith.addf %275, %271 : vector<16x128xf32>
    %cst_78 = arith.constant 5.000000e-01 : f32
    %277 = vector.broadcast %cst_78 : f32 to vector<16x128xf32>
    %278 = arith.cmpf ogt, %276, %277 : vector<16x128xf32>
    %279 = arith.extui %278 : vector<16x128xi1> to vector<16x128xi32>
    %280 = arith.sitofp %279 : vector<16x128xi32> to vector<16x128xf32>
    %281 = arith.addf %246, %280 : vector<16x128xf32>
    %c7 = arith.constant 7 : index
    %c0_79 = arith.constant 0 : index
    %c0_80 = arith.constant 0 : index
    %282 = vector.load %arg7[%c7, %c0_79, %c0_80] : memref<8x16x128xf32, #tpu.memory_space<vmem>>, vector<1x16x128xf32>
    %283 = vector.shape_cast %282 : vector<1x16x128xf32> to vector<16x128xf32>
    %284 = arith.mulf %254, %7 : vector<16x128xf32>
    %285 = arith.mulf %4, %259 : vector<16x128xf32>
    %cst_81 = arith.constant 1.000000e+00 : f32
    %286 = vector.broadcast %cst_81 : f32 to vector<16x128xf32>
    %287 = arith.subf %286, %285 : vector<16x128xf32>
    %288 = arith.mulf %287, %283 : vector<16x128xf32>
    %289 = arith.addf %284, %288 : vector<16x128xf32>
    %290 = arith.mulf %10, %259 : vector<16x128xf32>
    %cst_82 = arith.constant 1.000000e+00 : f32
    %291 = vector.broadcast %cst_82 : f32 to vector<16x128xf32>
    %292 = arith.subf %291, %263 : vector<16x128xf32>
    %293 = arith.mulf %290, %292 : vector<16x128xf32>
    %294 = arith.addf %293, %289 : vector<16x128xf32>
    %cst_83 = arith.constant 5.000000e-01 : f32
    %295 = vector.broadcast %cst_83 : f32 to vector<16x128xf32>
    %296 = arith.cmpf ogt, %294, %295 : vector<16x128xf32>
    %297 = arith.extui %296 : vector<16x128xi1> to vector<16x128xi32>
    %298 = arith.sitofp %297 : vector<16x128xi32> to vector<16x128xf32>
    %cst_84 = arith.constant dense<0.000000e+00> : vector<16x128xf32>
    %299 = tpu.matmul %298, %23, %cst_84 {dimension_numbers = #tpu.dot_dimension_numbers<[1], [0], [0], [1], [0, 0, 1, 1], [], []>, precision = #tpu.contract_precision<fp32>} : vector<16x128xf32>, vector<128x128xf32>, vector<16x128xf32> -> vector<16x128xf32>
    %300 = arith.addf %299, %22 : vector<16x128xf32>
    %301 = arith.mulf %271, %16 : vector<16x128xf32>
    %302 = arith.mulf %13, %276 : vector<16x128xf32>
    %cst_85 = arith.constant 1.000000e+00 : f32
    %303 = vector.broadcast %cst_85 : f32 to vector<16x128xf32>
    %304 = arith.subf %303, %302 : vector<16x128xf32>
    %305 = arith.mulf %304, %300 : vector<16x128xf32>
    %306 = arith.addf %301, %305 : vector<16x128xf32>
    %307 = arith.mulf %19, %276 : vector<16x128xf32>
    %cst_86 = arith.constant 1.000000e+00 : f32
    %308 = vector.broadcast %cst_86 : f32 to vector<16x128xf32>
    %309 = arith.subf %308, %280 : vector<16x128xf32>
    %310 = arith.mulf %307, %309 : vector<16x128xf32>
    %311 = arith.addf %310, %306 : vector<16x128xf32>
    %cst_87 = arith.constant 5.000000e-01 : f32
    %312 = vector.broadcast %cst_87 : f32 to vector<16x128xf32>
    %313 = arith.cmpf ogt, %311, %312 : vector<16x128xf32>
    %314 = arith.extui %313 : vector<16x128xi1> to vector<16x128xi32>
    %315 = arith.sitofp %314 : vector<16x128xi32> to vector<16x128xf32>
    %316 = arith.addf %281, %315 : vector<16x128xf32>
    %cst_88 = arith.constant 1.250000e-01 : f32
    %317 = vector.broadcast %cst_88 : f32 to vector<16x128xf32>
    %318 = arith.mulf %316, %317 : vector<16x128xf32>
    %c0_89 = arith.constant 0 : index
    %c0_90 = arith.constant 0 : index
    %319 = vector.load %arg6[%c0_89, %c0_90] : memref<16x128xf32, #tpu.memory_space<vmem>>, vector<16x128xf32>
    tpu.vector_store %arg6[%c0_89, %c0_90], %318 {strides = array<i32>} : memref<16x128xf32, #tpu.memory_space<vmem>>, vector<16x128xf32>,
    return
  }
  func.func @transform_0(%arg0: i32) -> (i32, i32, i32) {
    %c0_i32 = arith.constant 0 : i32
    %c0_i32_0 = arith.constant 0 : i32
    %c0_i32_1 = arith.constant 0 : i32
    return %c0_i32, %arg0, %c0_i32_0 : i32, i32, i32
  }
  func.func @transform_1(%arg0: i32) -> (i32, i32) {
    %c0_i32 = arith.constant 0 : i32
    %c0_i32_0 = arith.constant 0 : i32
    %c0_i32_1 = arith.constant 0 : i32
    return %c0_i32, %c0_i32_0 : i32, i32
  }
  func.func @transform_2(%arg0: i32) -> (i32, i32) {
    %c0_i32 = arith.constant 0 : i32
    %c0_i32_0 = arith.constant 0 : i32
    %c0_i32_1 = arith.constant 0 : i32
    return %c0_i32, %c0_i32_0 : i32, i32
  }
  func.func @transform_3(%arg0: i32) -> (i32, i32) {
    %c0_i32 = arith.constant 0 : i32
    %c0_i32_0 = arith.constant 0 : i32
    %c0_i32_1 = arith.constant 0 : i32
    return %c0_i32, %c0_i32_0 : i32, i32
  }
  func.func @transform_4(%arg0: i32) -> (i32, i32) {
    %c0_i32 = arith.constant 0 : i32
    %c0_i32_0 = arith.constant 0 : i32
    %c0_i32_1 = arith.constant 0 : i32
    return %c0_i32, %c0_i32_0 : i32, i32
  }
  func.func @transform_5(%arg0: i32) -> (i32, i32) {
    %c0_i32 = arith.constant 0 : i32
    %c0_i32_0 = arith.constant 0 : i32
    return %arg0, %c0_i32 : i32, i32
  }
}

</mosaic_0001>

<bundles_post_ra>
// kernel: tpu_custom_call.1
= control target key start
LH: loop header
LB: loop body
LE: loop exit
PB: predicated region body
PF: predicated region fallthrough
CT: control target
= control target key end

     0   :  { %10 = vsyncpa [#allocation4], 0  ;;  %s6752_s0 = inlined_call_operand.hbm [shape: bf16[8,16,32], index: 0, kind: input, shape index: {}]   ;;  %s6753_s1 = inlined_call_operand.hbm [shape: f32[32,128], index: 1, kind: input, shape index: {}]   ;;  %s6754_s2 = inlined_call_operand.hbm [shape: f32[128,128], index: 2, kind: input, shape index: {}]   ;;  %s6755_s3 = inlined_call_operand.hbm [shape: f32[4,128], index: 3, kind: input, shape index: {}]   ;;  %s6756_s4 = inlined_call_operand.hbm [shape: f32[4,128], index: 4, kind: input, shape index: {}]   ;;  %s6757_s5 = inlined_call_operand.hbm [shape: f32[16,128], index: 5, kind: output, shape index: {}]  }
   0x1   :  { %11 = vsyncpa [#allocation7], 0 }
   0x2   :  { %12 = vsyncpa [#allocation10], 0  ;;  %s31_s20 = sshll.u32 %s6753_s1, 4  ;;  %s32_s20 = int_to_ptr.hbm [resolvable:$true] %s31_s20 }
   0x3   :  { %13 = vsyncpa [#allocation5], 0  ;;  %s4611_s21 = smov [#allocation6]   ;;  %s58_s25 = sshll.u32 %s6755_s3, 4  ;;  %s59_s25 = int_to_ptr.hbm [resolvable:$true] %s58_s25 }
   0x4   :  { %s33_s22 = sshll.u32 %s4611_s21, 4  ;;  %s4612_s26 = smov 128   ;;  %s34_s22 = int_to_ptr.vmem [resolvable:$true] %s33_s22 }
   0x5   :  { %s4613_s27 = smov 8   ;;  %s4614_s28 = smov [#allocation9]  }
   0x6   :  { %39 = dma.hbm_to_vmem [thread:$0]  %s32_s20, 512, %s34_s22, [#allocation7], %s4612_s26, %s4612_s26, %s4613_s27  }
   0x7   :  { %s60_s29 = sshll.u32 %s4614_s28, 4  ;;  %s18_s6 = sshll.u32 %s6752_s0, 4  ;;  %s61_s29 = int_to_ptr.vmem [resolvable:$true] %s60_s29  ;;  %s19_s6 = int_to_ptr.hbm [resolvable:$true] %s18_s6 }
   0x8   :  { %63 = dma.hbm_to_vmem [thread:$0]  %s59_s25, 64, %s61_s29, [#allocation10]  }
   0x9   :  { %s4615_s7 = smov [#allocation3]   ;;  %s44_s10 = sshll.u32 %s6754_s2, 4  ;;  %s45_s10 = int_to_ptr.hbm [resolvable:$true] %s44_s10 }
   0xa   :  { %s20_s8 = sshll.u32 %s4615_s7, 4  ;;  %s4616_s11 = smov 64   ;;  %s21_s8 = int_to_ptr.vmem [resolvable:$true] %s20_s8 }
   0xb   :  { %s4617_s12 = smov 4   ;;  %s4618_s13 = smov [#allocation8]  }
   0xc   :  { %26 = dma.hbm_to_vmem [thread:$0]  %s19_s6, 1024, %s21_s8, [#allocation4], %s4616_s11, %s4616_s11, %s4617_s12  }
   0xd   :  { %s46_s14 = sshll.u32 %s4618_s13, 4  ;;  %s69_s0 = sshll.u32 %s6756_s4, 4  ;;  %s47_s14 = int_to_ptr.vmem [resolvable:$true] %s46_s14  ;;  %s70_s0 = int_to_ptr.hbm [resolvable:$true] %s69_s0 }
   0xe   :  { %52 = dma.hbm_to_vmem [thread:$0]  %s45_s10, 2048, %s47_s14, [#allocation7], %s4612_s26, %s4612_s26, %s4613_s27  }
   0xf   :  { %s4619_s17 = smov [#allocation11]  }
  0x10   :  { %s71_s18 = sshll.u32 %s4619_s17, 4  ;;  %s72_s18 = int_to_ptr.vmem [resolvable:$true] %s71_s18 }
  0x11   :  { %74 = dma.hbm_to_vmem [thread:$0]  %s70_s0, 64, %s72_s18, [#allocation10]  }
  0x12   :  { %4603 = dma.done.wait [#allocation4], 1024  }
  0x13   :  { %4604 = vsyncadd [#allocation4], 4294966272 }
  0x14   :  { %4605 = dma.done.wait [#allocation7], 2560  }
  0x15   :  { %4606 = vsyncadd [#allocation7], 4294964736 }
  0x16   :  { %4607 = dma.done.wait [#allocation10], 128  }
  0x17   :  { %4608 = vsyncadd [#allocation10], 4294967168  ;;  %v155_v0 = vld [vmem:[#allocation6 + $0x18] sm:$0xff]  ;;  %v154_v1 = vld [vmem:[#allocation6 + $0x10] sm:$0xff]  ;;  %vm157_vm0 = vcmask 261120   ;;  %s4622_s2 = smov [#allocation12]  }
  0x18   :  { %v153_v2 = vld [vmem:[#allocation6 + $0x8] sm:$0xff]  ;;  %v4674_v3 = vand.u32 4294901760, %v155_v0  ;;  %v4676_v4 = vand.u32 4294901760, %v154_v1  ;;  %v152_v6 = vld [vmem:[#allocation6] sm:$0xff]  ;;  %v4441_v44 = vld [vmem:[#allocation3 + $0x10] sm:$0xff]   ;;  %s4263_s4 = sshll.u32 %s4622_s2, 4  ;;  %s4264_s4 = int_to_ptr.vmem [resolvable:$true] %s4263_s4 }
  0x19   :  { %v4678_v5 = vand.u32 4294901760, %v153_v2  ;;  %v4409_v7 = vld [vmem:[#allocation3] sm:$0xff]   ;;  %v4680_v8 = vand.u32 4294901760, %v152_v6  ;;  %v4440_v14 = vld [vmem:[#allocation3 + $0x8] sm:$0xff]   ;;  %v4714_v47 = vunpack.c.l.bf16 %v4441_v44  ;;  %v4722_v53 = vunpack.c.h.bf16 %v4441_v44  ;;  %v4442_v57 = vld [vmem:[#allocation3 + $0x18] sm:$0xff]   ;;  %s4265_s21 = sshll.u32 %s6757_s5, 4  ;;  %s4266_s21 = int_to_ptr.hbm [resolvable:$true] %s4265_s21 }
  0x1a   :  { %v4682_v9 = vunpack.c.l.bf16 %v4409_v7  ;;  %v4684_v10 = vunpack.c.h.bf16 %v4409_v7  ;;  %219 = vmatpush.msra.mxu0 %v4674_v3  ;;  %v368_v11 = vsub.f32 %v155_v0, %v4674_v3  ;;  %v374_v12 = vsub.f32 %v154_v1, %v4676_v4  ;;  %574 = vmatpush.msra.mxu3 %v4674_v3 }
  0x1b   :  { %v380_v13 = vsub.f32 %v153_v2, %v4678_v5  ;;  %v386_v16 = vsub.f32 %v152_v6, %v4680_v8  ;;  %v4698_v24 = vunpack.c.l.bf16 %v4440_v14  ;;  %v4706_v40 = vunpack.c.h.bf16 %v4440_v14  ;;  %v4443_v6 = vld [vmem:[#allocation3 + $0x20] sm:$0xff]  }
  0x1c   :  { %v159_v15 = vsel %vm157_vm0, %v4682_v9, 0  ;;  %v162_v17 = vsel %vm157_vm0, %v4684_v10, 0  ;;  %221 = vmatpush.msra.mxu0 %v4676_v4  ;;  %470 = vmatpush.msra.mxu2 %v368_v11  ;;  %v369_v18 = vand.u32 4294901760, %v368_v11  ;;  %v375_v20 = vand.u32 4294901760, %v374_v12 }
  0x1d   :  { %v227_v19 = vsub.f32 %v159_v15, %v159_v15  ;;  %v381_v21 = vand.u32 4294901760, %v380_v13  ;;  %576 = vmatpush.msra.mxu3 %v4676_v4  ;;  %v387_v22 = vand.u32 4294901760, %v386_v16  ;;  %v235_v23 = vsub.f32 %v162_v17, %v162_v17 }
  0x1e   :  { %223 = vmatpush.msra.mxu0 %v4678_v5  ;;  %473 = vmatpush.msra.mxu2 %v374_v12  ;;  %v370_v25 = vsub.f32 %v368_v11, %v369_v18  ;;  %v376_v27 = vsub.f32 %v374_v12, %v375_v20  ;;  %v165_v34 = vsel %vm157_vm0, %v4698_v24, 0  ;;  %v168_v43 = vsel %vm157_vm0, %v4706_v40, 0 }
  0x1f   :  { %v228_v26 = vand.u32 4294901760, %v227_v19  ;;  %v382_v28 = vsub.f32 %v380_v13, %v381_v21  ;;  %578 = vmatpush.msra.mxu3 %v4678_v5  ;;  %v388_v29 = vsub.f32 %v386_v16, %v387_v22  ;;  %v236_v33 = vand.u32 4294901760, %v235_v23 }
  0x20   :  { %225 = vmatpush.msra.mxu0 %v4680_v8  ;;  %v371_v30 = vand.u32 4294901760, %v370_v25  ;;  %476 = vmatpush.msra.mxu2 %v380_v13  ;;  %v377_v32 = vand.u32 4294901760, %v376_v27  ;;  %v243_v39 = vsub.f32 %v165_v34, %v165_v34  ;;  %v251_v46 = vsub.f32 %v168_v43, %v168_v43 }
  0x21   :  { %v229_v31 = vsub.f32 %v227_v19, %v228_v26  ;;  %580 = vmatpush.msra.mxu3 %v4680_v8  ;;  %v383_v36 = vand.u32 4294901760, %v382_v28  ;;  %v389_v37 = vand.u32 4294901760, %v388_v29  ;;  %v237_v38 = vsub.f32 %v235_v23, %v236_v33 }
  0x22   :  { %693 = vmatpush.msrb.mxu0 %v369_v18  ;;  %372 = vmatpush.msra.mxu1 %v371_v30  ;;  %v244_v42 = vand.u32 4294901760, %v243_v39  ;;  %v252_v49 = vand.u32 4294901760, %v251_v46  ;;  %v171_v50 = vsel %vm157_vm0, %v4714_v47, 0  ;;  %v174_v56 = vsel %vm157_vm0, %v4722_v53, 0 }
  0x23   :  { %v230_v35 = vand.u32 4294901760, %v229_v31  ;;  %479 = vmatpush.msra.mxu2 %v386_v16  ;;  %584 = vmatmul.f32.vlgmr.msra.gmra.mxu3 %v228_v26  ;;  %v238_v41 = vand.u32 4294901760, %v237_v38  ;;  %v259_v52 = vsub.f32 %v171_v50, %v171_v50  ;;  %v267_v59 = vsub.f32 %v174_v56, %v174_v56  ;;  %v4446_v50 = vld [vmem:[#allocation3 + $0x38] sm:$0xff]  }
  0x24   :  { %482 = vmatmul.f32.vlgmr.msra.gmra.mxu2 %v227_v19  ;;  %378 = vmatpush.msra.mxu1 %v377_v32  ;;  %v245_v45 = vsub.f32 %v243_v39, %v244_v42  ;;  %v253_v51 = vsub.f32 %v251_v46, %v252_v49  ;;  %v4728_v60 = vunpack.c.l.bf16 %v4442_v57  ;;  %v4734_v2 = vunpack.c.h.bf16 %v4442_v57 }
  0x25   :  { %231 = vmatmul.f32.vlgmr.msra.gmra.mxu0 %v230_v35  ;;  %v260_v55 = vand.u32 4294901760, %v259_v52  ;;  %v268_v62 = vand.u32 4294901760, %v267_v59  ;;  %v4740_v11 = vunpack.c.l.bf16 %v4443_v6  ;;  %v4746_v17 = vunpack.c.h.bf16 %v4443_v6  ;;  %v4445_v35 = vld [vmem:[#allocation3 + $0x30] sm:$0xff]  }
  0x26   :  { %697 = vmatpush.msrb.mxu0 %v375_v20  ;;  %384 = vmatpush.msra.mxu1 %v383_v36  ;;  %v246_v48 = vand.u32 4294901760, %v245_v45  ;;  %v254_v54 = vand.u32 4294901760, %v253_v51  ;;  %v177_v63 = vsel %vm157_vm0, %v4728_v60, 0  ;;  %v4764_v38 = vunpack.c.l.bf16 %v4445_v35 }
  0x27   :  { %v261_v58 = vsub.f32 %v259_v52, %v260_v55  ;;  %v269_v0 = vsub.f32 %v267_v59, %v268_v62  ;;  %v275_v1 = vsub.f32 %v177_v63, %v177_v63  ;;  %v183_v14 = vsel %vm157_vm0, %v4740_v11, 0 }
  0x28   :  { %701 = vmatpush.msrb.mxu0 %v381_v21  ;;  %390 = vmatpush.msra.mxu1 %v389_v37  ;;  %v291_v16 = vsub.f32 %v183_v14, %v183_v14  ;;  %v186_v20 = vsel %vm157_vm0, %v4746_v17, 0  ;;  %v4444_v21 = vld [vmem:[#allocation3 + $0x28] sm:$0xff]   ;;  %v4770_v45 = vunpack.c.h.bf16 %v4445_v35 }
  0x29   :  { %4280 = vmatmul.msk.f32.vlgmr.msra.gmra.mxu1 %vm157_vm0, %v4682_v9  ;;  %v262_v61 = vand.u32 4294901760, %v261_v58  ;;  %v4752_v25 = vunpack.c.l.bf16 %v4444_v21  ;;  %v4758_v31 = vunpack.c.h.bf16 %v4444_v21 }
  0x2a   :  { %705 = vmatpush.msrb.mxu0 %v387_v22  ;;  %784 = vmatpush.msrb.mxu1 %v4674_v3  ;;  %v270_v3 = vand.u32 4294901760, %v269_v0  ;;  %v292_v19 = vand.u32 4294901760, %v291_v16 }
  0x2b   :  { %590 = vmatmul.f32.gmra.mxu3 %v236_v33  ;;  %v189_v28 = vsel %vm157_vm0, %v4752_v25, 0  ;;  %v192_v34 = vsel %vm157_vm0, %v4758_v31, 0 }
  0x2c   :  { %487 = vmatmul.f32.gmra.mxu2 %v235_v23  ;;  %786 = vmatpush.msrb.mxu1 %v4676_v4  ;;  %v276_v4 = vand.u32 4294901760, %v275_v1  ;;  %v293_v22 = vsub.f32 %v291_v16, %v292_v19  ;;  %v299_v23 = vsub.f32 %v186_v20, %v186_v20  ;;  %v307_v30 = vsub.f32 %v189_v28, %v189_v28  ;;  %v119_v20 = vld [vmem:[#allocation8 + $0x78] sm:$0xff] }
  0x2d   :  { %239 = vmatmul.f32.gmra.mxu0 %v238_v41  ;;  %v315_v37 = vsub.f32 %v192_v34, %v192_v34 }
  0x2e   :  { %788 = vmatpush.msrb.mxu1 %v4678_v5  ;;  %v180_v5 = vsel %vm157_vm0, %v4734_v2, 0  ;;  %v277_v7 = vsub.f32 %v275_v1, %v276_v4  ;;  %v294_v26 = vand.u32 4294901760, %v293_v22  ;;  %v300_v27 = vand.u32 4294901760, %v299_v23  ;;  %v118_v22 = vld [vmem:[#allocation8 + $0x70] sm:$0xff] }
  0x2f   :  { %v308_v33 = vand.u32 4294901760, %v307_v30  ;;  %v316_v41 = vand.u32 4294901760, %v315_v37 }
  0x30   :  { %790 = vmatpush.msrb.mxu1 %v4680_v8  ;;  %v283_v8 = vsub.f32 %v180_v5, %v180_v5  ;;  %v278_v12 = vand.u32 4294901760, %v277_v7  ;;  %v301_v29 = vsub.f32 %v299_v23, %v300_v27 }
  0x31   :  { %4281 = vmatmul.msk.f32.gmra.mxu1 %vm157_vm0, %v4684_v10  ;;  %v309_v36 = vsub.f32 %v307_v30, %v308_v33  ;;  %v317_v43 = vsub.f32 %v315_v37, %v316_v41 }
  0x32   :  { %v284_v13 = vand.u32 4294901760, %v283_v8  ;;  %v302_v32 = vand.u32 4294901760, %v301_v29 }
  0x33   :  { %596 = vmatmul.f32.gmra.mxu3 %v244_v42  ;;  %v195_v42 = vsel %vm157_vm0, %v4764_v38, 0 }
  0x34   :  { %492 = vmatmul.f32.gmra.mxu2 %v243_v39  ;;  %v285_v15 = vsub.f32 %v283_v8, %v284_v13  ;;  %v310_v39 = vand.u32 4294901760, %v309_v36  ;;  %v323_v44 = vsub.f32 %v195_v42, %v195_v42  ;;  %v115_v36 = vld [vmem:[#allocation8 + $0x58] sm:$0xff] }
  0x35   :  { %247 = vmatmul.f32.gmra.mxu0 %v246_v48 }
  0x36   :  { %v286_v18 = vand.u32 4294901760, %v285_v15  ;;  %v324_v48 = vand.u32 4294901760, %v323_v44 }
  0x38   :  { %v325_v51 = vsub.f32 %v323_v44, %v324_v48 }
  0x39   :  { %4282 = vmatmul.msk.f32.gmra.mxu1 %vm157_vm0, %v4698_v24 }
  0x3b   :  { %602 = vmatmul.f32.gmra.mxu3 %v252_v49  ;;  %v198_v49 = vsel %vm157_vm0, %v4770_v45, 0 }
  0x3c   :  { %497 = vmatmul.f32.gmra.mxu2 %v251_v46  ;;  %v318_v46 = vand.u32 4294901760, %v317_v43 }
  0x3d   :  { %255 = vmatmul.f32.gmra.mxu0 %v254_v54  ;;  %v4776_v54 = vunpack.c.l.bf16 %v4446_v50 }
  0x3f   :  { %v201_v57 = vsel %vm157_vm0, %v4776_v54, 0 }
  0x41   :  { %4283 = vmatmul.msk.f32.gmra.mxu1 %vm157_vm0, %v4706_v40 }
  0x43   :  { %608 = vmatmul.f32.gmra.mxu3 %v260_v55  ;;  %v326_v55 = vand.u32 4294901760, %v325_v51 }
  0x44   :  { %502 = vmatmul.f32.gmra.mxu2 %v259_v52  ;;  %v331_v52 = vsub.f32 %v198_v49, %v198_v49 }
  0x45   :  { %263 = vmatmul.f32.gmra.mxu0 %v262_v61  ;;  %v4782_v61 = vunpack.c.h.bf16 %v4446_v50 }
  0x46   :  { %v332_v56 = vand.u32 4294901760, %v331_v52 }
  0x47   :  { %v204_v0 = vsel %vm157_vm0, %v4782_v61, 0 }
  0x48   :  { %v333_v58 = vsub.f32 %v331_v52, %v332_v56 }
  0x49   :  { %4284 = vmatmul.msk.f32.gmra.mxu1 %vm157_vm0, %v4714_v47 }
  0x4b   :  { %614 = vmatmul.f32.gmra.mxu3 %v268_v62  ;;  %v334_v62 = vand.u32 4294901760, %v333_v58 }
  0x4c   :  { %507 = vmatmul.f32.gmra.mxu2 %v267_v59  ;;  %v339_v59 = vsub.f32 %v201_v57, %v201_v57 }
  0x4d   :  { %271 = vmatmul.f32.gmra.mxu0 %v270_v3  ;;  %v347_v3 = vsub.f32 %v204_v0, %v204_v0 }
  0x4e   :  { %v340_v63 = vand.u32 4294901760, %v339_v59 }
  0x4f   :  { %v348_v5 = vand.u32 4294901760, %v347_v3 }
  0x51   :  { %4285 = vmatmul.msk.f32.gmra.mxu1 %vm157_vm0, %v4722_v53  ;;  %v349_v6 = vsub.f32 %v347_v3, %v348_v5 }
  0x53   :  { %620 = vmatmul.f32.gmra.mxu3 %v276_v4  ;;  %v350_v7 = vand.u32 4294901760, %v349_v6  ;;  %v111_v6 = vld [vmem:[#allocation8 + $0x38] sm:$0xff] }
  0x54   :  { %512 = vmatmul.f32.gmra.mxu2 %v275_v1  ;;  %v341_v1 = vsub.f32 %v339_v59, %v340_v63 }
  0x55   :  { %279 = vmatmul.f32.gmra.mxu0 %v278_v12 }
  0x56   :  { %v342_v4 = vand.u32 4294901760, %v341_v1 }
  0x59   :  { %4286 = vmatmul.msk.f32.gmra.mxu1 %vm157_vm0, %v4728_v60 }
  0x5b   :  { %626 = vmatmul.f32.gmra.mxu3 %v284_v13 }
  0x5c   :  { %517 = vmatmul.f32.gmra.mxu2 %v283_v8 }
  0x5d   :  { %287 = vmatmul.f32.gmra.mxu0 %v286_v18 }
  0x61   :  { %4287 = vmatmul.msk.f32.gmra.mxu1 %vm157_vm0, %v4734_v2 }
  0x63   :  { %632 = vmatmul.f32.gmra.mxu3 %v292_v19 }
  0x64   :  { %522 = vmatmul.f32.gmra.mxu2 %v291_v16 }
  0x65   :  { %295 = vmatmul.f32.gmra.mxu0 %v294_v26  ;;  %v4841_v26 = vand.u32 4294901760, %v118_v22 }
  0x69   :  { %4288 = vmatmul.msk.f32.gmra.mxu1 %vm157_vm0, %v4740_v11 }
  0x6b   :  { %638 = vmatmul.f32.gmra.mxu3 %v300_v27 }
  0x6c   :  { %527 = vmatmul.f32.gmra.mxu2 %v299_v23 }
  0x6d   :  { %303 = vmatmul.f32.gmra.mxu0 %v302_v32 }
  0x71   :  { %4289 = vmatmul.msk.f32.gmra.mxu1 %vm157_vm0, %v4746_v17 }
  0x73   :  { %644 = vmatmul.f32.gmra.mxu3 %v308_v33 }
  0x74   :  { %532 = vmatmul.f32.gmra.mxu2 %v307_v30  ;;  %v116_v30 = vld [vmem:[#allocation8 + $0x60] sm:$0xff] }
  0x75   :  { %311 = vmatmul.f32.gmra.mxu0 %v310_v39  ;;  %v4870_v35 = vand.u32 4294901760, %v116_v30 }
  0x77   :  { %v4886_v43 = vsub.f32 %v116_v30, %v4870_v35 }
  0x79   :  { %4290 = vmatmul.msk.f32.gmra.mxu1 %vm157_vm0, %v4752_v25  ;;  %6988 = vst [vmem:[#allocation32_spill] sm:$0xff] %v4886_v43  ;;  %v4902_v50 = vand.u32 4294901760, %v4886_v43 }
  0x7b   :  { %650 = vmatmul.f32.gmra.mxu3 %v316_v41  ;;  %6990 = vst [vmem:[#allocation34_spill] sm:$0xff] %v4902_v50 }
  0x7c   :  { %537 = vmatmul.f32.gmra.mxu2 %v315_v37 }
  0x7d   :  { %319 = vmatmul.f32.gmra.mxu0 %v318_v46  ;;  %v114_v46 = vld [vmem:[#allocation8 + $0x50] sm:$0xff] }
  0x7e   :  { %v4897_v49 = vand.u32 4294901760, %v114_v46 }
  0x81   :  { %4291 = vmatmul.msk.f32.gmra.mxu1 %vm157_vm0, %v4758_v31 }
  0x83   :  { %656 = vmatmul.f32.gmra.mxu3 %v324_v48 }
  0x84   :  { %542 = vmatmul.f32.gmra.mxu2 %v323_v44  ;;  %v4888_v44 = vand.u32 4294901760, %v115_v36 }
  0x85   :  { %327 = vmatmul.f32.gmra.mxu0 %v326_v55 }
  0x86   :  { %v4905_v51 = vsub.f32 %v115_v36, %v4888_v44  ;;  %v110_v36 = vld [vmem:[#allocation8 + $0x30] sm:$0xff] }
  0x88   :  { %6991 = vst [vmem:[#allocation35_spill] sm:$0xff] %v4905_v51 }
  0x89   :  { %4292 = vmatmul.msk.f32.gmra.mxu1 %vm157_vm0, %v4764_v38 }
  0x8b   :  { %662 = vmatmul.f32.gmra.mxu3 %v332_v56  ;;  %v4912_v56 = vsub.f32 %v114_v46, %v4897_v49 }
  0x8c   :  { %547 = vmatmul.f32.gmra.mxu2 %v331_v52  ;;  %v113_v52 = vld [vmem:[#allocation8 + $0x48] sm:$0xff] }
  0x8d   :  { %335 = vmatmul.f32.gmra.mxu0 %v334_v62  ;;  %6993 = vst [vmem:[#allocation37_spill] sm:$0xff] %v4912_v56  ;;  %v4914_v57 = vand.u32 4294901760, %v113_v52  ;;  %v4922_v62 = vand.u32 4294901760, %v4905_v51  ;;  %v4928_v0 = vand.u32 4294901760, %v4912_v56 }
  0x8f   :  { %6995 = vst [vmem:[#allocation39_spill] sm:$0xff] %v4922_v62  ;;  %v4931_v1 = vsub.f32 %v113_v52, %v4914_v57  ;;  %v4976_v52 = vand.u32 4294901760, %v110_v36 }
  0x90   :  { %6996 = vst [vmem:[#allocation40_spill] sm:$0xff] %v4928_v0 }
  0x91   :  { %4293 = vmatmul.msk.f32.gmra.mxu1 %vm157_vm0, %v4770_v45  ;;  %6997 = vst [vmem:[#allocation41_spill] sm:$0xff] %v4931_v1 }
  0x93   :  { %668 = vmatmul.f32.gmra.mxu3 %v340_v63  ;;  %v112_v63 = vld [vmem:[#allocation8 + $0x40] sm:$0xff] }
  0x94   :  { %552 = vmatmul.f32.gmra.mxu2 %v339_v59  ;;  %v960_v59 = vsub.f32 %v4886_v43, %v4902_v50  ;;  %v106_v50 = vld [vmem:[#allocation8 + $0x10] sm:$0xff] }
  0x95   :  { %343 = vmatmul.f32.gmra.mxu0 %v342_v4 }
  0x96   :  { %v4936_v4 = vand.u32 4294901760, %v960_v59  ;;  %v109_v59 = vld [vmem:[#allocation8 + $0x28] sm:$0xff] }
  0x98   :  { %6998 = vst [vmem:[#allocation42_spill] sm:$0xff] %v4936_v4 }
  0x99   :  { %4294 = vmatmul.msk.f32.gmra.mxu1 %vm157_vm0, %v4776_v54 }
  0x9b   :  { %674 = vmatmul.f32.gmra.mxu3 %v348_v5  ;;  %v966_v5 = vsub.f32 %v4905_v51, %v4922_v62 }
  0x9c   :  { %557 = vmatmul.f32.gmra.mxu2 %v347_v3  ;;  %v4933_v3 = vand.u32 4294901760, %v112_v63 }
  0x9d   :  { %351 = vmatmul.f32.gmra.mxu0 %v350_v7  ;;  %v4956_v30 = vand.u32 4294901760, %v966_v5 }
  0x9f   :  { %7002 = vst [vmem:[#allocation46_spill] sm:$0xff] %v4956_v30 }
  0xa1   :  { %4295 = vmatmul.msk.f32.gmra.mxu1 %vm157_vm0, %v4782_v61 }
  0xa2   :  { %v4792_v8 = vpop.f32.mrf.mxu0 }
  0xa5   :  { %4296 = vmatmul.msk.f32.vlgmr.msrb.gmra.mxu0 %vm157_vm0, %v4682_v9 }
  0xa6   :  { %v4798_v12 = vpop.f32.mrf.mxu1 }
  0xa9   :  { %4312 = vmatmul.msk.f32.vlgmr.msrb.gmra.mxu1 %vm157_vm0, %v4682_v9 }
  0xaa   :  { %v4800_v13 = vpop.f32.mrf.mxu0 }
  0xad   :  { %4297 = vmatmul.msk.f32.gmra.mxu0 %vm157_vm0, %v4684_v10 }
  0xae   :  { %v4806_v14 = vpop.f32.mrf.mxu1 }
  0xb1   :  { %4313 = vmatmul.msk.f32.gmra.mxu1 %vm157_vm0, %v4684_v10 }
  0xb2   :  { %v4808_v15 = vpop.f32.mrf.mxu0 }
  0xb5   :  { %4298 = vmatmul.msk.f32.gmra.mxu0 %vm157_vm0, %v4698_v24 }
  0xb6   :  { %v4814_v16 = vpop.f32.mrf.mxu1 }
  0xb7   :  { %6973 = vst [vmem:[#allocation17_spill] sm:$0xff] %v4814_v16 }
  0xb9   :  { %4314 = vmatmul.msk.f32.gmra.mxu1 %vm157_vm0, %v4698_v24  ;;  %v4836_v24 = vand.u32 4294901760, %v119_v20 }
  0xba   :  { %v4816_v18 = vpop.f32.mrf.mxu0 }
  0xbb   :  { %6974 = vst [vmem:[#allocation18_spill] sm:$0xff] %v4816_v18  ;;  %v4839_v23 = vsub.f32 %v119_v20, %v4836_v24  ;;  %891 = vmatpush.msrb.mxu2 %v4836_v24  ;;  %1521 = vmatpush.msra.mxu1 %v4836_v24  ;;  %v972_v20 = vsub.f32 %v4912_v56, %v4928_v0  ;;  %v107_v0 = vld [vmem:[#allocation8 + $0x18] sm:$0xff] }
  0xbd   :  { %4299 = vmatmul.msk.f32.gmra.mxu0 %vm157_vm0, %v4706_v40  ;;  %6979 = vst [vmem:[#allocation23_spill] sm:$0xff] %v4839_v23  ;;  %v4848_v27 = vand.u32 4294901760, %v4839_v23  ;;  %893 = vmatpush.msrb.mxu2 %v4841_v26 }
  0xbe   :  { %v4822_v9 = vpop.f32.mrf.mxu1  ;;  %1463 = vmatpush.msra.mxu0 %v4839_v23  ;;  %1523 = vmatpush.msra.mxu1 %v4841_v26 }
  0xbf   :  { %6975 = vst [vmem:[#allocation19_spill] sm:$0xff] %v4822_v9  ;;  %v942_v32 = vsub.f32 %v4839_v23, %v4848_v27 }
  0xc0   :  { %6980 = vst [vmem:[#allocation24_spill] sm:$0xff] %v4848_v27 }
  0xc1   :  { %4315 = vmatmul.msk.f32.gmra.mxu1 %vm157_vm0, %v4706_v40  ;;  %v117_v40 = vld [vmem:[#allocation8 + $0x68] sm:$0xff]  ;;  %v4877_v39 = vand.u32 4294901760, %v942_v32  ;;  %v4958_v32 = vand.u32 4294901760, %v111_v6 }
  0xc2   :  { %v4824_v19 = vpop.f32.mrf.mxu0  ;;  %v4853_v28 = vand.u32 4294901760, %v117_v40 }
  0xc3   :  { %6976 = vst [vmem:[#allocation20_spill] sm:$0xff] %v4824_v19  ;;  %944 = vmatpush.msrb.mxu3 %v4877_v39 }
  0xc4   :  { %v4866_v34 = vsub.f32 %v117_v40, %v4853_v28  ;;  %895 = vmatpush.msrb.mxu2 %v4853_v28  ;;  %1525 = vmatpush.msra.mxu1 %v4853_v28  ;;  %6986 = vst [vmem:[#allocation30_spill] sm:$0xff] %v4877_v39  ;;  %v4952_v40 = vsub.f32 %v112_v63, %v4933_v3 }
  0xc5   :  { %4300 = vmatmul.msk.f32.gmra.mxu0 %vm157_vm0, %v4714_v47 }
  0xc6   :  { %v4830_v10 = vpop.f32.mrf.mxu1  ;;  %6984 = vst [vmem:[#allocation28_spill] sm:$0xff] %v4866_v34  ;;  %v4882_v42 = vand.u32 4294901760, %v4866_v34  ;;  %897 = vmatpush.msrb.mxu2 %v4870_v35  ;;  %1527 = vmatpush.msra.mxu1 %v4870_v35  ;;  %v4966_v46 = vand.u32 4294901760, %v4952_v40 }
  0xc7   :  { %6977 = vst [vmem:[#allocation21_spill] sm:$0xff] %v4830_v10 }
  0xc8   :  { %6987 = vst [vmem:[#allocation31_spill] sm:$0xff] %v4882_v42  ;;  %v954_v48 = vsub.f32 %v4866_v34, %v4882_v42  ;;  %899 = vmatpush.msrb.mxu2 %v4888_v44  ;;  %1529 = vmatpush.msra.mxu1 %v4888_v44  ;;  %v984_v5 = vsub.f32 %v4952_v40, %v4966_v46 }
  0xc9   :  { %4316 = vmatmul.msk.f32.gmra.mxu1 %vm157_vm0, %v4714_v47  ;;  %v4851_v47 = vsub.f32 %v118_v22, %v4841_v26  ;;  %v4949_v22 = vand.u32 4294901760, %v4931_v1  ;;  %7001 = vst [vmem:[#allocation45_spill] sm:$0xff] %v4952_v40 }
  0xca   :  { %v4832_v21 = vpop.f32.mrf.mxu0  ;;  %v4909_v55 = vand.u32 4294901760, %v954_v48  ;;  %901 = vmatpush.msrb.mxu2 %v4897_v49  ;;  %1531 = vmatpush.msra.mxu1 %v4897_v49  ;;  %7004 = vst [vmem:[#allocation48_spill] sm:$0xff] %v4966_v46  ;;  %v4974_v48 = vsub.f32 %v111_v6, %v4958_v32  ;;  %v4996_v46 = vand.u32 4294901760, %v984_v5 }
  0xcb   :  { %6978 = vst [vmem:[#allocation22_spill] sm:$0xff] %v4832_v21  ;;  %v4863_v33 = vand.u32 4294901760, %v4851_v47  ;;  %1466 = vmatpush.msra.mxu0 %v4851_v47 }
  0xcc   :  { %6981 = vst [vmem:[#allocation25_spill] sm:$0xff] %v4851_v47  ;;  %903 = vmatpush.msrb.mxu2 %v4914_v57  ;;  %1533 = vmatpush.msra.mxu1 %v4914_v57  ;;  %v4990_v6 = vand.u32 4294901760, %v4974_v48 }
  0xcd   :  { %4301 = vmatmul.msk.f32.gmra.mxu0 %vm157_vm0, %v4722_v53  ;;  %6983 = vst [vmem:[#allocation27_spill] sm:$0xff] %v4863_v33  ;;  %v948_v41 = vsub.f32 %v4851_v47, %v4863_v33 }
  0xce   :  { %v4857_v29 = vpop.f32.mrf.mxu1  ;;  %1469 = vmatpush.msra.mxu0 %v4866_v34  ;;  %6992 = vst [vmem:[#allocation36_spill] sm:$0xff] %v4909_v55  ;;  %905 = vmatpush.msrb.mxu2 %v4933_v3 }
  0xcf   :  { %6982 = vst [vmem:[#allocation26_spill] sm:$0xff] %v4857_v29  ;;  %1535 = vmatpush.msra.mxu1 %v4933_v3  ;;  %v5022_v29 = vand.u32 4294901760, %v107_v0 }
  0xd0   :  { %1472 = vmatpush.msra.mxu0 %v4886_v43  ;;  %7000 = vst [vmem:[#allocation44_spill] sm:$0xff] %v4949_v22  ;;  %907 = vmatpush.msrb.mxu2 %v4958_v32 }
  0xd1   :  { %4317 = vmatmul.msk.f32.gmra.mxu1 %vm157_vm0, %v4722_v53  ;;  %v4893_v53 = vand.u32 4294901760, %v948_v41  ;;  %v978_v41 = vsub.f32 %v4931_v1, %v4949_v22  ;;  %7005 = vst [vmem:[#allocation49_spill] sm:$0xff] %v4974_v48  ;;  %v5037_v42 = vsub.f32 %v107_v0, %v5022_v29 }
  0xd2   :  { %v4873_v37 = vpop.f32.mrf.mxu0  ;;  %1475 = vmatpush.msra.mxu0 %v4905_v51  ;;  %7008 = vst [vmem:[#allocation52_spill] sm:$0xff] %v4990_v6  ;;  %909 = vmatpush.msrb.mxu2 %v4976_v52 }
  0xd3   :  { %6985 = vst [vmem:[#allocation29_spill] sm:$0xff] %v4873_v37  ;;  %950 = vmatpush.msrb.mxu3 %v4893_v53  ;;  %v4978_v63 = vand.u32 4294901760, %v978_v41  ;;  %v108_v41 = vld [vmem:[#allocation8 + $0x20] sm:$0xff]  ;;  %1537 = vmatpush.msra.mxu1 %v4958_v32  ;;  %v5053_v33 = vand.u32 4294901760, %v5037_v42 }
  0xd4   :  { %6989 = vst [vmem:[#allocation33_spill] sm:$0xff] %v4893_v53  ;;  %1478 = vmatpush.msra.mxu0 %v4912_v56  ;;  %v5001_v37 = vand.u32 4294901760, %v108_v41 }
  0xd5   :  { %4302 = vmatmul.msk.f32.gmra.mxu0 %vm157_vm0, %v4728_v60  ;;  %956 = vmatpush.msrb.mxu3 %v4909_v55  ;;  %7006 = vst [vmem:[#allocation50_spill] sm:$0xff] %v4978_v63  ;;  %v1014_v19 = vsub.f32 %v5037_v42, %v5053_v33 }
  0xd6   :  { %v4917_v58 = vpop.f32.mrf.mxu1  ;;  %1481 = vmatpush.msra.mxu0 %v4931_v1  ;;  %7010 = vst [vmem:[#allocation54_spill] sm:$0xff] %v4996_v46  ;;  %v5020_v62 = vsub.f32 %v108_v41, %v5001_v37  ;;  %1539 = vmatpush.msra.mxu1 %v4976_v52 }
  0xd7   :  { %6994 = vst [vmem:[#allocation38_spill] sm:$0xff] %v4917_v58  ;;  %962 = vmatpush.msrb.mxu3 %v4936_v4  ;;  %v4993_v58 = vsub.f32 %v110_v36, %v4976_v52  ;;  %v990_v36 = vsub.f32 %v4974_v48, %v4990_v6 }
  0xd8   :  { %1484 = vmatpush.msra.mxu0 %v4952_v40  ;;  %7015 = vst [vmem:[#allocation59_spill] sm:$0xff] %v5020_v62  ;;  %v5034_v41 = vand.u32 4294901760, %v5020_v62 }
  0xd9   :  { %4318 = vmatmul.msk.f32.gmra.mxu1 %vm157_vm0, %v4728_v60  ;;  %v4961_v60 = vand.u32 4294901760, %v972_v20  ;;  %968 = vmatpush.msrb.mxu3 %v4956_v30  ;;  %v4982_v20 = vand.u32 4294901760, %v109_v59  ;;  %7009 = vst [vmem:[#allocation53_spill] sm:$0xff] %v4993_v58  ;;  %v5026_v6 = vand.u32 4294901760, %v990_v36 }
  0xda   :  { %v4942_v7 = vpop.f32.mrf.mxu0  ;;  %1487 = vmatpush.msra.mxu0 %v4974_v48  ;;  %7017 = vst [vmem:[#allocation61_spill] sm:$0xff] %v5034_v41  ;;  %v1008_v0 = vsub.f32 %v5020_v62, %v5034_v41 }
  0xdb   :  { %6999 = vst [vmem:[#allocation43_spill] sm:$0xff] %v4942_v7  ;;  %974 = vmatpush.msrb.mxu3 %v4961_v60  ;;  %v4999_v22 = vsub.f32 %v109_v59, %v4982_v20  ;;  %911 = vmatpush.msrb.mxu2 %v4982_v20 }
  0xdc   :  { %7003 = vst [vmem:[#allocation47_spill] sm:$0xff] %v4961_v60  ;;  %1490 = vmatpush.msra.mxu0 %v4993_v58  ;;  %1541 = vmatpush.msra.mxu1 %v4982_v20  ;;  %v5066_v41 = vand.u32 4294901760, %v1008_v0 }
  0xdd   :  { %4303 = vmatmul.msk.f32.gmra.mxu0 %vm157_vm0, %v4734_v2  ;;  %7011 = vst [vmem:[#allocation55_spill] sm:$0xff] %v4999_v22  ;;  %980 = vmatpush.msrb.mxu3 %v4978_v63  ;;  %v5017_v59 = vand.u32 4294901760, %v4999_v22 }
  0xde   :  { %v4986_v7 = vpop.f32.mrf.mxu1  ;;  %7016 = vst [vmem:[#allocation60_spill] sm:$0xff] %v5026_v6  ;;  %913 = vmatpush.msrb.mxu2 %v5001_v37  ;;  %1493 = vmatpush.msra.mxu0 %v4999_v22 }
  0xdf   :  { %7007 = vst [vmem:[#allocation51_spill] sm:$0xff] %v4986_v7  ;;  %v5009_v7 = vand.u32 4294901760, %v4993_v58  ;;  %986 = vmatpush.msrb.mxu3 %v4996_v46  ;;  %1543 = vmatpush.msra.mxu1 %v5001_v37 }
  0xe0   :  { %7014 = vst [vmem:[#allocation58_spill] sm:$0xff] %v5017_v59  ;;  %915 = vmatpush.msrb.mxu2 %v5022_v29  ;;  %1496 = vmatpush.msra.mxu0 %v5020_v62 }
  0xe1   :  { %7012 = vst [vmem:[#allocation56_spill] sm:$0xff] %v5009_v7  ;;  %4319 = vmatmul.msk.f32.gmra.mxu1 %vm157_vm0, %v4734_v2  ;;  %v1002_v2 = vsub.f32 %v4999_v22, %v5017_v59  ;;  %992 = vmatpush.msrb.mxu3 %v5026_v6  ;;  %v105_v59 = vld [vmem:[#allocation8 + $0x8] sm:$0xff] }
  0xe2   :  { %v5012_v5 = vpop.f32.mrf.mxu0  ;;  %7018 = vst [vmem:[#allocation62_spill] sm:$0xff] %v5037_v42  ;;  %v5055_v27 = vand.u32 4294901760, %v105_v59  ;;  %1499 = vmatpush.msra.mxu0 %v5037_v42  ;;  %1545 = vmatpush.msra.mxu1 %v5022_v29 }
  0xe3   :  { %7013 = vst [vmem:[#allocation57_spill] sm:$0xff] %v5012_v5  ;;  %v996_v5 = vsub.f32 %v4993_v58, %v5009_v7  ;;  %v5046_v7 = vand.u32 4294901760, %v106_v50  ;;  %v5048_v21 = vand.u32 4294901760, %v1002_v2  ;;  %v104_v2 = vld [vmem:[#allocation8] sm:$0xff] }
  0xe4   :  { %7021 = vst [vmem:[#allocation65_spill] sm:$0xff] %v5053_v33  ;;  %v5071_v9 = vsub.f32 %v105_v59, %v5055_v27  ;;  %v5086_v59 = vand.u32 4294901760, %v1014_v19 }
  0xe5   :  { %4304 = vmatmul.msk.f32.gmra.mxu0 %vm157_vm0, %v4740_v11  ;;  %v5044_v36 = vand.u32 4294901760, %v996_v5  ;;  %7020 = vst [vmem:[#allocation64_spill] sm:$0xff] %v5048_v21  ;;  %v5063_v5 = vsub.f32 %v106_v50, %v5046_v7  ;;  %917 = vmatpush.msrb.mxu2 %v5046_v7 }
  0xe6   :  { %v5059_v10 = vpop.f32.mrf.mxu1  ;;  %7024 = vst [vmem:[#allocation68_spill] sm:$0xff] %v5066_v41  ;;  %v5089_v33 = vand.u32 4294901760, %v5071_v9  ;;  %1547 = vmatpush.msra.mxu1 %v5046_v7 }
  0xe7   :  { %7019 = vst [vmem:[#allocation63_spill] sm:$0xff] %v5044_v36  ;;  %998 = vmatpush.msrb.mxu3 %v5044_v36  ;;  %v5077_v50 = vand.u32 4294901760, %v5063_v5  ;;  %919 = vmatpush.msrb.mxu2 %v5055_v27 }
  0xe8   :  { %7022 = vst [vmem:[#allocation66_spill] sm:$0xff] %v5059_v10  ;;  %v5079_v10 = vand.u32 4294901760, %v104_v2  ;;  %1502 = vmatpush.msra.mxu0 %v5063_v5  ;;  %1549 = vmatpush.msra.mxu1 %v5055_v27 }
  0xe9   :  { %7023 = vst [vmem:[#allocation67_spill] sm:$0xff] %v5063_v5  ;;  %1004 = vmatpush.msrb.mxu3 %v5048_v21  ;;  %4320 = vmatmul.msk.f32.gmra.mxu1 %vm157_vm0, %v4740_v11  ;;  %v1020_v18 = vsub.f32 %v5063_v5, %v5077_v50  ;;  %v1026_v11 = vsub.f32 %v5071_v9, %v5089_v33 }
  0xea   :  { %7025 = vst [vmem:[#allocation69_spill] sm:$0xff] %v5071_v9  ;;  %v5082_v0 = vpop.f32.mrf.mxu0  ;;  %v5096_v16 = vsub.f32 %v104_v2, %v5079_v10  ;;  %921 = vmatpush.msrb.mxu2 %v5079_v10  ;;  %1505 = vmatpush.msra.mxu0 %v5071_v9 }
  0xeb   :  { %7026 = vst [vmem:[#allocation70_spill] sm:$0xff] %v5077_v50  ;;  %1010 = vmatpush.msrb.mxu3 %v5066_v41  ;;  %v5106_v19 = vand.u32 4294901760, %v1020_v18  ;;  %v5111_v2 = vand.u32 4294901760, %v1026_v11  ;;  %1551 = vmatpush.msra.mxu1 %v5079_v10 }
  0xec   :  { %7027 = vst [vmem:[#allocation71_spill] sm:$0xff] %v5082_v0  ;;  %v5109_v0 = vand.u32 4294901760, %v5096_v16  ;;  %1046 = vmatpush.msra.mxu2 %v4839_v23  ;;  %1508 = vmatpush.msra.mxu0 %v5096_v16 }
  0xed   :  { %7028 = vst [vmem:[#allocation72_spill] sm:$0xff] %v5086_v59  ;;  %4305 = vmatmul.msk.f32.gmra.mxu0 %vm157_vm0, %v4746_v17  ;;  %1016 = vmatpush.msrb.mxu3 %v5086_v59 }
  0xee   :  { %7029 = vst [vmem:[#allocation73_spill] sm:$0xff] %v5089_v33  ;;  %v5115_v33 = vpop.f32.mrf.mxu1  ;;  %v1032_v50 = vsub.f32 %v5096_v16, %v5109_v0  ;;  %1049 = vmatpush.msra.mxu2 %v4851_v47  ;;  %1733 = vmatpush.msrb.mxu0 %v4836_v24 }
  0xef   :  { %7030 = vst [vmem:[#allocation74_spill] sm:$0xff] %v5096_v16  ;;  %1022 = vmatpush.msrb.mxu3 %v5106_v19  ;;  %1786 = vmatpush.msrb.mxu1 %v4877_v39 }
  0xf0   :  { %7031 = vst [vmem:[#allocation75_spill] sm:$0xff] %v5106_v19  ;;  %v5124_v18 = vand.u32 4294901760, %v1032_v50  ;;  %1052 = vmatpush.msra.mxu2 %v4866_v34  ;;  %1735 = vmatpush.msrb.mxu0 %v4841_v26 }
  0xf1   :  { %7032 = vst [vmem:[#allocation76_spill] sm:$0xff] %v5109_v0  ;;  %1028 = vmatpush.msrb.mxu3 %v5111_v2  ;;  %4321 = vmatmul.msk.f32.gmra.mxu1 %vm157_vm0, %v4746_v17 }
  0xf2   :  { %7033 = vst [vmem:[#allocation77_spill] sm:$0xff] %v5111_v2  ;;  %v5127_v11 = vpop.f32.mrf.mxu0  ;;  %1055 = vmatpush.msra.mxu2 %v4886_v43  ;;  %1792 = vmatpush.msrb.mxu1 %v4893_v53 }
  0xf3   :  { %7034 = vst [vmem:[#allocation78_spill] sm:$0xff] %v5115_v33  ;;  %1034 = vmatpush.msrb.mxu3 %v5124_v18  ;;  %1737 = vmatpush.msrb.mxu0 %v4853_v28 }
  0xf4   :  { %7035 = vst [vmem:[#allocation79_spill] sm:$0xff] %v5124_v18  ;;  %1058 = vmatpush.msra.mxu2 %v4905_v51  ;;  %1798 = vmatpush.msrb.mxu1 %v4909_v55 }
  0xf5   :  { %7036 = vst [vmem:[#allocation80_spill] sm:$0xff] %v5127_v11  ;;  %1104 = vmatpush.msra.mxu3 %v4836_v24  ;;  %4306 = vmatmul.msk.f32.gmra.mxu0 %vm157_vm0, %v4752_v25 }
  0xf6   :  { %v5141_v17 = vpop.f32.mrf.mxu1  ;;  %1061 = vmatpush.msra.mxu2 %v4912_v56  ;;  %v5161_v56 = vpop.f32.mrf.mxu2  ;;  %1739 = vmatpush.msrb.mxu0 %v4870_v35 }
  0xf7   :  { %1106 = vmatpush.msra.mxu3 %v4841_v26  ;;  %7037 = vst [vmem:[#allocation81_spill] sm:$0xff] %v5141_v17  ;;  %1804 = vmatpush.msrb.mxu1 %v4936_v4 }
  0xf8   :  { %1064 = vmatpush.msra.mxu2 %v4931_v1  ;;  %1741 = vmatpush.msrb.mxu0 %v4888_v44 }
  0xf9   :  { %1108 = vmatpush.msra.mxu3 %v4853_v28  ;;  %4322 = vmatmul.msk.f32.gmra.mxu1 %vm157_vm0, %v4752_v25 }
  0xfa   :  { %v5149_v50 = vpop.f32.mrf.mxu0  ;;  %1067 = vmatpush.msra.mxu2 %v4952_v40  ;;  %1810 = vmatpush.msrb.mxu1 %v4956_v30  ;;  %v5173_v40 = vpop.f32.mrf.mxu3 }
  0xfb   :  { %7038 = vst [vmem:[#allocation82_spill] sm:$0xff] %v5149_v50  ;;  %1110 = vmatpush.msra.mxu3 %v4870_v35  ;;  %1743 = vmatpush.msrb.mxu0 %v4897_v49 }
  0xfc   :  { %1070 = vmatpush.msra.mxu2 %v4974_v48  ;;  %1816 = vmatpush.msrb.mxu1 %v4961_v60 }
  0xfd   :  { %1112 = vmatpush.msra.mxu3 %v4888_v44  ;;  %4307 = vmatmul.msk.f32.gmra.mxu0 %vm157_vm0, %v4758_v31 }
  0xfe   :  { %v5165_v25 = vpop.f32.mrf.mxu1  ;;  %1073 = vmatpush.msra.mxu2 %v4993_v58  ;;  %1745 = vmatpush.msrb.mxu0 %v4914_v57 }
  0xff   :  { %1114 = vmatpush.msra.mxu3 %v4897_v49  ;;  %7039 = vst [vmem:[#allocation83_spill] sm:$0xff] %v5165_v25  ;;  %1822 = vmatpush.msrb.mxu1 %v4978_v63 }
 0x100   :  { %1076 = vmatpush.msra.mxu2 %v4999_v22  ;;  %v5193_v22 = vpop.f32.mrf.mxu2  ;;  %1747 = vmatpush.msrb.mxu0 %v4933_v3 }
 0x101   :  { %1116 = vmatpush.msra.mxu3 %v4914_v57  ;;  %4323 = vmatmul.msk.f32.gmra.mxu1 %vm157_vm0, %v4758_v31 }
 0x102   :  { %v5175_v1 = vpop.f32.mrf.mxu0  ;;  %1079 = vmatpush.msra.mxu2 %v5020_v62  ;;  %1828 = vmatpush.msrb.mxu1 %v4996_v46 }
 0x103   :  { %7040 = vst [vmem:[#allocation84_spill] sm:$0xff] %v5175_v1  ;;  %1118 = vmatpush.msra.mxu3 %v4933_v3  ;;  %1749 = vmatpush.msrb.mxu0 %v4958_v32 }
 0x104   :  { %1082 = vmatpush.msra.mxu2 %v5037_v42  ;;  %v591_v42 = vpop.f32.mrf.mxu3  ;;  %1834 = vmatpush.msrb.mxu1 %v5026_v6 }
 0x105   :  { %1120 = vmatpush.msra.mxu3 %v4958_v32  ;;  %4308 = vmatmul.msk.f32.gmra.mxu0 %vm157_vm0, %v4764_v38 }
 0x106   :  { %v5189_v31 = vpop.f32.mrf.mxu1  ;;  %1085 = vmatpush.msra.mxu2 %v5063_v5  ;;  %1751 = vmatpush.msrb.mxu0 %v4976_v52 }
 0x107   :  { %1122 = vmatpush.msra.mxu3 %v4976_v52  ;;  %7041 = vst [vmem:[#allocation85_spill] sm:$0xff] %v5189_v31  ;;  %1840 = vmatpush.msrb.mxu1 %v5044_v36  ;;  %v7056_v36 = vld [vmem:[#allocation27_spill] sm:$0xff] }
 0x108   :  { %1088 = vmatpush.msra.mxu2 %v5071_v9  ;;  %1753 = vmatpush.msrb.mxu0 %v4982_v20  ;;  %v95_v9 = vld [vmem:[#allocation9] sm:$0xf]  ;;  %v493_v5 = vpop.f32.mrf.mxu2 }
 0x109   :  { %1124 = vmatpush.msra.mxu3 %v4982_v20  ;;  %4324 = vmatmul.msk.f32.gmra.mxu1 %vm157_vm0, %v4764_v38  ;;  %v5263_v51 = vperm.slane %v95_v9, 1 }
 0x10a   :  { %v5199_v62 = vpop.f32.mrf.mxu0  ;;  %1091 = vmatpush.msra.mxu2 %v5096_v16  ;;  %1846 = vmatpush.msrb.mxu1 %v5048_v21  ;;  %v5226_v16 = vperm.slane %v95_v9, 3  ;;  %v7055_v21 = vld [vmem:[#allocation24_spill] sm:$0xff] }
 0x10b   :  { %7042 = vst [vmem:[#allocation86_spill] sm:$0xff] %v5199_v62  ;;  %1126 = vmatpush.msra.mxu3 %v5001_v37  ;;  %1755 = vmatpush.msrb.mxu0 %v5001_v37 }
 0x10c   :  { %1852 = vmatpush.msrb.mxu1 %v5066_v41  ;;  %v249_v25 = vadd.f32 %v4808_v15, %v5226_v16  ;;  %v7049_v15 = vld [vmem:[#allocation18_spill] sm:$0xff] }
 0x10d   :  { %1128 = vmatpush.msra.mxu3 %v5022_v29  ;;  %4309 = vmatmul.msk.f32.gmra.mxu0 %vm157_vm0, %v4770_v45  ;;  %v257_v50 = vadd.f32 %v7049_v15, %v5226_v16 }
 0x10e   :  { %v5213_v38 = vpop.f32.mrf.mxu1  ;;  %1858 = vmatpush.msrb.mxu1 %v5086_v59  ;;  %1757 = vmatpush.msrb.mxu0 %v5022_v29  ;;  %v874_v59 = vmul.f32 0.0, %v5263_v51 }
 0x10f   :  { %1130 = vmatpush.msra.mxu3 %v5046_v7  ;;  %7043 = vst [vmem:[#allocation87_spill] sm:$0xff] %v5213_v38  ;;  %v597_v38 = vpop.f32.mrf.mxu3 }
 0x110   :  { %1864 = vmatpush.msrb.mxu1 %v5106_v19  ;;  %1759 = vmatpush.msrb.mxu0 %v5046_v7  ;;  %v498_v62 = vpop.f32.mrf.mxu2 }
 0x111   :  { %1132 = vmatpush.msra.mxu3 %v5055_v27  ;;  %4325 = vmatmul.msk.f32.gmra.mxu1 %vm157_vm0, %v4770_v45  ;;  %v233_v45 = vadd.f32 %v4792_v8, %v5226_v16  ;;  %v5249_v8 = vperm.slane %v95_v9, 0 }
 0x112   :  { %v5219_v58 = vpop.f32.mrf.mxu0  ;;  %1870 = vmatpush.msrb.mxu1 %v5111_v2  ;;  %1761 = vmatpush.msrb.mxu0 %v5055_v27 }
 0x113   :  { %7044 = vst [vmem:[#allocation88_spill] sm:$0xff] %v5219_v58  ;;  %1134 = vmatpush.msra.mxu3 %v5079_v10 }
 0x114   :  { %1876 = vmatpush.msrb.mxu1 %v5124_v18  ;;  %1763 = vmatpush.msrb.mxu0 %v5079_v10 }
 0x115   :  { %4310 = vmatmul.msk.f32.gmra.mxu0 %vm157_vm0, %v4776_v54 }
 0x116   :  { %v5232_v58 = vpop.f32.mrf.mxu1 }
 0x117   :  { %7045 = vst [vmem:[#allocation89_spill] sm:$0xff] %v5232_v58  ;;  %v394_v58 = vadd.f32 %v4798_v12, %v233_v45  ;;  %v5256_v1 = vpop.f32.mrf.mxu3  ;;  %v875_v12 = vmul.f32 0.0, %v5249_v8 }
 0x119   :  { %4326 = vmatmul.msk.f32.gmra.mxu1 %vm157_vm0, %v4776_v54  ;;  %v484_v54 = vadd.f32 %v5161_v56, %v394_v58  ;;  %v876_v56 = vsub.f32 1.0, %v875_v12 }
 0x11a   :  { %v5239_v48 = vpop.f32.mrf.mxu0 }
 0x11b   :  { %7046 = vst [vmem:[#allocation90_spill] sm:$0xff] %v5239_v48  ;;  %v241_v48 = vadd.f32 %v4800_v13, %v5226_v16  ;;  %v586_v45 = vadd.f32 %v5173_v40, %v484_v54  ;;  %v5267_v13 = vperm.slane %v95_v9, 2 }
 0x11d   :  { %4311 = vmatmul.msk.f32.gmra.mxu0 %vm157_vm0, %v4782_v61  ;;  %v398_v2 = vadd.f32 %v4806_v14, %v241_v48  ;;  %v881_v48 = vmul.f32 0.0, %v5267_v13 }
 0x11e   :  { %v5251_v31 = vpop.f32.mrf.mxu1 }
 0x11f   :  { %7047 = vst [vmem:[#allocation91_spill] sm:$0xff] %v5251_v31  ;;  %v5265_v31 = vpop.f32.mrf.mxu2  ;;  %v5273_v40 = vpop.f32.mrf.mxu3 }
 0x121   :  { %4327 = vmatmul.msk.f32.gmra.mxu1 %vm157_vm0, %v4782_v61  ;;  %v489_v61 = vadd.f32 %v5193_v22, %v398_v2 }
 0x122   :  { %v708_v18 = vpop.f32.mrf.mxu0 }
 0x123   :  { %v709_v19 = vadd.f32 %v708_v18, %v586_v45  ;;  %v592_v34 = vadd.f32 %v591_v42, %v489_v61  ;;  %v7048_v18 = vld [vmem:[#allocation17_spill] sm:$0xff] }
 0x124   :  { %v402_v9 = vadd.f32 %v7048_v18, %v249_v25  ;;  %v6828_v25 = vmov 1.0  }
 0x126   :  { %v793_v58 = vpop.f32.mrf.mxu1 }
 0x127   :  { %v794_v43 = vadd.f32 %v793_v58, %v709_v19  ;;  %v494_v19 = vadd.f32 %v493_v5, %v402_v9  ;;  %v5281_v2 = vpop.f32.mrf.mxu2  ;;  %v7050_v5 = vld [vmem:[#allocation19_spill] sm:$0xff]  ;;  %v5294_v18 = vpop.f32.mrf.mxu3 }
 0x129   :  { %v877_v14 = vmul.f32 %v876_v56, %v794_v43  ;;  %v6826_v43 = vmov 0.0  }
 0x12a   :  { %v712_v54 = vpop.f32.mrf.mxu0 }
 0x12b   :  { %v879_v45 = vadd.f32 %v877_v14, %v874_v59  ;;  %v713_v41 = vadd.f32 %v712_v54, %v592_v34  ;;  %v598_v54 = vadd.f32 %v597_v38, %v494_v19 }
 0x12d   :  { %v5277_v12 = vadd.f32 %v881_v48, %v879_v45 }
 0x12e   :  { %v797_v22 = vpop.f32.mrf.mxu1 }
 0x12f   :  { %v798_v58 = vadd.f32 %v797_v22, %v713_v41  ;;  %vm884_vm1 = vcmp.gt.f32.partialorder %v5277_v12, 0.5  ;;  %v406_v41 = vadd.f32 %v7050_v5, %v257_v50  ;;  %v1285_v15 = vmul.f32 %v5277_v12, %v5249_v8  ;;  %v7051_v50 = vld [vmem:[#allocation20_spill] sm:$0xff] }
 0x130   :  { %v4328_v42 = vsel %vm884_vm1, 1.0, %v6826_v43  ;;  %4330 = vmatmul.msk.f32.vlgmr.msrb.gmra.mxu3 %vm884_vm1, %v6828_v25  ;;  %v265_v38 = vadd.f32 %v7051_v50, %v5226_v16 }
 0x131   :  { %v878_v34 = vmul.f32 %v876_v56, %v798_v58  ;;  %v5290_v14 = vsub.f32 %v4328_v42, %v4328_v42  ;;  %1222 = vmatpush.msrb.mxu3 %v4836_v24  ;;  %v499_v19 = vadd.f32 %v498_v62, %v406_v41  ;;  %v1295_v5 = vsub.f32 1.0, %v4328_v42  ;;  %v5315_v62 = vpop.f32.mrf.mxu2 }
 0x132   :  { %v716_v61 = vpop.f32.mrf.mxu0  ;;  %v1287_v25 = vsub.f32 1.0, %v1285_v15  ;;  %v1293_v41 = vmul.f32 %v5277_v12, %v5267_v13 }
 0x133   :  { %v880_v9 = vadd.f32 %v878_v34, %v874_v59  ;;  %1224 = vmatpush.msrb.mxu3 %v4841_v26  ;;  %v924_v22 = vand.u32 4294901760, %v5290_v14  ;;  %v717_v56 = vadd.f32 %v716_v61, %v598_v54  ;;  %v7052_v61 = vmov 1.0  }
 0x134   :  { %v7053_v54 = vmov 0.0   ;;  %v1297_v17 = vmul.f32 %v1295_v5, %v1293_v41 }
 0x135   :  { %v5300_v43 = vadd.f32 %v881_v48, %v880_v9  ;;  %1226 = vmatpush.msrb.mxu3 %v4853_v28  ;;  %v925_v58 = vsub.f32 %v5290_v14, %v924_v22  ;;  %v1283_v48 = vmul.f32 %v879_v45, %v5263_v51  ;;  %v604_v45 = vadd.f32 %v5256_v1, %v499_v19  ;;  %v7057_v19 = vld [vmem:[#allocation22_spill] sm:$0xff] }
 0x136   :  { %v801_v59 = vpop.f32.mrf.mxu1  ;;  %v273_v5 = vadd.f32 %v7057_v19, %v5226_v16 }
 0x137   :  { %v802_v34 = vadd.f32 %v801_v59, %v717_v56  ;;  %1228 = vmatpush.msrb.mxu3 %v4870_v35  ;;  %vm885_vm2 = vcmp.gt.f32.partialorder %v5300_v43, 0.5  ;;  %v926_v47 = vand.u32 4294901760, %v925_v58  ;;  %v7054_v58 = vld [vmem:[#allocation21_spill] sm:$0xff] }
 0x138   :  { %4331 = vmatmul.msk.f32.gmra.mxu3 %vm885_vm2, %v7052_v61  ;;  %v4329_v50 = vsel %vm885_vm2, 1.0, %v7053_v54  ;;  %v410_v59 = vadd.f32 %v7054_v58, %v265_v38 }
 0x139   :  { %v1289_v42 = vmul.f32 %v1287_v25, %v802_v34  ;;  %1230 = vmatpush.msrb.mxu3 %v4888_v44  ;;  %927 = vmatmul.f32.vlgmr.msrb.gmra.mxu2 %v926_v47  ;;  %v5320_v56 = vsub.f32 %v4329_v50, %v4329_v50  ;;  %v1286_v25 = vmul.f32 %v5300_v43, %v5249_v8  ;;  %v5330_v47 = vpop.f32.mrf.mxu3  ;;  %v1296_v58 = vsub.f32 1.0, %v4329_v50 }
 0x13a   :  { %v720_v15 = vpop.f32.mrf.mxu0  ;;  %1151 = vmatpush.msrb.mxu2 %v7055_v21 }
 0x13b   :  { %v1291_v23 = vadd.f32 %v1289_v42, %v1283_v48  ;;  %1232 = vmatpush.msrb.mxu3 %v4897_v49  ;;  %v932_v34 = vand.u32 4294901760, %v5320_v56  ;;  %v721_v1 = vadd.f32 %v720_v15, %v604_v45  ;;  %v504_v48 = vadd.f32 %v5265_v31, %v410_v59  ;;  %v7058_v42 = vld [vmem:[#allocation31_spill] sm:$0xff]  ;;  %v7059_v45 = vld [vmem:[#allocation34_spill] sm:$0xff] }
 0x13c   :  { %1155 = vmatpush.msrb.mxu2 %v7056_v36  ;;  %v1288_v46 = vsub.f32 1.0, %v1286_v25  ;;  %v1284_v15 = vmul.f32 %v880_v9, %v5263_v51  ;;  %v1294_v59 = vmul.f32 %v5300_v43, %v5267_v13  ;;  %v7060_v9 = vld [vmem:[#allocation26_spill] sm:$0xff] }
 0x13d   :  { %v5332_v6 = vadd.f32 %v1297_v17, %v1291_v23  ;;  %1234 = vmatpush.msrb.mxu3 %v4914_v57  ;;  %v933_v38 = vsub.f32 %v5320_v56, %v932_v34 }
 0x13e   :  { %1159 = vmatpush.msrb.mxu2 %v7058_v42  ;;  %v805_v41 = vpop.f32.mrf.mxu1  ;;  %v1298_v63 = vmul.f32 %v1296_v58, %v1294_v59  ;;  %v7065_v59 = vld [vmem:[#allocation44_spill] sm:$0xff] }
 0x13f   :  { %vm1301_vm3 = vcmp.gt.f32.partialorder %v5332_v6, 0.5  ;;  %v806_v11 = vadd.f32 %v805_v41, %v721_v1  ;;  %1236 = vmatpush.msrb.mxu3 %v4933_v3  ;;  %v934_v17 = vand.u32 4294901760, %v933_v38  ;;  %v610_v1 = vadd.f32 %v5273_v40, %v504_v48  ;;  %v7061_v41 = vld [vmem:[#allocation39_spill] sm:$0xff]  ;;  %v7064_v48 = vld [vmem:[#allocation29_spill] sm:$0xff] }
 0x140   :  { %1163 = vmatpush.msrb.mxu2 %v7059_v45  ;;  %1138 = vmatmul.f32.vlgmr.msra.gmra.mxu3 %v924_v22  ;;  %v4338_v31 = vsel %vm1301_vm3, 1.0, %v7053_v54  ;;  %v414_v38 = vadd.f32 %v7060_v9, %v273_v5  ;;  %v5355_v22 = vpop.f32.mrf.mxu2  ;;  %v281_v58 = vadd.f32 %v7064_v48, %v5226_v16  ;;  %v1708_v48 = vmul.f32 %v1291_v23, %v5263_v51 }
 0x141   :  { %v1290_v50 = vmul.f32 %v1288_v46, %v806_v11  ;;  %1238 = vmatpush.msrb.mxu3 %v4958_v32  ;;  %935 = vmatmul.f32.gmra.mxu2 %v934_v17  ;;  %v5350_v25 = vsub.f32 %v4338_v31, %v4338_v31  ;;  %v1710_v11 = vmul.f32 %v5332_v6, %v5249_v8  ;;  %v7062_v17 = vld [vmem:[#allocation40_spill] sm:$0xff]  ;;  %v5377_v9 = vpop.f32.mrf.mxu3 }
 0x142   :  { %v724_v19 = vpop.f32.mrf.mxu0  ;;  %1167 = vmatpush.msrb.mxu2 %v7061_v41 }
 0x143   :  { %v5357_v33 = vadd.f32 %v1290_v50, %v1284_v15  ;;  %1240 = vmatpush.msrb.mxu3 %v4976_v52  ;;  %1511 = vmatmul.f32.vlgmr.msra.gmra.mxu0 %v5350_v25  ;;  %v6844_v46 = vand.u32 4294901760, %v5350_v25  ;;  %v725_v40 = vadd.f32 %v724_v19, %v610_v1  ;;  %v509_v15 = vadd.f32 %v5281_v2, %v414_v38 }
 0x144   :  { %1171 = vmatpush.msrb.mxu2 %v7062_v17  ;;  %1993 = vmatpush.msra.mxu0 %v7055_v21  ;;  %v1712_v19 = vsub.f32 1.0, %v1710_v11  ;;  %v1720_v1 = vsub.f32 1.0, %v4338_v31 }
 0x145   :  { %v5367_v5 = vadd.f32 %v1298_v63, %v5357_v33  ;;  %1242 = vmatpush.msrb.mxu3 %v4982_v20  ;;  %1555 = vmatmul.f32.vlgmr.msra.gmra.mxu1 %v6844_v46  ;;  %v7066_v46 = vld [vmem:[#allocation48_spill] sm:$0xff]  ;;  %v616_v23 = vadd.f32 %v5294_v18, %v509_v15 }
 0x146   :  { %1175 = vmatpush.msrb.mxu2 %v7065_v59  ;;  %1997 = vmatpush.msra.mxu0 %v7056_v36  ;;  %v809_v50 = vpop.f32.mrf.mxu1 }
 0x147   :  { %7063 = vst [vmem:[#allocation17_spill] sm:$0xff] %v5367_v5  ;;  %2064 = vmatpush.msra.mxu1 %v4836_v24  ;;  %v810_v63 = vadd.f32 %v809_v50, %v725_v40  ;;  %1244 = vmatpush.msrb.mxu3 %v5001_v37  ;;  %vm1302_vm4 = vcmp.gt.f32.partialorder %v5367_v5, 0.5  ;;  %v1718_v40 = vmul.f32 %v5332_v6, %v5267_v13  ;;  %v7068_v50 = vld [vmem:[#allocation38_spill] sm:$0xff]  ;;  %v7164_v6 = vld [vmem:[#allocation28_spill] sm:$0xff] }
 0x148   :  { %1179 = vmatpush.msrb.mxu2 %v7066_v46  ;;  %2001 = vmatpush.msra.mxu0 %v7058_v42  ;;  %v4339_v2 = vsel %vm1302_vm4, 1.0, %v7053_v54  ;;  %v418_v36 = vadd.f32 %v7068_v50, %v281_v58  ;;  %v5406_v58 = vpop.f32.mrf.mxu2 }
 0x149   :  { %v1714_v38 = vmul.f32 %v1712_v19, %v810_v63  ;;  %2066 = vmatpush.msra.mxu1 %v4841_v26  ;;  %1144 = vmatmul.f32.gmra.mxu3 %v932_v34  ;;  %v5391_v11 = vsub.f32 %v4339_v2, %v4339_v2  ;;  %v1722_v63 = vmul.f32 %v1720_v1, %v1718_v40  ;;  %v7069_v19 = vld [vmem:[#allocation52_spill] sm:$0xff]  ;;  %v1721_v18 = vsub.f32 1.0, %v4339_v2  ;;  %v5429_v2 = vpop.f32.mrf.mxu3 }
 0x14a   :  { %v728_v31 = vpop.f32.mrf.mxu0  ;;  %1246 = vmatpush.msrb.mxu3 %v5022_v29  ;;  %1094 = vmatmul.f32.vlgmr.msra.gmra.mxu2 %v5290_v14  ;;  %v1711_v34 = vmul.f32 %v5367_v5, %v5249_v8  ;;  %v7070_v1 = vld [vmem:[#allocation56_spill] sm:$0xff]  ;;  %v514_v40 = vadd.f32 %v5315_v62, %v418_v36  ;;  %v1709_v36 = vmul.f32 %v5357_v33, %v5263_v51  ;;  %v7076_v33 = vld [vmem:[#allocation61_spill] sm:$0xff] }
 0x14b   :  { %7067 = vst [vmem:[#allocation18_spill] sm:$0xff] %v5391_v11  ;;  %v5397_v42 = vadd.f32 %v1714_v38, %v1708_v48  ;;  %1183 = vmatpush.msrb.mxu2 %v7069_v19  ;;  %2005 = vmatpush.msra.mxu0 %v7059_v45  ;;  %v729_v15 = vadd.f32 %v728_v31, %v616_v23  ;;  %v7071_v48 = vld [vmem:[#allocation43_spill] sm:$0xff]  ;;  %v7073_v45 = vand.u32 4294901760, %v5391_v11 }
 0x14c   :  { %2068 = vmatpush.msra.mxu1 %v4853_v28  ;;  %1248 = vmatpush.msrb.mxu3 %v5046_v7  ;;  %v289_v38 = vadd.f32 %v7071_v48, %v5226_v16  ;;  %v1713_v23 = vsub.f32 1.0, %v1711_v34 }
 0x14d   :  { %v5409_v14 = vadd.f32 %v1722_v63, %v5397_v42  ;;  %1187 = vmatpush.msrb.mxu2 %v7070_v1  ;;  %1516 = vmatmul.f32.gmra.mxu0 %v5391_v11  ;;  %v7072_v63 = vld [vmem:[#allocation58_spill] sm:$0xff]  ;;  %v622_v11 = vadd.f32 %v5330_v47, %v514_v40  ;;  %v7077_v47 = vld [vmem:[#allocation65_spill] sm:$0xff] }
 0x14e   :  { %2009 = vmatpush.msra.mxu0 %v7061_v41  ;;  %2070 = vmatpush.msra.mxu1 %v4870_v35  ;;  %v813_v50 = vpop.f32.mrf.mxu1 }
 0x14f   :  { %1250 = vmatpush.msrb.mxu3 %v5055_v27  ;;  %1191 = vmatpush.msrb.mxu2 %v7072_v63  ;;  %v814_v31 = vadd.f32 %v813_v50, %v729_v15  ;;  %vm1726_vm5 = vcmp.gt.f32.partialorder %v5409_v14, 0.5  ;;  %v1719_v15 = vmul.f32 %v5367_v5, %v5267_v13  ;;  %v7075_v50 = vld [vmem:[#allocation51_spill] sm:$0xff]  ;;  %v2135_v41 = vmul.f32 %v5409_v14, %v5249_v8 }
 0x150   :  { %1561 = vmatmul.f32.gmra.mxu1 %v7073_v45  ;;  %2013 = vmatpush.msra.mxu0 %v7062_v17  ;;  %v4348_v62 = vsel %vm1726_vm5, 1.0, %v7053_v54  ;;  %v422_v17 = vadd.f32 %v7075_v50, %v289_v38 }
 0x151   :  { %2072 = vmatpush.msra.mxu1 %v4888_v44  ;;  %v1715_v34 = vmul.f32 %v1713_v23, %v814_v31  ;;  %1252 = vmatpush.msrb.mxu3 %v5079_v10  ;;  %v5435_v48 = vsub.f32 %v4348_v62, %v4348_v62  ;;  %v1723_v21 = vmul.f32 %v1721_v18, %v1719_v15  ;;  %v7078_v18 = vld [vmem:[#allocation57_spill] sm:$0xff] }
 0x152   :  { %v732_v45 = vpop.f32.mrf.mxu0  ;;  %1195 = vmatpush.msrb.mxu2 %v7076_v33  ;;  %2017 = vmatpush.msra.mxu0 %v7065_v59  ;;  %v297_v40 = vadd.f32 %v7078_v18, %v5226_v16 }
 0x153   :  { %7074 = vst [vmem:[#allocation19_spill] sm:$0xff] %v5435_v48  ;;  %1361 = vmatpush.msra.mxu3 %v4877_v39  ;;  %v5443_v5 = vadd.f32 %v1715_v34, %v1709_v36  ;;  %2074 = vmatpush.msra.mxu1 %v4897_v49  ;;  %v6855_v31 = vand.u32 4294901760, %v5435_v48  ;;  %v733_v23 = vadd.f32 %v732_v45, %v622_v11  ;;  %v2137_v34 = vsub.f32 1.0, %v2135_v41 }
 0x154   :  { %4334 = vmatmul.msk.f32.vlgmr.msrb.gmra.mxu3 %vm884_vm1, %v7052_v61  ;;  %1099 = vmatmul.f32.gmra.mxu2 %v5320_v56  ;;  %v519_v36 = vadd.f32 %v5355_v22, %v422_v17  ;;  %v5462_v56 = vpop.f32.mrf.mxu2  ;;  %v2145_v45 = vsub.f32 1.0, %v4348_v62  ;;  %v2133_v41 = vmul.f32 %v5397_v42, %v5263_v51  ;;  %v7080_v17 = vld [vmem:[#allocation73_spill] sm:$0xff]  ;;  %v5489_v42 = vpop.f32.mrf.mxu3 }
 0x155   :  { %v5453_v38 = vadd.f32 %v1723_v21, %v5443_v5  ;;  %1199 = vmatpush.msrb.mxu2 %v7077_v47  ;;  %1367 = vmatpush.msra.mxu3 %v4893_v53  ;;  %v7079_v21 = vld [vmem:[#allocation70_spill] sm:$0xff]  ;;  %v1767_v50 = vsub.f32 %v5435_v48, %v6855_v31 }
 0x156   :  { %2021 = vmatpush.msra.mxu0 %v7066_v46  ;;  %2076 = vmatpush.msra.mxu1 %v4914_v57  ;;  %v817_v15 = vpop.f32.mrf.mxu1  ;;  %v628_v31 = vadd.f32 %v5377_v9, %v519_v36  ;;  %v7082_v48 = vld [vmem:[#allocation66_spill] sm:$0xff] }
 0x157   :  { %1203 = vmatpush.msrb.mxu2 %v7079_v21  ;;  %1373 = vmatpush.msra.mxu3 %v4909_v55  ;;  %v818_v11 = vadd.f32 %v817_v15, %v733_v23  ;;  %vm1727_vm6 = vcmp.gt.f32.partialorder %v5453_v38, 0.5  ;;  %v2143_v23 = vmul.f32 %v5409_v14, %v5267_v13  ;;  %v426_v55 = vadd.f32 %v7082_v48, %v297_v40 }
 0x158   :  { %2025 = vmatpush.msra.mxu0 %v7069_v19  ;;  %2078 = vmatpush.msra.mxu1 %v4933_v3  ;;  %v4349_v22 = vsel %vm1727_vm6, 1.0, %v7053_v54  ;;  %v2136_v9 = vmul.f32 %v5453_v38, %v5249_v8 }
 0x159   :  { %1207 = vmatpush.msrb.mxu2 %v7080_v17  ;;  %1379 = vmatpush.msra.mxu3 %v4936_v4  ;;  %v2139_v62 = vmul.f32 %v2137_v34, %v818_v11  ;;  %v5481_v15 = vsub.f32 %v4349_v22, %v4349_v22  ;;  %v2147_v11 = vmul.f32 %v2145_v45, %v2143_v23  ;;  %v1768_v4 = vand.u32 4294901760, %v1767_v50  ;;  %v7084_v45 = vld [vmem:[#allocation71_spill] sm:$0xff] }
 0x15a   :  { %v736_v18 = vpop.f32.mrf.mxu0  ;;  %4350 = vmatmul.msk.f32.vlgmr.msrb.gmra.mxu1 %vm1726_vm5, %v7052_v61  ;;  %2029 = vmatpush.msra.mxu0 %v7070_v1  ;;  %v305_v50 = vadd.f32 %v7084_v45, %v5226_v16 }
 0x15b   :  { %7081 = vst [vmem:[#allocation20_spill] sm:$0xff] %v5481_v15  ;;  %2080 = vmatpush.msra.mxu1 %v4958_v32  ;;  %v5492_v34 = vadd.f32 %v2139_v62, %v2133_v41  ;;  %1211 = vmatpush.msrb.mxu2 %v5109_v0  ;;  %v737_v40 = vadd.f32 %v736_v18, %v628_v31  ;;  %v6865_v36 = vand.u32 4294901760, %v5481_v15  ;;  %v2146_v31 = vsub.f32 1.0, %v4349_v22 }
 0x15c   :  { %1385 = vmatpush.msra.mxu3 %v4956_v30  ;;  %2033 = vmatpush.msra.mxu0 %v7072_v63  ;;  %v524_v41 = vadd.f32 %v5406_v58, %v426_v55  ;;  %v2138_v18 = vsub.f32 1.0, %v2136_v9  ;;  %v2134_v55 = vmul.f32 %v5443_v5, %v5263_v51  ;;  %v2144_v58 = vmul.f32 %v5453_v38, %v5267_v13  ;;  %v5525_v12 = vpop.f32.mrf.mxu2 }
 0x15d   :  { %v5500_v48 = vadd.f32 %v2147_v11, %v5492_v34  ;;  %2082 = vmatpush.msra.mxu1 %v4976_v52  ;;  %4335 = vmatmul.msk.f32.gmra.mxu3 %vm885_vm2, %v7052_v61 }
 0x15e   :  { %1308 = vmatpush.msra.mxu2 %v4836_v24  ;;  %1391 = vmatpush.msra.mxu3 %v4961_v60  ;;  %v821_v62 = vpop.f32.mrf.mxu1  ;;  %v634_v45 = vadd.f32 %v5429_v2, %v524_v41  ;;  %v5549_v2 = vpop.f32.mrf.mxu3 }
 0x15f   :  { %7083 = vst [vmem:[#allocation21_spill] sm:$0xff] %v5500_v48  ;;  %vm2151_vm7 = vcmp.gt.f32.partialorder %v5500_v48, 0.5  ;;  %4332 = vmatmul.msk.f32.vlgmr.msrb.gmra.mxu2 %vm884_vm1, %v7052_v61  ;;  %1769 = vmatmul.f32.vlgmr.msrb.gmra.mxu0 %v1768_v4  ;;  %v822_v23 = vadd.f32 %v821_v62, %v737_v40  ;;  %v7085_v4 = vld [vmem:[#allocation50_spill] sm:$0xff]  ;;  %v1775_v40 = vsub.f32 %v5481_v15, %v6865_v36 }
 0x160   :  { %2037 = vmatpush.msra.mxu0 %v7076_v33  ;;  %2084 = vmatpush.msra.mxu1 %v4982_v20  ;;  %v4358_v11 = vsel %vm2151_vm7, 1.0, %v7053_v54  ;;  %v7086_v62 = vld [vmem:[#allocation78_spill] sm:$0xff]  ;;  %v2560_v36 = vmul.f32 %v5500_v48, %v5249_v8 }
 0x161   :  { %1310 = vmatpush.msra.mxu2 %v4841_v26  ;;  %1397 = vmatpush.msra.mxu3 %v7085_v4  ;;  %v2140_v22 = vmul.f32 %v2138_v18, %v822_v23  ;;  %v5532_v5 = vsub.f32 %v4358_v11, %v4358_v11  ;;  %v430_v60 = vadd.f32 %v7086_v62, %v305_v50  ;;  %v7087_v33 = vld [vmem:[#allocation54_spill] sm:$0xff] }
 0x162   :  { %v740_v9 = vpop.f32.mrf.mxu0  ;;  %2041 = vmatpush.msra.mxu0 %v7077_v47  ;;  %2086 = vmatpush.msra.mxu1 %v5001_v37  ;;  %v2148_v18 = vmul.f32 %v2146_v31, %v2144_v58  ;;  %v1776_v31 = vand.u32 4294901760, %v1775_v40  ;;  %v7090_v58 = vld [vmem:[#allocation80_spill] sm:$0xff]  ;;  %v2562_v40 = vsub.f32 1.0, %v2560_v36  ;;  %v2568_v36 = vmul.f32 %v5500_v48, %v5267_v13 }
 0x163   :  { %1312 = vmatpush.msra.mxu2 %v4853_v28  ;;  %1403 = vmatpush.msra.mxu3 %v7087_v33  ;;  %v5540_v23 = vadd.f32 %v2140_v22, %v2134_v55  ;;  %v6868_v15 = vand.u32 4294901760, %v5532_v5  ;;  %v741_v41 = vadd.f32 %v740_v9, %v634_v45  ;;  %v313_v22 = vadd.f32 %v7090_v58, %v5226_v16  ;;  %v7091_v33 = vld [vmem:[#allocation60_spill] sm:$0xff]  ;;  %v7092_v58 = vld [vmem:[#allocation63_spill] sm:$0xff] }
 0x164   :  { %4351 = vmatmul.msk.f32.gmra.mxu1 %vm1727_vm6, %v7052_v61  ;;  %2045 = vmatpush.msra.mxu0 %v7079_v21  ;;  %v529_v62 = vadd.f32 %v5462_v56, %v430_v60  ;;  %v2570_v45 = vsub.f32 1.0, %v4358_v11  ;;  %v2558_v60 = vmul.f32 %v5492_v34, %v5263_v51  ;;  %v538_v34 = vpop.f32.mrf.mxu2 }
 0x165   :  { %2088 = vmatpush.msra.mxu1 %v5022_v29  ;;  %v5553_v50 = vadd.f32 %v2148_v18, %v5540_v23  ;;  %1314 = vmatpush.msra.mxu2 %v4870_v35  ;;  %v5559_v55 = vsub.f32 %v5532_v5, %v6868_v15 }
 0x166   :  { %1409 = vmatpush.msra.mxu3 %v7091_v33  ;;  %2049 = vmatpush.msra.mxu0 %v7080_v17  ;;  %v825_v18 = vpop.f32.mrf.mxu1  ;;  %v640_v43 = vadd.f32 %v5489_v42, %v529_v62  ;;  %v7096_v42 = vld [vmem:[#allocation25_spill] sm:$0xff] }
 0x167   :  { %7088 = vst [vmem:[#allocation22_spill] sm:$0xff] %v5553_v50  ;;  %vm2152_vm8 = vcmp.gt.f32.partialorder %v5553_v50, 0.5  ;;  %2090 = vmatpush.msra.mxu1 %v5046_v7  ;;  %1316 = vmatpush.msra.mxu2 %v4888_v44  ;;  %v826_v9 = vadd.f32 %v825_v18, %v741_v41  ;;  %v7093_v18 = vld [vmem:[#allocation81_spill] sm:$0xff]  ;;  %v2561_v48 = vmul.f32 %v5553_v50, %v5249_v8 }
 0x168   :  { %7089 = vst [vmem:[#allocation26_spill] sm:$0xff] %v5559_v55  ;;  %4333 = vmatmul.msk.f32.gmra.mxu2 %vm885_vm2, %v7052_v61  ;;  %1415 = vmatpush.msra.mxu3 %v7092_v58  ;;  %v4359_v56 = vsel %vm2152_vm8, 1.0, %v7053_v54  ;;  %v434_v55 = vadd.f32 %v7093_v18, %v313_v22  ;;  %v7094_v58 = vld [vmem:[#allocation23_spill] sm:$0xff]  ;;  %v7100_v18 = vld [vmem:[#allocation68_spill] sm:$0xff] }
 0x169   :  { %1777 = vmatmul.f32.gmra.mxu0 %v1776_v31  ;;  %2092 = vmatpush.msra.mxu1 %v5055_v27  ;;  %v2564_v15 = vmul.f32 %v2562_v40, %v826_v9  ;;  %v5581_v41 = vsub.f32 %v4359_v56, %v4359_v56  ;;  %v7095_v31 = vld [vmem:[#allocation64_spill] sm:$0xff]  ;;  %v2572_v40 = vmul.f32 %v2570_v45, %v2568_v36  ;;  %v7099_v45 = vld [vmem:[#allocation82_spill] sm:$0xff] }
 0x16a   :  { %v744_v11 = vpop.f32.mrf.mxu0  ;;  %2053 = vmatpush.msra.mxu0 %v5109_v0  ;;  %1318 = vmatpush.msra.mxu2 %v4897_v49  ;;  %v534_v36 = vadd.f32 %v5525_v12, %v434_v55  ;;  %v2569_v12 = vmul.f32 %v5553_v50, %v5267_v13  ;;  %v7102_v55 = vld [vmem:[#allocation72_spill] sm:$0xff] }
 0x16b   :  { %1421 = vmatpush.msra.mxu3 %v7095_v31  ;;  %v5589_v9 = vadd.f32 %v2564_v15, %v2558_v60  ;;  %v6871_v33 = vand.u32 4294901760, %v5581_v41  ;;  %2094 = vmatpush.msra.mxu1 %v5079_v10  ;;  %v745_v62 = vadd.f32 %v744_v11, %v640_v43  ;;  %v321_v60 = vadd.f32 %v7099_v45, %v5226_v16  ;;  %v651_v31 = vpop.f32.mrf.mxu3  ;;  %v7101_v11 = vld [vmem:[#allocation28_spill] sm:$0xff] }
 0x16c   :  { %2313 = vmatpush.msrb.mxu0 %v7094_v58  ;;  %1320 = vmatpush.msra.mxu2 %v4914_v57  ;;  %v7103_v45 = vld [vmem:[#allocation32_spill] sm:$0xff]  ;;  %v7105_v58 = vld [vmem:[#allocation75_spill] sm:$0xff] }
 0x16d   :  { %2371 = vmatpush.msrb.mxu1 %v4836_v24  ;;  %v5599_v22 = vadd.f32 %v2572_v40, %v5589_v9  ;;  %v5604_v15 = vsub.f32 %v5581_v41, %v6871_v33  ;;  %1427 = vmatpush.msra.mxu3 %v7100_v18  ;;  %v2571_v40 = vsub.f32 1.0, %v4359_v56  ;;  %v2563_v33 = vsub.f32 1.0, %v2561_v48 }
 0x16e   :  { %2316 = vmatpush.msrb.mxu0 %v7096_v42  ;;  %4354 = vmatmul.msk.f32.vlgmr.msra.gmra.mxu1 %vm1726_vm5, %v7052_v61  ;;  %v829_v42 = vpop.f32.mrf.mxu1 }
 0x16f   :  { %7097 = vst [vmem:[#allocation29_spill] sm:$0xff] %v5599_v22  ;;  %vm2576_vm9 = vcmp.gt.f32.partialorder %v5599_v22, 0.5  ;;  %1322 = vmatpush.msra.mxu2 %v4933_v3  ;;  %v830_v43 = vadd.f32 %v829_v42, %v745_v62  ;;  %2373 = vmatpush.msrb.mxu1 %v4841_v26  ;;  %v2559_v42 = vmul.f32 %v5540_v23, %v5263_v51 }
 0x170   :  { %7098 = vst [vmem:[#allocation38_spill] sm:$0xff] %v5604_v15  ;;  %2319 = vmatpush.msrb.mxu0 %v7101_v11  ;;  %1433 = vmatpush.msra.mxu3 %v7102_v55  ;;  %v5623_v56 = vsel %vm2576_vm9, 1.0, %v7053_v54  ;;  %v2993_v15 = vmul.f32 %v5599_v22, %v5267_v13  ;;  %v646_v55 = vadd.f32 %v5549_v2, %v534_v36  ;;  %v7104_v11 = vld [vmem:[#allocation83_spill] sm:$0xff]  ;;  %v7107_v36 = vld [vmem:[#allocation77_spill] sm:$0xff] }
 0x171   :  { %1324 = vmatpush.msra.mxu2 %v4958_v32  ;;  %v2565_v48 = vmul.f32 %v2563_v33, %v830_v43  ;;  %v2995_v50 = vsub.f32 1.0, %v5623_v56  ;;  %v438_v18 = vadd.f32 %v7104_v11, %v321_v60  ;;  %2375 = vmatpush.msrb.mxu1 %v4853_v28  ;;  %v2573_v0 = vmul.f32 %v2571_v40, %v2569_v12  ;;  %v7106_v2 = vld [vmem:[#allocation35_spill] sm:$0xff]  ;;  %v543_v60 = vpop.f32.mrf.mxu2  ;;  %v7109_v11 = vld [vmem:[#allocation84_spill] sm:$0xff] }
 0x172   :  { %2322 = vmatpush.msrb.mxu0 %v7103_v45  ;;  %v748_v62 = vpop.f32.mrf.mxu0  ;;  %1439 = vmatpush.msra.mxu3 %v7105_v58  ;;  %v2985_v23 = vmul.f32 %v5599_v22, %v5249_v8  ;;  %v329_v12 = vadd.f32 %v7109_v11, %v5226_v16 }
 0x173   :  { %4352 = vmatmul.msk.f32.vlgmr.msra.gmra.mxu0 %vm1726_vm5, %v7052_v61  ;;  %1326 = vmatpush.msra.mxu2 %v4976_v52  ;;  %v5640_v33 = vadd.f32 %v2565_v48, %v2559_v42  ;;  %v2997_v43 = vmul.f32 %v2995_v50, %v2993_v15  ;;  %v749_v40 = vadd.f32 %v748_v62, %v646_v55  ;;  %v7110_v48 = vld [vmem:[#allocation37_spill] sm:$0xff]  ;;  %v7111_v15 = vld [vmem:[#allocation79_spill] sm:$0xff] }
 0x174   :  { %2325 = vmatpush.msrb.mxu0 %v7106_v2  ;;  %2377 = vmatpush.msrb.mxu1 %v4870_v35  ;;  %v539_v42 = vadd.f32 %v538_v34, %v438_v18  ;;  %v2987_v55 = vsub.f32 1.0, %v2985_v23  ;;  %v657_v34 = vpop.f32.mrf.mxu3  ;;  %v7112_v18 = vld [vmem:[#allocation41_spill] sm:$0xff]  ;;  %v2983_v62 = vmul.f32 %v5589_v9, %v5263_v51 }
 0x175   :  { %1445 = vmatpush.msra.mxu3 %v7107_v36  ;;  %1328 = vmatpush.msra.mxu2 %v4982_v20  ;;  %v5649_v14 = vadd.f32 %v2573_v0, %v5640_v33 }
 0x176   :  { %2328 = vmatpush.msrb.mxu0 %v7110_v48  ;;  %2379 = vmatpush.msrb.mxu1 %v4888_v44  ;;  %v833_v50 = vpop.f32.mrf.mxu1  ;;  %v7113_v48 = vld [vmem:[#allocation85_spill] sm:$0xff] }
 0x177   :  { %7108 = vst [vmem:[#allocation43_spill] sm:$0xff] %v5649_v14  ;;  %1451 = vmatpush.msra.mxu3 %v7111_v15  ;;  %4355 = vmatmul.msk.f32.gmra.mxu1 %vm1727_vm6, %v7052_v61  ;;  %v834_v22 = vadd.f32 %v833_v50, %v749_v40  ;;  %vm2577_vm10 = vcmp.gt.f32.partialorder %v5649_v14, 0.5  ;;  %v2994_v11 = vmul.f32 %v5649_v14, %v5267_v13 }
 0x178   :  { %1330 = vmatpush.msra.mxu2 %v5001_v37  ;;  %4340 = vmatmul.msk.f32.vlgmr.msra.gmra.mxu3 %vm1301_vm3, %v7052_v61  ;;  %v5667_v0 = vsel %vm2577_vm10, 1.0, %v7053_v54  ;;  %v652_v15 = vadd.f32 %v651_v31, %v539_v42  ;;  %v442_v36 = vadd.f32 %v7113_v48, %v329_v12  ;;  %v2986_v9 = vmul.f32 %v5649_v14, %v5249_v8 }
 0x179   :  { %1639 = vmatpush.msrb.mxu3 %v4836_v24  ;;  %2331 = vmatpush.msrb.mxu0 %v7112_v18  ;;  %v2989_v23 = vmul.f32 %v2987_v55, %v834_v22  ;;  %v2996_v50 = vsub.f32 1.0, %v5667_v0  ;;  %v7114_v18 = vld [vmem:[#allocation45_spill] sm:$0xff]  ;;  %v7116_v12 = vand.u32 4294901760, %v5350_v25  ;;  %v7117_v55 = vld [vmem:[#allocation86_spill] sm:$0xff] }
 0x17a   :  { %v752_v40 = vpop.f32.mrf.mxu0  ;;  %2381 = vmatpush.msrb.mxu1 %v4897_v49  ;;  %1332 = vmatpush.msra.mxu2 %v5022_v29  ;;  %v2988_v14 = vsub.f32 1.0, %v2986_v9 }
 0x17b   :  { %1641 = vmatpush.msrb.mxu3 %v4841_v26  ;;  %2334 = vmatpush.msrb.mxu0 %v7114_v18  ;;  %v2991_v2 = vadd.f32 %v2989_v23, %v2983_v62  ;;  %v2998_v22 = vmul.f32 %v2996_v50, %v2994_v11  ;;  %v1342_v42 = vsub.f32 %v5350_v25, %v7116_v12  ;;  %v7118_v23 = vld [vmem:[#allocation49_spill] sm:$0xff]  ;;  %v548_v50 = vpop.f32.mrf.mxu2  ;;  %v7121_v12 = vld [vmem:[#allocation87_spill] sm:$0xff] }
 0x17c   :  { %2383 = vmatpush.msrb.mxu1 %v4914_v57  ;;  %4353 = vmatmul.msk.f32.gmra.mxu0 %vm1727_vm6, %v7052_v61  ;;  %v753_v48 = vadd.f32 %v752_v40, %v652_v15  ;;  %v337_v62 = vadd.f32 %v7117_v55, %v5226_v16  ;;  %v544_v11 = vadd.f32 %v543_v60, %v442_v36  ;;  %v7119_v18 = vld [vmem:[#allocation53_spill] sm:$0xff]  ;;  %v7172_v25 = vld [vmem:[#allocation79_spill] sm:$0xff] }
 0x17d   :  { %1334 = vmatpush.msra.mxu2 %v5046_v7  ;;  %1643 = vmatpush.msrb.mxu3 %v4853_v28  ;;  %v5689_v31 = vadd.f32 %v2997_v43, %v2991_v2  ;;  %v1343_v60 = vand.u32 4294901760, %v1342_v42  ;;  %v2984_v36 = vmul.f32 %v5640_v33, %v5263_v51 }
 0x17e   :  { %2337 = vmatpush.msrb.mxu0 %v7118_v23  ;;  %2385 = vmatpush.msrb.mxu1 %v4933_v3  ;;  %v837_v38 = vpop.f32.mrf.mxu1  ;;  %v446_v9 = vadd.f32 %v7121_v12, %v337_v62  ;;  %v658_v55 = vadd.f32 %v657_v34, %v544_v11  ;;  %v7123_v23 = vld [vmem:[#allocation24_spill] sm:$0xff] }
 0x17f   :  { %7115 = vst [vmem:[#allocation51_spill] sm:$0xff] %v5689_v31  ;;  %1336 = vmatpush.msra.mxu2 %v5055_v27  ;;  %1645 = vmatpush.msrb.mxu3 %v4870_v35  ;;  %v838_v43 = vadd.f32 %v837_v38, %v753_v48  ;;  %vm3001_vm11 = vcmp.gt.f32.partialorder %v5689_v31, 0.5  ;;  %v7122_v48 = vld [vmem:[#allocation55_spill] sm:$0xff]  ;;  %v663_v38 = vpop.f32.mrf.mxu3  ;;  %v3410_v42 = vmul.f32 %v5689_v31, %v5249_v8  ;;  %v7127_v11 = vld [vmem:[#allocation88_spill] sm:$0xff] }
 0x180   :  { %2340 = vmatpush.msrb.mxu0 %v7119_v18  ;;  %2387 = vmatpush.msrb.mxu1 %v4958_v32  ;;  %v5722_v33 = vsel %vm3001_vm11, 1.0, %v7053_v54 }
 0x181   :  { %1338 = vmatpush.msra.mxu2 %v5079_v10  ;;  %4341 = vmatmul.msk.f32.gmra.mxu3 %vm1302_vm4, %v7052_v61  ;;  %v2990_v15 = vmul.f32 %v2988_v14, %v838_v43  ;;  %7124 = vst [vmem:[#allocation57_spill] sm:$0xff] %v5722_v33  ;;  %v7125_v14 = vld [vmem:[#allocation59_spill] sm:$0xff]  ;;  %v345_v43 = vadd.f32 %v7127_v11, %v5226_v16  ;;  %v3412_v58 = vsub.f32 1.0, %v3410_v42 }
 0x182   :  { %v756_v40 = vpop.f32.mrf.mxu0  ;;  %1647 = vmatpush.msrb.mxu3 %v4888_v44  ;;  %2343 = vmatpush.msrb.mxu0 %v7122_v48  ;;  %v3408_v11 = vmul.f32 %v2991_v2, %v5263_v51 }
 0x183   :  { %2389 = vmatpush.msrb.mxu1 %v4976_v52  ;;  %1344 = vmatmul.f32.vlgmr.msra.gmra.mxu2 %v1343_v60  ;;  %v5713_v18 = vadd.f32 %v2990_v15, %v2984_v36  ;;  %v757_v62 = vadd.f32 %v756_v40, %v658_v55  ;;  %v549_v60 = vadd.f32 %v548_v50, %v446_v9  ;;  %v7128_v36 = vld [vmem:[#allocation27_spill] sm:$0xff]  ;;  %v7129_v15 = vld [vmem:[#allocation18_spill] sm:$0xff]  ;;  %v3420_v40 = vsub.f32 1.0, %v5722_v33  ;;  %v553_v50 = vpop.f32.mrf.mxu2 }
 0x184   :  { %1568 = vmatpush.msrb.mxu2 %v7123_v23  ;;  %1649 = vmatpush.msrb.mxu3 %v4897_v49  ;;  %v7130_v12 = vand.u32 4294901760, %v7129_v15  ;;  %v7132_v55 = vld [vmem:[#allocation31_spill] sm:$0xff] }
 0x185   :  { %2346 = vmatpush.msrb.mxu0 %v7125_v14  ;;  %2391 = vmatpush.msrb.mxu1 %v4982_v20  ;;  %v5727_v34 = vadd.f32 %v2998_v22, %v5713_v18  ;;  %v7131_v14 = vld [vmem:[#allocation62_spill] sm:$0xff]  ;;  %v7133_v9 = vld [vmem:[#allocation67_spill] sm:$0xff] }
 0x186   :  { %1572 = vmatpush.msrb.mxu2 %v7128_v36  ;;  %1651 = vmatpush.msrb.mxu3 %v4914_v57  ;;  %v1350_v48 = vsub.f32 %v7129_v15, %v7130_v12  ;;  %v841_v23 = vpop.f32.mrf.mxu1  ;;  %v7134_v12 = vld [vmem:[#allocation89_spill] sm:$0xff] }
 0x187   :  { %7126 = vst [vmem:[#allocation66_spill] sm:$0xff] %v5727_v34  ;;  %2349 = vmatpush.msrb.mxu0 %v7131_v14  ;;  %2393 = vmatpush.msrb.mxu1 %v5001_v37  ;;  %v842_v22 = vadd.f32 %v841_v23, %v757_v62  ;;  %vm3002_vm12 = vcmp.gt.f32.partialorder %v5727_v34, 0.5  ;;  %v3418_v23 = vmul.f32 %v5689_v31, %v5267_v13  ;;  %v7135_v14 = vld [vmem:[#allocation34_spill] sm:$0xff]  ;;  %v7136_v36 = vld [vmem:[#allocation69_spill] sm:$0xff]  ;;  %v7142_v31 = vld [vmem:[#allocation40_spill] sm:$0xff] }
 0x188   :  { %1576 = vmatpush.msrb.mxu2 %v7132_v55  ;;  %1653 = vmatpush.msrb.mxu3 %v4933_v3  ;;  %v664_v62 = vadd.f32 %v663_v38, %v549_v60  ;;  %v450_v33 = vadd.f32 %v7134_v12, %v345_v43  ;;  %v1351_v55 = vand.u32 4294901760, %v1350_v48  ;;  %v5759_v38 = vsel %vm3002_vm12, 1.0, %v7053_v54  ;;  %v669_v43 = vpop.f32.mrf.mxu3  ;;  %v7138_v48 = vld [vmem:[#allocation39_spill] sm:$0xff]  ;;  %v7139_v60 = vld [vmem:[#allocation74_spill] sm:$0xff] }
 0x189   :  { %2352 = vmatpush.msrb.mxu0 %v7133_v9  ;;  %2395 = vmatpush.msrb.mxu1 %v5022_v29  ;;  %v3414_v15 = vmul.f32 %v3412_v58, %v842_v22  ;;  %v3422_v2 = vmul.f32 %v3420_v40, %v3418_v23  ;;  %v3411_v58 = vmul.f32 %v5727_v34, %v5249_v8  ;;  %v3421_v12 = vsub.f32 1.0, %v5759_v38 }
 0x18a   :  { %v760_v42 = vpop.f32.mrf.mxu0  ;;  %1580 = vmatpush.msrb.mxu2 %v7135_v14  ;;  %1655 = vmatpush.msrb.mxu3 %v4958_v32  ;;  %7137 = vst [vmem:[#allocation71_spill] sm:$0xff] %v5759_v38  ;;  %v554_v23 = vadd.f32 %v553_v50, %v450_v33  ;;  %v7144_v33 = vand.u32 4294901760, %v5532_v5  ;;  %v3409_v50 = vmul.f32 %v5713_v18, %v5263_v51 }
 0x18b   :  { %2355 = vmatpush.msrb.mxu0 %v7136_v36  ;;  %2397 = vmatpush.msrb.mxu1 %v5046_v7  ;;  %v5752_v9 = vadd.f32 %v3414_v15, %v3408_v11  ;;  %v761_v40 = vadd.f32 %v760_v42, %v664_v62  ;;  %v7141_v11 = vld [vmem:[#allocation90_spill] sm:$0xff]  ;;  %v3419_v42 = vmul.f32 %v5727_v34, %v5267_v13  ;;  %v7145_v34 = vld [vmem:[#allocation91_spill] sm:$0xff] }
 0x18c   :  { %1352 = vmatmul.f32.gmra.mxu2 %v1351_v55  ;;  %1657 = vmatpush.msrb.mxu3 %v4976_v52  ;;  %v353_v15 = vadd.f32 %v7141_v11, %v5226_v16 }
 0x18d   :  { %1584 = vmatpush.msrb.mxu2 %v7138_v48  ;;  %2358 = vmatpush.msrb.mxu0 %v7139_v60  ;;  %v5765_v22 = vadd.f32 %v3422_v2, %v5752_v9  ;;  %v3413_v60 = vsub.f32 1.0, %v3411_v58  ;;  %v3423_v36 = vmul.f32 %v3421_v12, %v3419_v42 }
 0x18e   :  { %2399 = vmatpush.msrb.mxu1 %v5055_v27  ;;  %2361 = vmatmul.f32.vlgmr.msrb.gmra.mxu0 %v5532_v5  ;;  %v845_v55 = vpop.f32.mrf.mxu1  ;;  %v454_v38 = vadd.f32 %v7145_v34, %v353_v15  ;;  %v558_v5 = vpop.f32.mrf.mxu2 }
 0x18f   :  { %7140 = vst [vmem:[#allocation78_spill] sm:$0xff] %v5765_v22  ;;  %1588 = vmatpush.msrb.mxu2 %v7142_v31  ;;  %2583 = vmatpush.msra.mxu0 %v4836_v24  ;;  %vm3426_vm13 = vcmp.gt.f32.partialorder %v5765_v22, 0.5  ;;  %v846_v2 = vadd.f32 %v845_v55, %v761_v40  ;;  %v3843_v40 = vmul.f32 %v5765_v22, %v5267_v13 }
 0x190   :  { %1659 = vmatpush.msrb.mxu3 %v4982_v20  ;;  %2401 = vmatpush.msrb.mxu1 %v5079_v10  ;;  %v5782_v16 = vsel %vm3426_vm13, 1.0, %v7053_v54  ;;  %v670_v55 = vadd.f32 %v669_v43, %v554_v23  ;;  %v559_v15 = vadd.f32 %v558_v5, %v454_v38  ;;  %v7147_v23 = vld [vmem:[#allocation36_spill] sm:$0xff]  ;;  %v675_v42 = vpop.f32.mrf.mxu3  ;;  %v3833_v38 = vmul.f32 %v5752_v9, %v5263_v51 }
 0x191   :  { %7143 = vst [vmem:[#allocation80_spill] sm:$0xff] %v5782_v16  ;;  %1592 = vmatpush.msrb.mxu2 %v7065_v59  ;;  %2405 = vmatmul.f32.vlgmr.msrb.gmra.mxu1 %v7144_v33  ;;  %v3415_v62 = vmul.f32 %v3413_v60, %v846_v2  ;;  %v3845_v11 = vsub.f32 1.0, %v5782_v16  ;;  %v3835_v60 = vmul.f32 %v5765_v22, %v5249_v8  ;;  %v7150_v5 = vand.u32 4294901760, %v5581_v41  ;;  %v7178_v22 = vld [vmem:[#allocation49_spill] sm:$0xff] }
 0x192   :  { %v764_v58 = vpop.f32.mrf.mxu0  ;;  %2585 = vmatpush.msra.mxu0 %v4841_v26  ;;  %2636 = vmatpush.msra.mxu1 %v4877_v39 }
 0x193   :  { %1661 = vmatpush.msrb.mxu3 %v5001_v37  ;;  %1596 = vmatpush.msrb.mxu2 %v7066_v46  ;;  %v3417_v18 = vadd.f32 %v3415_v62, %v3409_v50  ;;  %v3847_v2 = vmul.f32 %v3845_v11, %v3843_v40  ;;  %v765_v34 = vadd.f32 %v764_v58, %v670_v55  ;;  %v3837_v50 = vsub.f32 1.0, %v3835_v60  ;;  %v7148_v62 = vld [vmem:[#allocation42_spill] sm:$0xff] }
 0x194   :  { %2587 = vmatpush.msra.mxu0 %v4853_v28  ;;  %2642 = vmatpush.msra.mxu1 %v4893_v53  ;;  %v676_v55 = vadd.f32 %v675_v42, %v559_v15  ;;  %v7153_v42 = vld [vmem:[#allocation47_spill] sm:$0xff] }
 0x195   :  { %1663 = vmatpush.msrb.mxu3 %v5022_v29  ;;  %1600 = vmatpush.msrb.mxu2 %v7069_v19  ;;  %v5803_v43 = vadd.f32 %v3423_v36, %v3417_v18 }
 0x196   :  { %2589 = vmatpush.msra.mxu0 %v4870_v35  ;;  %2648 = vmatpush.msra.mxu1 %v7147_v23  ;;  %v849_v12 = vpop.f32.mrf.mxu1 }
 0x197   :  { %7146 = vst [vmem:[#allocation81_spill] sm:$0xff] %v5803_v43  ;;  %1665 = vmatpush.msrb.mxu3 %v5046_v7  ;;  %1604 = vmatpush.msrb.mxu2 %v7070_v1  ;;  %v850_v33 = vadd.f32 %v849_v12, %v765_v34  ;;  %vm3427_vm14 = vcmp.gt.f32.partialorder %v5803_v43, 0.5  ;;  %v3844_v40 = vmul.f32 %v5803_v43, %v5267_v13  ;;  %v7151_v13 = vld [vmem:[#allocation61_spill] sm:$0xff] }
 0x198   :  { %2366 = vmatmul.f32.gmra.mxu0 %v5581_v41  ;;  %2654 = vmatpush.msra.mxu1 %v7148_v62  ;;  %v5815_v36 = vsel %vm3427_vm14, 1.0, %v7053_v54  ;;  %v3836_v9 = vmul.f32 %v5803_v43, %v5249_v8  ;;  %v7176_v54 = vld [vmem:[#allocation45_spill] sm:$0xff]  ;;  %v7177_v43 = vld [vmem:[#allocation31_spill] sm:$0xff] }
 0x199   :  { %7149 = vst [vmem:[#allocation82_spill] sm:$0xff] %v5815_v36  ;;  %2591 = vmatpush.msra.mxu0 %v4888_v44  ;;  %1667 = vmatpush.msrb.mxu3 %v5055_v27  ;;  %v3839_v58 = vmul.f32 %v3837_v50, %v850_v33  ;;  %v3846_v11 = vsub.f32 1.0, %v5815_v36 }
 0x19a   :  { %1608 = vmatpush.msrb.mxu2 %v7072_v63  ;;  %2411 = vmatmul.f32.gmra.mxu1 %v7150_v5  ;;  %v768_v60 = vpop.f32.mrf.mxu0  ;;  %v3838_v50 = vsub.f32 1.0, %v3836_v9  ;;  %v7157_v5 = vld [vmem:[#allocation76_spill] sm:$0xff]  ;;  %v7162_v9 = vld [vmem:[#allocation25_spill] sm:$0xff] }
 0x19b   :  { %2593 = vmatpush.msra.mxu0 %v4897_v49  ;;  %2660 = vmatpush.msra.mxu1 %v4956_v30  ;;  %v3841_v34 = vadd.f32 %v3839_v58, %v3833_v38  ;;  %v3848_v12 = vmul.f32 %v3846_v11, %v3844_v40  ;;  %v769_v15 = vadd.f32 %v768_v60, %v676_v55  ;;  %v7154_v58 = vld [vmem:[#allocation54_spill] sm:$0xff]  ;;  %v7156_v55 = vld [vmem:[#allocation60_spill] sm:$0xff] }
 0x19c   :  { %1669 = vmatpush.msrb.mxu3 %v5079_v10  ;;  %1612 = vmatpush.msrb.mxu2 %v7151_v13  ;;  %v5854_v11 = vsub.f32 %v5623_v56, %v5623_v56  ;;  %v7160_v56 = vld [vmem:[#allocation23_spill] sm:$0xff] }
 0x19d   :  { %4344 = vmatmul.msk.f32.vlgmr.msrb.gmra.mxu3 %vm1301_vm3, %v7052_v61  ;;  %2595 = vmatpush.msra.mxu0 %v4914_v57  ;;  %v5837_v41 = vadd.f32 %v3847_v2, %v3841_v34  ;;  %v3834_v2 = vmul.f32 %v3417_v18, %v5263_v51  ;;  %v7159_v18 = vld [vmem:[#allocation63_spill] sm:$0xff]  ;;  %v7161_v34 = vld [vmem:[#allocation64_spill] sm:$0xff] }
 0x19e   :  { %1946 = vmatpush.msra.mxu3 %v4836_v24  ;;  %2666 = vmatpush.msra.mxu1 %v7153_v42  ;;  %v853_v33 = vpop.f32.mrf.mxu1  ;;  %7155 = vst [vmem:[#allocation84_spill] sm:$0xff] %v5854_v11  ;;  %v6886_v60 = vand.u32 4294901760, %v5854_v11 }
 0x19f   :  { %7152 = vst [vmem:[#allocation83_spill] sm:$0xff] %v5837_v41  ;;  %1616 = vmatpush.msrb.mxu2 %v7077_v47  ;;  %2597 = vmatpush.msra.mxu0 %v4933_v3  ;;  %v854_v8 = vadd.f32 %v853_v33, %v769_v15  ;;  %v7165_v33 = vld [vmem:[#allocation72_spill] sm:$0xff]  ;;  %v7173_v41 = vld [vmem:[#allocation41_spill] sm:$0xff] }
 0x1a0   :  { %1948 = vmatpush.msra.mxu3 %v4841_v26  ;;  %2672 = vmatpush.msra.mxu1 %v7085_v4  ;;  %v2617_v15 = vsub.f32 %v5854_v11, %v6886_v60  ;;  %v7170_v60 = vld [vmem:[#allocation37_spill] sm:$0xff]  ;;  %v7175_v11 = vld [vmem:[#allocation27_spill] sm:$0xff] }
 0x1a1   :  { %1620 = vmatpush.msrb.mxu2 %v7079_v21  ;;  %2599 = vmatpush.msra.mxu0 %v4958_v32  ;;  %v3840_v38 = vmul.f32 %v3838_v50, %v854_v8  ;;  %v5890_v8 = vsub.f32 %v5667_v0, %v5667_v0  ;;  %v7167_v50 = vld [vmem:[#allocation75_spill] sm:$0xff] }
 0x1a2   :  { %1950 = vmatpush.msra.mxu3 %v4853_v28  ;;  %2678 = vmatpush.msra.mxu1 %v7154_v58 }
 0x1a3   :  { %1624 = vmatpush.msrb.mxu2 %v7080_v17  ;;  %2601 = vmatpush.msra.mxu0 %v4976_v52  ;;  %v3842_v40 = vadd.f32 %v3840_v38, %v3834_v2  ;;  %7166 = vst [vmem:[#allocation86_spill] sm:$0xff] %v5890_v8  ;;  %v2618_v2 = vand.u32 4294901760, %v2617_v15  ;;  %v7168_v38 = vld [vmem:[#allocation35_spill] sm:$0xff]  ;;  %v6897_v0 = vand.u32 4294901760, %v5890_v8 }
 0x1a4   :  { %1952 = vmatpush.msra.mxu3 %v4870_v35  ;;  %2684 = vmatpush.msra.mxu1 %v7156_v55 }
 0x1a5   :  { %1628 = vmatpush.msrb.mxu2 %v7157_v5  ;;  %4345 = vmatmul.msk.f32.gmra.mxu3 %vm1302_vm4, %v7052_v61  ;;  %v5862_v51 = vadd.f32 %v3848_v12, %v3842_v40  ;;  %v7163_v12 = vld [vmem:[#allocation68_spill] sm:$0xff]  ;;  %v7169_v40 = vld [vmem:[#allocation77_spill] sm:$0xff] }
 0x1a6   :  { %1954 = vmatpush.msra.mxu3 %v4888_v44  ;;  %2603 = vmatpush.msra.mxu0 %v4982_v20 }
 0x1a7   :  { %7158 = vst [vmem:[#allocation85_spill] sm:$0xff] %v5862_v51  ;;  %2690 = vmatpush.msra.mxu1 %v7159_v18  ;;  %4342 = vmatmul.msk.f32.vlgmr.msrb.gmra.mxu2 %vm1301_vm3, %v7052_v61  ;;  %v7171_v51 = vld [vmem:[#allocation24_spill] sm:$0xff] }
 0x1a8   :  { %1888 = vmatpush.msra.mxu2 %v7160_v56  ;;  %1956 = vmatpush.msra.mxu3 %v4897_v49 }
 0x1a9   :  { %2605 = vmatpush.msra.mxu0 %v5001_v37  ;;  %2696 = vmatpush.msra.mxu1 %v7161_v34 }
 0x1aa   :  { %1891 = vmatpush.msra.mxu2 %v7162_v9  ;;  %1958 = vmatpush.msra.mxu3 %v4914_v57 }
 0x1ab   :  { %2607 = vmatpush.msra.mxu0 %v5022_v29  ;;  %2702 = vmatpush.msra.mxu1 %v7163_v12 }
 0x1ac   :  { %1894 = vmatpush.msra.mxu2 %v7164_v6  ;;  %1960 = vmatpush.msra.mxu3 %v4933_v3 }
 0x1ad   :  { %2609 = vmatpush.msra.mxu0 %v5046_v7  ;;  %2708 = vmatpush.msra.mxu1 %v7165_v33 }
 0x1ae   :  { %1897 = vmatpush.msra.mxu2 %v7103_v45  ;;  %1962 = vmatpush.msra.mxu3 %v4958_v32 }
 0x1af   :  { %2611 = vmatpush.msra.mxu0 %v5055_v27  ;;  %2714 = vmatpush.msra.mxu1 %v7167_v50 }
 0x1b0   :  { %4343 = vmatmul.msk.f32.gmra.mxu2 %vm1302_vm4, %v7052_v61  ;;  %1964 = vmatpush.msra.mxu3 %v4976_v52 }
 0x1b1   :  { %1900 = vmatpush.msra.mxu2 %v7168_v38  ;;  %2613 = vmatpush.msra.mxu0 %v5079_v10 }
 0x1b2   :  { %2720 = vmatpush.msra.mxu1 %v7169_v40  ;;  %2619 = vmatmul.f32.vlgmr.msra.gmra.mxu0 %v2618_v2  ;;  %v2625_v2 = vsub.f32 %v5890_v8, %v6897_v0  ;;  %v7179_v0 = vld [vmem:[#allocation53_spill] sm:$0xff] }
 0x1b3   :  { %1903 = vmatpush.msra.mxu2 %v7170_v60  ;;  %2843 = vmatpush.msrb.mxu0 %v7171_v51  ;;  %v5925_v8 = vpop.f32.mrf.mxu3 }
 0x1b4   :  { %1966 = vmatpush.msra.mxu3 %v4982_v20  ;;  %2726 = vmatpush.msra.mxu1 %v7172_v25  ;;  %v2626_v36 = vand.u32 4294901760, %v2625_v2  ;;  %v7183_v2 = vld [vmem:[#allocation19_spill] sm:$0xff] }
 0x1b5   :  { %1906 = vmatpush.msra.mxu2 %v7173_v41  ;;  %4370 = vmatmul.msk.f32.vlgmr.msra.gmra.mxu1 %vm2576_vm9, %v7052_v61 }
 0x1b6   :  { %2847 = vmatpush.msrb.mxu0 %v7175_v11  ;;  %2914 = vmatpush.msrb.mxu1 %v4836_v24  ;;  %v7184_v11 = vand.u32 4294901760, %v7183_v2 }
 0x1b7   :  { %1968 = vmatpush.msra.mxu3 %v5001_v37  ;;  %1909 = vmatpush.msra.mxu2 %v7176_v54 }
 0x1b8   :  { %2851 = vmatpush.msrb.mxu0 %v7177_v43  ;;  %2916 = vmatpush.msrb.mxu1 %v4841_v26  ;;  %v7180_v43 = vld [vmem:[#allocation55_spill] sm:$0xff] }
 0x1b9   :  { %1970 = vmatpush.msra.mxu3 %v5022_v29  ;;  %1912 = vmatpush.msra.mxu2 %v7178_v22 }
 0x1ba   :  { %2855 = vmatpush.msrb.mxu0 %v7135_v14  ;;  %2918 = vmatpush.msrb.mxu1 %v4853_v28 }
 0x1bb   :  { %1972 = vmatpush.msra.mxu3 %v5046_v7  ;;  %1915 = vmatpush.msra.mxu2 %v7179_v0 }
 0x1bc   :  { %2627 = vmatmul.f32.gmra.mxu0 %v2626_v36  ;;  %2920 = vmatpush.msrb.mxu1 %v4870_v35  ;;  %v928_v16 = vpop.f32.mrf.mxu2  ;;  %v7182_v36 = vld [vmem:[#allocation59_spill] sm:$0xff] }
 0x1bd   :  { %2859 = vmatpush.msrb.mxu0 %v7138_v48  ;;  %1974 = vmatpush.msra.mxu3 %v5055_v27  ;;  %v7185_v48 = vld [vmem:[#allocation62_spill] sm:$0xff] }
 0x1be   :  { %1918 = vmatpush.msra.mxu2 %v7180_v43  ;;  %4371 = vmatmul.msk.f32.gmra.mxu1 %vm2577_vm10, %v7052_v61 }
 0x1bf   :  { %2863 = vmatpush.msrb.mxu0 %v7142_v31  ;;  %2922 = vmatpush.msrb.mxu1 %v4888_v44 }
 0x1c0   :  { %1976 = vmatpush.msra.mxu3 %v5079_v10  ;;  %1921 = vmatpush.msra.mxu2 %v7182_v36  ;;  %v7186_v36 = vld [vmem:[#allocation67_spill] sm:$0xff] }
 0x1c1   :  { %1980 = vmatmul.f32.vlgmr.msra.gmra.mxu3 %v7184_v11  ;;  %2867 = vmatpush.msrb.mxu0 %v7065_v59  ;;  %v5951_v11 = vpop.f32.mrf.mxu3 }
 0x1c2   :  { %2211 = vmatpush.msrb.mxu3 %v4877_v39  ;;  %2924 = vmatpush.msrb.mxu1 %v4897_v49  ;;  %v7187_v39 = vld [vmem:[#allocation69_spill] sm:$0xff] }
 0x1c3   :  { %1924 = vmatpush.msra.mxu2 %v7185_v48  ;;  %2871 = vmatpush.msrb.mxu0 %v7066_v46  ;;  %v7189_v46 = vld [vmem:[#allocation20_spill] sm:$0xff] }
 0x1c4   :  { %2217 = vmatpush.msrb.mxu3 %v4893_v53  ;;  %2926 = vmatpush.msrb.mxu1 %v4914_v57  ;;  %v5947_v31 = vpop.f32.mrf.mxu2  ;;  %v7188_v53 = vld [vmem:[#allocation74_spill] sm:$0xff]  ;;  %v7190_v59 = vand.u32 4294901760, %v7189_v46 }
 0x1c5   :  { %1927 = vmatpush.msra.mxu2 %v7186_v36  ;;  %2875 = vmatpush.msrb.mxu0 %v7069_v19 }
 0x1c6   :  { %2223 = vmatpush.msrb.mxu3 %v7147_v23  ;;  %2928 = vmatpush.msrb.mxu1 %v4933_v3  ;;  %v5964_v23 = vpop.f32.mrf.mxu0 }
 0x1c7   :  { %1930 = vmatpush.msra.mxu2 %v7187_v39  ;;  %2879 = vmatpush.msrb.mxu0 %v7070_v1  ;;  %7191 = vst [vmem:[#allocation17_spill] sm:$0xff] %v5964_v23  ;;  %v5980_v23 = vld [vmem:[#allocation11] sm:$0xf] }
 0x1c8   :  { %2229 = vmatpush.msrb.mxu3 %v7148_v62  ;;  %2930 = vmatpush.msrb.mxu1 %v4958_v32 }
 0x1c9   :  { %1933 = vmatpush.msra.mxu2 %v7188_v53  ;;  %1986 = vmatmul.f32.gmra.mxu3 %v7190_v59  ;;  %v5974_v59 = vpop.f32.mrf.mxu1 }
 0x1ca   :  { %2235 = vmatpush.msrb.mxu3 %v4956_v30  ;;  %2883 = vmatpush.msrb.mxu0 %v7072_v63  ;;  %7192 = vst [vmem:[#allocation87_spill] sm:$0xff] %v5974_v59  ;;  %v5987_v59 = vperm.slane %v5980_v23, 3 }
 0x1cb   :  { %2932 = vmatpush.msrb.mxu1 %v4976_v52  ;;  %1936 = vmatmul.f32.vlgmr.msra.gmra.mxu2 %v7183_v2  ;;  %v1139_v2 = vpop.f32.mrf.mxu3 }
 0x1cc   :  { %2158 = vmatpush.msrb.mxu2 %v4836_v24  ;;  %2241 = vmatpush.msrb.mxu3 %v7153_v42  ;;  %7193 = vst [vmem:[#allocation88_spill] sm:$0xff] %v5987_v59 }
 0x1cd   :  { %2887 = vmatpush.msrb.mxu0 %v7151_v13  ;;  %2934 = vmatpush.msrb.mxu1 %v4982_v20  ;;  %v1095_v30 = vpop.f32.mrf.mxu2 }
 0x1ce   :  { %2160 = vmatpush.msrb.mxu2 %v4841_v26  ;;  %2247 = vmatpush.msrb.mxu3 %v7085_v4 }
 0x1cf   :  { %2891 = vmatpush.msrb.mxu0 %v7077_v47  ;;  %2936 = vmatpush.msrb.mxu1 %v5001_v37 }
 0x1d0   :  { %2162 = vmatpush.msrb.mxu2 %v4853_v28  ;;  %2253 = vmatpush.msrb.mxu3 %v7154_v58  ;;  %v5993_v58 = vpop.f32.mrf.mxu0 }
 0x1d1   :  { %2895 = vmatpush.msrb.mxu0 %v7079_v21  ;;  %2938 = vmatpush.msrb.mxu1 %v5022_v29  ;;  %7194 = vst [vmem:[#allocation18_spill] sm:$0xff] %v5993_v58 }
 0x1d2   :  { %2164 = vmatpush.msrb.mxu2 %v4870_v35  ;;  %2259 = vmatpush.msrb.mxu3 %v7156_v55  ;;  %v929_v55 = vadd.f32 %v928_v16, %v5987_v59 }
 0x1d3   :  { %2899 = vmatpush.msrb.mxu0 %v7080_v17  ;;  %2940 = vmatpush.msrb.mxu1 %v5046_v7 }
 0x1d4   :  { %1941 = vmatmul.f32.gmra.mxu2 %v7189_v46  ;;  %2265 = vmatpush.msrb.mxu3 %v7159_v18  ;;  %v6006_v46 = vpop.f32.mrf.mxu1  ;;  %v1145_v18 = vpop.f32.mrf.mxu3  ;;  %v1038_v16 = vadd.f32 %v5925_v8, %v929_v55  ;;  %v937_v55 = vadd.f32 %v5947_v31, %v5987_v59 }
 0x1d5   :  { %2166 = vmatpush.msrb.mxu2 %v4888_v44  ;;  %2903 = vmatpush.msrb.mxu0 %v7157_v5  ;;  %7195 = vst [vmem:[#allocation89_spill] sm:$0xff] %v6006_v46 }
 0x1d6   :  { %2942 = vmatpush.msrb.mxu1 %v5055_v27  ;;  %4372 = vmatmul.msk.f32.vlgmr.msrb.gmra.mxu0 %vm2576_vm9, %v7052_v61  ;;  %v1096_v15 = vadd.f32 %v1095_v30, %v1038_v16 }
 0x1d7   :  { %2168 = vmatpush.msrb.mxu2 %v4897_v49  ;;  %3163 = vmatpush.msra.mxu0 %v7160_v56  ;;  %v1100_v58 = vpop.f32.mrf.mxu2 }
 0x1d8   :  { %2271 = vmatpush.msrb.mxu3 %v7161_v34  ;;  %2944 = vmatpush.msrb.mxu1 %v5079_v10  ;;  %v1140_v30 = vadd.f32 %v1139_v2, %v1096_v15  ;;  %v1042_v2 = vadd.f32 %v5951_v11, %v937_v55  ;;  %v6194_v15 = vperm.slane %v5980_v23, 1 }
 0x1d9   :  { %2170 = vmatpush.msrb.mxu2 %v4914_v57  ;;  %4374 = vmatmul.msk.f32.vlgmr.msrb.gmra.mxu1 %vm2576_vm9, %v7052_v61 }
 0x1da   :  { %3166 = vmatpush.msra.mxu0 %v7162_v9  ;;  %3221 = vmatpush.msra.mxu1 %v4836_v24 }
 0x1db   :  { %2277 = vmatpush.msrb.mxu3 %v7163_v12  ;;  %2172 = vmatpush.msrb.mxu2 %v4933_v3 }
 0x1dc   :  { %3169 = vmatpush.msra.mxu0 %v7164_v6  ;;  %3223 = vmatpush.msra.mxu1 %v4841_v26  ;;  %v1770_v46 = vpop.f32.mrf.mxu0  ;;  %v1879_v31 = vpop.f32.mrf.mxu1 }
 0x1dd   :  { %2283 = vmatpush.msrb.mxu3 %v7165_v33  ;;  %2174 = vmatpush.msrb.mxu2 %v4958_v32  ;;  %v1771_v8 = vadd.f32 %v1770_v46, %v5987_v59 }
 0x1de   :  { %3172 = vmatpush.msra.mxu0 %v7103_v45  ;;  %3225 = vmatpush.msra.mxu1 %v4853_v28 }
 0x1df   :  { %2289 = vmatpush.msrb.mxu3 %v7167_v50  ;;  %2176 = vmatpush.msrb.mxu2 %v4976_v52  ;;  %v1255_v50 = vpop.f32.mrf.mxu3  ;;  %v6043_v46 = vadd.f32 %v1879_v31, %v1771_v8  ;;  %v7199_v31 = vld [vmem:[#allocation26_spill] sm:$0xff] }
 0x1e0   :  { %4373 = vmatmul.msk.f32.gmra.mxu0 %vm2577_vm10, %v7052_v61  ;;  %3227 = vmatpush.msra.mxu1 %v4870_v35 }
 0x1e1   :  { %3175 = vmatpush.msra.mxu0 %v7168_v38  ;;  %2295 = vmatpush.msrb.mxu3 %v7169_v40  ;;  %7196 = vst [vmem:[#allocation90_spill] sm:$0xff] %v6043_v46 }
 0x1e2   :  { %2178 = vmatpush.msrb.mxu2 %v4982_v20  ;;  %4375 = vmatmul.msk.f32.gmra.mxu1 %vm2577_vm10, %v7052_v61  ;;  %v1214_v16 = vpop.f32.mrf.mxu2 }
 0x1e3   :  { %3178 = vmatpush.msra.mxu0 %v7170_v60  ;;  %3229 = vmatpush.msra.mxu1 %v4888_v44  ;;  %v1215_v45 = vadd.f32 %v1214_v16, %v1140_v30  ;;  %v1101_v30 = vadd.f32 %v1100_v58, %v1042_v2  ;;  %v2193_v2 = vand.u32 4294901760, %v7199_v31 }
 0x1e4   :  { %2301 = vmatpush.msrb.mxu3 %v7172_v25  ;;  %2180 = vmatpush.msrb.mxu2 %v5001_v37  ;;  %v1883_v11 = vpop.f32.mrf.mxu1 }
 0x1e5   :  { %4360 = vmatmul.msk.f32.vlgmr.msrb.gmra.mxu3 %vm2151_vm7, %v7052_v61  ;;  %3181 = vmatpush.msra.mxu0 %v7173_v41  ;;  %v6049_v14 = vadd.f32 %v1255_v50, %v1215_v45  ;;  %v1146_v58 = vadd.f32 %v1145_v18, %v1101_v30 }
 0x1e6   :  { %2489 = vmatpush.msra.mxu3 %v4836_v24  ;;  %3231 = vmatpush.msra.mxu1 %v4897_v49  ;;  %v1778_v16 = vpop.f32.mrf.mxu0 }
 0x1e7   :  { %2182 = vmatpush.msrb.mxu2 %v5022_v29  ;;  %3184 = vmatpush.msra.mxu0 %v7176_v54  ;;  %v1779_v45 = vadd.f32 %v1778_v16, %v5987_v59  ;;  %v1259_v18 = vpop.f32.mrf.mxu3 }
 0x1e8   :  { %2491 = vmatpush.msra.mxu3 %v4841_v26  ;;  %3233 = vmatpush.msra.mxu1 %v4914_v57 }
 0x1e9   :  { %2184 = vmatpush.msrb.mxu2 %v5046_v7  ;;  %3187 = vmatpush.msra.mxu0 %v7178_v22  ;;  %v6071_v30 = vadd.f32 %v1883_v11, %v1779_v45  ;;  %v7203_v45 = vld [vmem:[#allocation31_spill] sm:$0xff]  ;;  %v7204_v11 = vld [vmem:[#allocation34_spill] sm:$0xff] }
 0x1ea   :  { %2493 = vmatpush.msra.mxu3 %v4853_v28  ;;  %3235 = vmatpush.msra.mxu1 %v4933_v3 }
 0x1eb   :  { %2186 = vmatpush.msrb.mxu2 %v5055_v27  ;;  %3190 = vmatpush.msra.mxu0 %v7179_v0  ;;  %v1218_v50 = vpop.f32.mrf.mxu2  ;;  %7200 = vst [vmem:[#allocation91_spill] sm:$0xff] %v6071_v30  ;;  %v7208_v30 = vld [vmem:[#allocation39_spill] sm:$0xff] }
 0x1ec   :  { %2495 = vmatpush.msra.mxu3 %v4870_v35  ;;  %3237 = vmatpush.msra.mxu1 %v4958_v32  ;;  %v1219_v55 = vadd.f32 %v1218_v50, %v1146_v58  ;;  %v7201_v58 = vld [vmem:[#allocation59_spill] sm:$0xff] }
 0x1ed   :  { %2188 = vmatpush.msrb.mxu2 %v5079_v10  ;;  %4361 = vmatmul.msk.f32.gmra.mxu3 %vm2152_vm8, %v7052_v61  ;;  %v7202_v50 = vld [vmem:[#allocation27_spill] sm:$0xff] }
 0x1ee   :  { %2497 = vmatpush.msra.mxu3 %v4888_v44  ;;  %3193 = vmatpush.msra.mxu0 %v7180_v43  ;;  %v6075_v16 = vadd.f32 %v1259_v18, %v1219_v55  ;;  %v7205_v55 = vld [vmem:[#allocation38_spill] sm:$0xff] }
 0x1ef   :  { %3239 = vmatpush.msra.mxu1 %v4976_v52  ;;  %2194 = vmatmul.f32.vlgmr.msrb.gmra.mxu2 %v2193_v2  ;;  %v2201_v31 = vand.u32 4294901760, %v7205_v55  ;;  %v7206_v2 = vld [vmem:[#allocation57_spill] sm:$0xff]  ;;  %v7209_v55 = vld [vmem:[#allocation40_spill] sm:$0xff] }
 0x1f0   :  { %2418 = vmatpush.msra.mxu2 %v7171_v51  ;;  %2499 = vmatpush.msra.mxu3 %v4897_v49  ;;  %v6097_v18 = vsub.f32 %v7206_v2, %v7206_v2  ;;  %v7211_v2 = vld [vmem:[#allocation30_spill] sm:$0xff] }
 0x1f1   :  { %3196 = vmatpush.msra.mxu0 %v7201_v58  ;;  %3241 = vmatpush.msra.mxu1 %v4982_v20 }
 0x1f2   :  { %2422 = vmatpush.msra.mxu2 %v7202_v50  ;;  %2501 = vmatpush.msra.mxu3 %v4914_v57  ;;  %7207 = vst [vmem:[#allocation25_spill] sm:$0xff] %v6097_v18  ;;  %v6922_v46 = vand.u32 4294901760, %v6097_v18 }
 0x1f3   :  { %3199 = vmatpush.msra.mxu0 %v7185_v48  ;;  %3243 = vmatpush.msra.mxu1 %v5001_v37 }
 0x1f4   :  { %2426 = vmatpush.msra.mxu2 %v7203_v45  ;;  %2503 = vmatpush.msra.mxu3 %v4933_v3 }
 0x1f5   :  { %3202 = vmatpush.msra.mxu0 %v7186_v36  ;;  %3245 = vmatpush.msra.mxu1 %v5022_v29  ;;  %v7214_v36 = vld [vmem:[#allocation71_spill] sm:$0xff] }
 0x1f6   :  { %2430 = vmatpush.msra.mxu2 %v7204_v11  ;;  %2505 = vmatpush.msra.mxu3 %v4958_v32  ;;  %v6120_v48 = vsub.f32 %v7214_v36, %v7214_v36 }
 0x1f7   :  { %3205 = vmatpush.msra.mxu0 %v7187_v39  ;;  %3247 = vmatpush.msra.mxu1 %v5046_v7  ;;  %v7213_v39 = vld [vmem:[#allocation33_spill] sm:$0xff] }
 0x1f8   :  { %2202 = vmatmul.f32.gmra.mxu2 %v2201_v31  ;;  %2507 = vmatpush.msra.mxu3 %v4976_v52  ;;  %v7210_v31 = vld [vmem:[#allocation44_spill] sm:$0xff]  ;;  %7215 = vst [vmem:[#allocation35_spill] sm:$0xff] %v6120_v48 }
 0x1f9   :  { %2434 = vmatpush.msra.mxu2 %v7208_v30  ;;  %3208 = vmatpush.msra.mxu0 %v7188_v53  ;;  %v7212_v53 = vld [vmem:[#allocation48_spill] sm:$0xff] }
 0x1fa   :  { %3249 = vmatpush.msra.mxu1 %v5055_v27  ;;  %3211 = vmatmul.f32.vlgmr.msra.gmra.mxu0 %v6097_v18  ;;  %v6929_v18 = vand.u32 4294901760, %v6120_v48 }
 0x1fb   :  { %2438 = vmatpush.msra.mxu2 %v7209_v55  ;;  %3433 = vmatpush.msrb.mxu0 %v4836_v24 }
 0x1fc   :  { %2509 = vmatpush.msra.mxu3 %v4982_v20  ;;  %3251 = vmatpush.msra.mxu1 %v5079_v10 }
 0x1fd   :  { %2442 = vmatpush.msra.mxu2 %v7210_v31  ;;  %3255 = vmatmul.f32.vlgmr.msra.gmra.mxu1 %v6922_v46  ;;  %v7216_v46 = vld [vmem:[#allocation36_spill] sm:$0xff] }
 0x1fe   :  { %3435 = vmatpush.msrb.mxu0 %v4841_v26  ;;  %3486 = vmatpush.msrb.mxu1 %v7211_v2 }
 0x1ff   :  { %2511 = vmatpush.msra.mxu3 %v5001_v37  ;;  %2446 = vmatpush.msra.mxu2 %v7212_v53 }
 0x200   :  { %3437 = vmatpush.msrb.mxu0 %v4853_v28  ;;  %3492 = vmatpush.msrb.mxu1 %v7213_v39 }
 0x201   :  { %2513 = vmatpush.msra.mxu3 %v5022_v29  ;;  %2450 = vmatpush.msra.mxu2 %v7069_v19 }
 0x202   :  { %3439 = vmatpush.msrb.mxu0 %v4870_v35  ;;  %3498 = vmatpush.msrb.mxu1 %v7216_v46  ;;  %v7217_v46 = vld [vmem:[#allocation46_spill] sm:$0xff] }
 0x203   :  { %2515 = vmatpush.msra.mxu3 %v5046_v7  ;;  %2454 = vmatpush.msra.mxu2 %v7070_v1  ;;  %v1454_v1 = vpop.f32.mrf.mxu3 }
 0x204   :  { %3216 = vmatmul.f32.gmra.mxu0 %v6120_v48  ;;  %3504 = vmatpush.msrb.mxu1 %v7148_v62 }
 0x205   :  { %3441 = vmatpush.msrb.mxu0 %v4888_v44  ;;  %2517 = vmatpush.msra.mxu3 %v5055_v27 }
 0x206   :  { %2458 = vmatpush.msra.mxu2 %v7072_v63  ;;  %3261 = vmatmul.f32.gmra.mxu1 %v6929_v18  ;;  %v1345_v36 = vpop.f32.mrf.mxu2 }
 0x207   :  { %3443 = vmatpush.msrb.mxu0 %v4897_v49  ;;  %3510 = vmatpush.msrb.mxu1 %v7217_v46  ;;  %v1346_v19 = vadd.f32 %v1345_v36, %v5987_v59  ;;  %v7218_v36 = vld [vmem:[#allocation17_spill] sm:$0xff] }
 0x208   :  { %2519 = vmatpush.msra.mxu3 %v5079_v10  ;;  %2462 = vmatpush.msra.mxu2 %v7151_v13  ;;  %v7219_v13 = vld [vmem:[#allocation87_spill] sm:$0xff] }
 0x209   :  { %4364 = vmatmul.msk.f32.vlgmr.msra.gmra.mxu3 %vm2151_vm7, %v7052_v61  ;;  %3445 = vmatpush.msrb.mxu0 %v4914_v57  ;;  %v1455_v48 = vadd.f32 %v1454_v1, %v1346_v19  ;;  %v7220_v1 = vld [vmem:[#allocation54_spill] sm:$0xff] }
 0x20a   :  { %2796 = vmatpush.msrb.mxu3 %v4836_v24  ;;  %3516 = vmatpush.msrb.mxu1 %v7153_v42 }
 0x20b   :  { %2466 = vmatpush.msra.mxu2 %v7077_v47  ;;  %3447 = vmatpush.msrb.mxu0 %v4933_v3  ;;  %v1513_v18 = vadd.f32 %v7218_v36, %v1455_v48  ;;  %v6160_v47 = vperm.slane %v5980_v23, 0  ;;  %v7221_v36 = vld [vmem:[#allocation80_spill] sm:$0xff] }
 0x20c   :  { %2798 = vmatpush.msrb.mxu3 %v4841_v26  ;;  %3522 = vmatpush.msrb.mxu1 %v7085_v4  ;;  %v7224_v4 = vld [vmem:[#allocation63_spill] sm:$0xff] }
 0x20d   :  { %2470 = vmatpush.msra.mxu2 %v7079_v21  ;;  %3449 = vmatpush.msrb.mxu0 %v4958_v32  ;;  %v6155_v19 = vadd.f32 %v7219_v13, %v1513_v18  ;;  %v6166_v21 = vsub.f32 %v7221_v36, %v7221_v36  ;;  %v7223_v13 = vld [vmem:[#allocation60_spill] sm:$0xff]  ;;  %v1263_v36 = vmul.f32 0.0, %v6160_v47 }
 0x20e   :  { %2800 = vmatpush.msrb.mxu3 %v4853_v28  ;;  %3528 = vmatpush.msrb.mxu1 %v7220_v1 }
 0x20f   :  { %2474 = vmatpush.msra.mxu2 %v7080_v17  ;;  %3451 = vmatpush.msrb.mxu0 %v4976_v52  ;;  %v1353_v48 = vpop.f32.mrf.mxu2  ;;  %7222 = vst [vmem:[#allocation37_spill] sm:$0xff] %v6166_v21  ;;  %v1458_v17 = vpop.f32.mrf.mxu3 }
 0x210   :  { %2802 = vmatpush.msrb.mxu3 %v4870_v35  ;;  %3534 = vmatpush.msrb.mxu1 %v7223_v13  ;;  %v1354_v18 = vadd.f32 %v1353_v48, %v5987_v59  ;;  %v6941_v48 = vand.u32 4294901760, %v6166_v21  ;;  %v7225_v59 = vld [vmem:[#allocation18_spill] sm:$0xff] }
 0x211   :  { %2478 = vmatpush.msra.mxu2 %v7157_v5  ;;  %4365 = vmatmul.msk.f32.gmra.mxu3 %vm2152_vm8, %v7052_v61 }
 0x212   :  { %2804 = vmatpush.msrb.mxu3 %v4888_v44  ;;  %3453 = vmatpush.msrb.mxu0 %v4982_v20  ;;  %v1459_v1 = vadd.f32 %v1458_v17, %v1354_v18  ;;  %v7226_v17 = vld [vmem:[#allocation89_spill] sm:$0xff] }
 0x213   :  { %3540 = vmatpush.msrb.mxu1 %v7224_v4  ;;  %4362 = vmatmul.msk.f32.vlgmr.msra.gmra.mxu2 %vm2151_vm7, %v7052_v61 }
 0x214   :  { %2738 = vmatpush.msrb.mxu2 %v7160_v56  ;;  %2806 = vmatpush.msrb.mxu3 %v4897_v49  ;;  %v1518_v5 = vadd.f32 %v7225_v59, %v1459_v1  ;;  %v1264_v56 = vsub.f32 1.0, %v1263_v36  ;;  %v3467_v59 = vsub.f32 %v6166_v21, %v6941_v48  ;;  %v7228_v1 = vld [vmem:[#allocation82_spill] sm:$0xff]  ;;  %v7230_v48 = vld [vmem:[#allocation75_spill] sm:$0xff] }
 0x215   :  { %3455 = vmatpush.msrb.mxu0 %v5001_v37  ;;  %3546 = vmatpush.msrb.mxu1 %v7161_v34  ;;  %v6209_v36 = vsub.f32 %v7228_v1, %v7228_v1 }
 0x216   :  { %2741 = vmatpush.msrb.mxu2 %v7162_v9  ;;  %2808 = vmatpush.msrb.mxu3 %v4914_v57  ;;  %v6191_v18 = vadd.f32 %v7226_v17, %v1518_v5  ;;  %v7227_v5 = vld [vmem:[#allocation32_spill] sm:$0xff]  ;;  %v6212_v17 = vperm.slane %v5980_v23, 2  ;;  %v3468_v21 = vand.u32 4294901760, %v3467_v59  ;;  %v1266_v59 = vmul.f32 %v1264_v56, %v6075_v16 }
 0x217   :  { %3457 = vmatpush.msrb.mxu0 %v5022_v29  ;;  %3552 = vmatpush.msrb.mxu1 %v7163_v12  ;;  %7229 = vst [vmem:[#allocation41_spill] sm:$0xff] %v6209_v36  ;;  %v1265_v12 = vmul.f32 %v1264_v56, %v6049_v14  ;;  %v6944_v23 = vand.u32 4294901760, %v6209_v36 }
 0x218   :  { %2744 = vmatpush.msrb.mxu2 %v7164_v6  ;;  %2810 = vmatpush.msrb.mxu3 %v4933_v3  ;;  %v1262_v6 = vmul.f32 0.0, %v6194_v15  ;;  %v1269_v1 = vmul.f32 0.0, %v6212_v17 }
 0x219   :  { %3459 = vmatpush.msrb.mxu0 %v5046_v7  ;;  %3558 = vmatpush.msrb.mxu1 %v7165_v33 }
 0x21a   :  { %2747 = vmatpush.msrb.mxu2 %v7227_v5  ;;  %2812 = vmatpush.msrb.mxu3 %v4958_v32  ;;  %v1267_v14 = vadd.f32 %v1265_v12, %v1262_v6 }
 0x21b   :  { %3461 = vmatpush.msrb.mxu0 %v5055_v27  ;;  %3564 = vmatpush.msrb.mxu1 %v7230_v48 }
 0x21c   :  { %4363 = vmatmul.msk.f32.gmra.mxu2 %vm2152_vm8, %v7052_v61  ;;  %2814 = vmatpush.msrb.mxu3 %v4976_v52  ;;  %v1270_v12 = vadd.f32 %v1269_v1, %v1267_v14 }
 0x21d   :  { %2750 = vmatpush.msrb.mxu2 %v7168_v38  ;;  %3463 = vmatpush.msrb.mxu0 %v5079_v10 }
 0x21e   :  { %3570 = vmatpush.msrb.mxu1 %v7169_v40  ;;  %3469 = vmatmul.f32.vlgmr.msrb.gmra.mxu0 %v3468_v21  ;;  %v3475_v21 = vsub.f32 %v6209_v36, %v6944_v23  ;;  %vm1272_vm15 = vcmp.gt.f32.partialorder %v1270_v12, 0.5  ;;  %v1268_v36 = vadd.f32 %v1266_v59, %v1262_v6  ;;  %v1681_v56 = vmul.f32 %v1270_v12, %v6160_v47 }
 0x21f   :  { %2753 = vmatpush.msrb.mxu2 %v7170_v60  ;;  %3693 = vmatpush.msra.mxu0 %v7171_v51 }
 0x220   :  { %2816 = vmatpush.msrb.mxu3 %v4982_v20  ;;  %3576 = vmatpush.msrb.mxu1 %v7172_v25  ;;  %v3476_v23 = vand.u32 4294901760, %v3475_v21  ;;  %v7233_v21 = vmov 0.0   ;;  %v1672_v6 = vpop.f32.mrf.mxu3  ;;  %v1271_v59 = vadd.f32 %v1269_v1, %v1268_v36  ;;  %v1689_v1 = vmul.f32 %v1270_v12, %v6212_v17 }
 0x221   :  { %2756 = vmatpush.msrb.mxu2 %v7173_v41  ;;  %4390 = vmatmul.msk.f32.vlgmr.msrb.gmra.mxu1 %vm3426_vm13, %v7052_v61 }
 0x222   :  { %3697 = vmatpush.msra.mxu0 %v7202_v50  ;;  %3764 = vmatpush.msra.mxu1 %v4836_v24  ;;  %vm1273_vm0 = vcmp.gt.f32.partialorder %v1271_v59, 0.5 }
 0x223   :  { %2818 = vmatpush.msrb.mxu3 %v5001_v37  ;;  %2759 = vmatpush.msrb.mxu2 %v7176_v54 }
 0x224   :  { %3701 = vmatpush.msra.mxu0 %v7203_v45  ;;  %3766 = vmatpush.msra.mxu1 %v4841_v26 }
 0x225   :  { %2820 = vmatpush.msrb.mxu3 %v5022_v29  ;;  %2762 = vmatpush.msrb.mxu2 %v7178_v22 }
 0x226   :  { %3705 = vmatpush.msra.mxu0 %v7204_v11  ;;  %3768 = vmatpush.msra.mxu1 %v4853_v28  ;;  %v4336_v11 = vsel %vm1272_vm15, 1.0, %v7233_v21 }
 0x227   :  { %2822 = vmatpush.msrb.mxu3 %v5046_v7  ;;  %2765 = vmatpush.msrb.mxu2 %v7179_v0  ;;  %v1691_v0 = vsub.f32 1.0, %v4336_v11 }
 0x228   :  { %3477 = vmatmul.f32.gmra.mxu0 %v3476_v23  ;;  %3770 = vmatpush.msra.mxu1 %v4870_v35 }
 0x229   :  { %3709 = vmatpush.msra.mxu0 %v7208_v30  ;;  %2824 = vmatpush.msrb.mxu3 %v5055_v27  ;;  %v7234_v30 = vld [vmem:[#allocation84_spill] sm:$0xff] }
 0x22a   :  { %2768 = vmatpush.msrb.mxu2 %v7180_v43  ;;  %4391 = vmatmul.msk.f32.gmra.mxu1 %vm3427_vm14, %v7052_v61  ;;  %v1631_v45 = vpop.f32.mrf.mxu2  ;;  %v7235_v50 = vand.u32 4294901760, %v7234_v30  ;;  %v1683_v43 = vsub.f32 1.0, %v1681_v56  ;;  %v7238_v56 = vld [vmem:[#allocation52_spill] sm:$0xff] }
 0x22b   :  { %3713 = vmatpush.msra.mxu0 %v7209_v55  ;;  %3772 = vmatpush.msra.mxu1 %v4888_v44  ;;  %v1632_v23 = vadd.f32 %v1631_v45, %v6155_v19  ;;  %v7236_v55 = vld [vmem:[#allocation62_spill] sm:$0xff]  ;;  %v1679_v45 = vmul.f32 %v1267_v14, %v6194_v15  ;;  %v7241_v14 = vld [vmem:[#allocation56_spill] sm:$0xff] }
 0x22c   :  { %2826 = vmatpush.msrb.mxu3 %v5079_v10  ;;  %2771 = vmatpush.msrb.mxu2 %v7201_v58 }
 0x22d   :  { %2830 = vmatmul.f32.vlgmr.msrb.gmra.mxu3 %v7235_v50  ;;  %3717 = vmatpush.msra.mxu0 %v7210_v31  ;;  %v1673_v51 = vadd.f32 %v1672_v6, %v1632_v23  ;;  %v7237_v50 = vld [vmem:[#allocation67_spill] sm:$0xff]  ;;  %v1693_v23 = vmul.f32 %v1691_v0, %v1689_v1 }
 0x22e   :  { %3061 = vmatpush.msra.mxu3 %v7211_v2  ;;  %3774 = vmatpush.msra.mxu1 %v4897_v49  ;;  %v7239_v2 = vld [vmem:[#allocation36_spill] sm:$0xff] }
 0x22f   :  { %2774 = vmatpush.msrb.mxu2 %v7236_v55  ;;  %3721 = vmatpush.msra.mxu0 %v7212_v53  ;;  %v1685_v19 = vmul.f32 %v1683_v43, %v1673_v51  ;;  %v1682_v43 = vmul.f32 %v1271_v59, %v6160_v47  ;;  %v7240_v51 = vld [vmem:[#allocation69_spill] sm:$0xff] }
 0x230   :  { %3067 = vmatpush.msra.mxu3 %v7213_v39  ;;  %3776 = vmatpush.msra.mxu1 %v4914_v57  ;;  %v4337_v39 = vsel %vm1273_vm0, 1.0, %v7233_v21 }
 0x231   :  { %2777 = vmatpush.msrb.mxu2 %v7237_v50  ;;  %3725 = vmatpush.msra.mxu0 %v7238_v56  ;;  %v6278_v6 = vadd.f32 %v1685_v19, %v1679_v45  ;;  %v7242_v45 = vld [vmem:[#allocation74_spill] sm:$0xff]  ;;  %v1692_v56 = vsub.f32 1.0, %v4337_v39 }
 0x232   :  { %3073 = vmatpush.msra.mxu3 %v7239_v2  ;;  %3778 = vmatpush.msra.mxu1 %v4933_v3  ;;  %v7243_v19 = vld [vmem:[#allocation86_spill] sm:$0xff]  ;;  %v1676_v2 = vpop.f32.mrf.mxu3 }
 0x233   :  { %2780 = vmatpush.msrb.mxu2 %v7240_v51  ;;  %3729 = vmatpush.msra.mxu0 %v7241_v14  ;;  %v6286_v12 = vadd.f32 %v1693_v23, %v6278_v6  ;;  %v1635_v53 = vpop.f32.mrf.mxu2  ;;  %v7244_v1 = vand.u32 4294901760, %v7243_v19  ;;  %v1684_v14 = vsub.f32 1.0, %v1682_v43  ;;  %v7247_v43 = vld [vmem:[#allocation65_spill] sm:$0xff] }
 0x234   :  { %3079 = vmatpush.msra.mxu3 %v7148_v62  ;;  %3780 = vmatpush.msra.mxu1 %v4958_v32  ;;  %v1636_v0 = vadd.f32 %v1635_v53, %v6191_v18  ;;  %v1680_v18 = vmul.f32 %v1268_v36, %v6194_v15 }
 0x235   :  { %2783 = vmatpush.msrb.mxu2 %v7242_v45  ;;  %2836 = vmatmul.f32.gmra.mxu3 %v7244_v1  ;;  %vm1697_vm1 = vcmp.gt.f32.partialorder %v6286_v12, 0.5 }
 0x236   :  { %3085 = vmatpush.msra.mxu3 %v7217_v46  ;;  %3733 = vmatpush.msra.mxu0 %v7072_v63  ;;  %v6299_v23 = vsel %vm1697_vm1, 1.0, %v7233_v21  ;;  %v1677_v62 = vadd.f32 %v1676_v2, %v1636_v0  ;;  %v1690_v46 = vmul.f32 %v1271_v59, %v6212_v17  ;;  %v7245_v63 = vld [vmem:[#allocation61_spill] sm:$0xff]  ;;  %v7246_v2 = vld [vmem:[#allocation50_spill] sm:$0xff]  ;;  %v7251_v0 = vld [vmem:[#allocation76_spill] sm:$0xff] }
 0x237   :  { %3782 = vmatpush.msra.mxu1 %v4976_v52  ;;  %2786 = vmatmul.f32.vlgmr.msrb.gmra.mxu2 %v7234_v30  ;;  %v6304_v53 = vadd.f32 %v6299_v23, %v4336_v11  ;;  %v7249_v59 = vld [vmem:[#allocation70_spill] sm:$0xff] }
 0x238   :  { %3008 = vmatpush.msra.mxu2 %v4836_v24  ;;  %3091 = vmatpush.msra.mxu3 %v7153_v42  ;;  %v1686_v1 = vmul.f32 %v1684_v14, %v1677_v62  ;;  %v1694_v11 = vmul.f32 %v1692_v56, %v1690_v46  ;;  %v7248_v62 = vld [vmem:[#allocation54_spill] sm:$0xff]  ;;  %v7250_v46 = vld [vmem:[#allocation73_spill] sm:$0xff] }
 0x239   :  { %3737 = vmatpush.msra.mxu0 %v7245_v63  ;;  %3784 = vmatpush.msra.mxu1 %v4982_v20 }
 0x23a   :  { %3010 = vmatpush.msra.mxu2 %v4841_v26  ;;  %3097 = vmatpush.msra.mxu3 %v7246_v2  ;;  %v6314_v30 = vadd.f32 %v1686_v1, %v1680_v18  ;;  %v7252_v18 = vld [vmem:[#allocation23_spill] sm:$0xff] }
 0x23b   :  { %3741 = vmatpush.msra.mxu0 %v7247_v43  ;;  %3786 = vmatpush.msra.mxu1 %v5001_v37 }
 0x23c   :  { %3012 = vmatpush.msra.mxu2 %v4853_v28  ;;  %3103 = vmatpush.msra.mxu3 %v7248_v62  ;;  %v6321_v36 = vadd.f32 %v1694_v11, %v6314_v30  ;;  %v7255_v11 = vld [vmem:[#allocation90_spill] sm:$0xff] }
 0x23d   :  { %3745 = vmatpush.msra.mxu0 %v7249_v59  ;;  %3788 = vmatpush.msra.mxu1 %v5022_v29 }
 0x23e   :  { %3014 = vmatpush.msra.mxu2 %v4870_v35  ;;  %3109 = vmatpush.msra.mxu3 %v7223_v13  ;;  %vm1698_vm2 = vcmp.gt.f32.partialorder %v6321_v36, 0.5  ;;  %v2107_v42 = vmul.f32 %v6321_v36, %v6160_v47 }
 0x23f   :  { %3749 = vmatpush.msra.mxu0 %v7250_v46  ;;  %3790 = vmatpush.msra.mxu1 %v5046_v7  ;;  %v6331_v56 = vsel %vm1698_vm2, 1.0, %v7233_v21 }
 0x240   :  { %2791 = vmatmul.f32.gmra.mxu2 %v7243_v19  ;;  %3115 = vmatpush.msra.mxu3 %v7224_v4  ;;  %v6336_v14 = vadd.f32 %v6331_v56, %v4337_v39  ;;  %v7253_v39 = vld [vmem:[#allocation68_spill] sm:$0xff] }
 0x241   :  { %3016 = vmatpush.msra.mxu2 %v4888_v44  ;;  %3753 = vmatpush.msra.mxu0 %v7251_v0  ;;  %v7254_v19 = vld [vmem:[#allocation28_spill] sm:$0xff] }
 0x242   :  { %3792 = vmatpush.msra.mxu1 %v5055_v27  ;;  %4392 = vmatmul.msk.f32.vlgmr.msra.gmra.mxu0 %vm3426_vm13, %v7052_v61 }
 0x243   :  { %3018 = vmatpush.msra.mxu2 %v4897_v49  ;;  %4013 = vmatpush.msrb.mxu0 %v7252_v18 }
 0x244   :  { %3121 = vmatpush.msra.mxu3 %v7161_v34  ;;  %3794 = vmatpush.msra.mxu1 %v5079_v10  ;;  %v1981_v1 = vpop.f32.mrf.mxu3 }
 0x245   :  { %3020 = vmatpush.msra.mxu2 %v4914_v57  ;;  %4394 = vmatmul.msk.f32.vlgmr.msra.gmra.mxu1 %vm3426_vm13, %v7052_v61 }
 0x246   :  { %4016 = vmatpush.msrb.mxu0 %v7162_v9  ;;  %4071 = vmatpush.msrb.mxu1 %v4836_v24 }
 0x247   :  { %3127 = vmatpush.msra.mxu3 %v7253_v39  ;;  %3022 = vmatpush.msra.mxu2 %v4933_v3  ;;  %v2106_v39 = vmul.f32 %v6286_v12, %v6160_v47 }
 0x248   :  { %4019 = vmatpush.msrb.mxu0 %v7254_v19  ;;  %4073 = vmatpush.msrb.mxu1 %v4841_v26 }
 0x249   :  { %3133 = vmatpush.msra.mxu3 %v7165_v33  ;;  %3024 = vmatpush.msra.mxu2 %v4958_v32  ;;  %v2056_v33 = vpop.f32.mrf.mxu0  ;;  %v2108_v13 = vsub.f32 1.0, %v2106_v39  ;;  %v7260_v39 = vld [vmem:[#allocation91_spill] sm:$0xff] }
 0x24a   :  { %4022 = vmatpush.msrb.mxu0 %v7227_v5  ;;  %4075 = vmatpush.msrb.mxu1 %v4853_v28 }
 0x24b   :  { %3139 = vmatpush.msra.mxu3 %v7230_v48  ;;  %3026 = vmatpush.msra.mxu2 %v4976_v52 }
 0x24c   :  { %4393 = vmatmul.msk.f32.gmra.mxu0 %vm3427_vm14, %v7052_v61  ;;  %4077 = vmatpush.msrb.mxu1 %v4870_v35 }
 0x24d   :  { %4025 = vmatpush.msrb.mxu0 %v7168_v38  ;;  %3145 = vmatpush.msra.mxu3 %v7169_v40  ;;  %v7281_v40 = vld [vmem:[#allocation30_spill] sm:$0xff] }
 0x24e   :  { %3028 = vmatpush.msra.mxu2 %v4982_v20  ;;  %4395 = vmatmul.msk.f32.gmra.mxu1 %vm3427_vm14, %v7052_v61  ;;  %v1937_v8 = vpop.f32.mrf.mxu2 }
 0x24f   :  { %4028 = vmatpush.msrb.mxu0 %v7170_v60  ;;  %4079 = vmatpush.msrb.mxu1 %v4888_v44  ;;  %v1938_v48 = vadd.f32 %v1937_v8, %v7255_v11  ;;  %v2097_v8 = vpop.f32.mrf.mxu1 }
 0x250   :  { %3151 = vmatpush.msra.mxu3 %v7172_v25  ;;  %3030 = vmatpush.msra.mxu2 %v5001_v37  ;;  %v2116_v25 = vsub.f32 1.0, %v6299_v23  ;;  %v2114_v23 = vmul.f32 %v6286_v12, %v6212_v17  ;;  %v1987_v12 = vpop.f32.mrf.mxu3 }
 0x251   :  { %4380 = vmatmul.msk.f32.vlgmr.msra.gmra.mxu3 %vm3001_vm11, %v7052_v61  ;;  %4031 = vmatpush.msrb.mxu0 %v7173_v41  ;;  %v1982_v16 = vadd.f32 %v1981_v1, %v1938_v48  ;;  %v7257_v48 = vld [vmem:[#allocation25_spill] sm:$0xff] }
 0x252   :  { %3339 = vmatpush.msrb.mxu3 %v4836_v24  ;;  %4081 = vmatpush.msrb.mxu1 %v4897_v49  ;;  %v7258_v1 = vand.u32 4294901760, %v7257_v48 }
 0x253   :  { %3032 = vmatpush.msra.mxu2 %v5022_v29  ;;  %4034 = vmatpush.msrb.mxu0 %v7176_v54  ;;  %v2057_v11 = vadd.f32 %v2056_v33, %v1982_v16  ;;  %v2104_v33 = vmul.f32 %v6278_v6, %v6194_v15  ;;  %v7259_v16 = vld [vmem:[#allocation53_spill] sm:$0xff] }
 0x254   :  { %3341 = vmatpush.msrb.mxu3 %v4841_v26  ;;  %4083 = vmatpush.msrb.mxu1 %v4914_v57  ;;  %v3042_v34 = vsub.f32 %v7257_v48, %v7258_v1  ;;  %v2118_v1 = vmul.f32 %v2116_v25, %v2114_v23  ;;  %v7265_v23 = vld [vmem:[#allocation35_spill] sm:$0xff] }
 0x255   :  { %3034 = vmatpush.msra.mxu2 %v5046_v7  ;;  %4037 = vmatpush.msrb.mxu0 %v7178_v22  ;;  %v2098_v4 = vadd.f32 %v2097_v8, %v2057_v11 }
 0x256   :  { %3343 = vmatpush.msrb.mxu3 %v4853_v28  ;;  %4085 = vmatpush.msrb.mxu1 %v4933_v3  ;;  %v3043_v6 = vand.u32 4294901760, %v3042_v34  ;;  %v7263_v34 = vld [vmem:[#allocation24_spill] sm:$0xff] }
 0x257   :  { %3036 = vmatpush.msra.mxu2 %v5055_v27  ;;  %4040 = vmatpush.msrb.mxu0 %v7259_v16  ;;  %v2110_v62 = vmul.f32 %v2108_v13, %v2098_v4  ;;  %v1942_v2 = vpop.f32.mrf.mxu2  ;;  %v7262_v4 = vld [vmem:[#allocation55_spill] sm:$0xff] }
 0x258   :  { %3345 = vmatpush.msrb.mxu3 %v4870_v35  ;;  %4087 = vmatpush.msrb.mxu1 %v4958_v32  ;;  %v1943_v8 = vadd.f32 %v1942_v2, %v7260_v39  ;;  %v2060_v2 = vpop.f32.mrf.mxu0 }
 0x259   :  { %3038 = vmatpush.msra.mxu2 %v5079_v10  ;;  %4381 = vmatmul.msk.f32.gmra.mxu3 %vm3002_vm12, %v7052_v61  ;;  %v6412_v48 = vadd.f32 %v2110_v62, %v2104_v33  ;;  %v7264_v62 = vld [vmem:[#allocation83_spill] sm:$0xff]  ;;  %v2101_v33 = vpop.f32.mrf.mxu1 }
 0x25a   :  { %3347 = vmatpush.msrb.mxu3 %v4888_v44  ;;  %4043 = vmatpush.msrb.mxu0 %v7262_v4  ;;  %v1988_v13 = vadd.f32 %v1987_v12, %v1943_v8  ;;  %vm3851_vm3 = vcmp.gt.f32.partialorder %v7264_v62, 0.5  ;;  %v7266_v8 = vand.u32 4294901760, %v7265_v23 }
 0x25b   :  { %4089 = vmatpush.msrb.mxu1 %v4976_v52  ;;  %3044 = vmatmul.f32.vlgmr.msra.gmra.mxu2 %v3043_v6  ;;  %v6420_v39 = vadd.f32 %v2118_v1, %v6412_v48  ;;  %v2117_v6 = vsub.f32 1.0, %v6331_v56  ;;  %v7267_v1 = vld [vmem:[#allocation27_spill] sm:$0xff]  ;;  %v4398_v56 = vsel %vm3851_vm3, 1.0, %v7233_v21 }
 0x25c   :  { %3268 = vmatpush.msrb.mxu2 %v7263_v34  ;;  %3349 = vmatpush.msrb.mxu3 %v4897_v49  ;;  %v2061_v25 = vadd.f32 %v2060_v2, %v1988_v13  ;;  %v3050_v12 = vsub.f32 %v7265_v23, %v7266_v8  ;;  %v2109_v2 = vsub.f32 1.0, %v2107_v42  ;;  %v2105_v8 = vmul.f32 %v6314_v30, %v6194_v15 }
 0x25d   :  { %4046 = vmatpush.msrb.mxu0 %v7201_v58  ;;  %4091 = vmatpush.msrb.mxu1 %v4982_v20  ;;  %vm2122_vm4 = vcmp.gt.f32.partialorder %v6420_v39, 0.5  ;;  %v2115_v42 = vmul.f32 %v6321_v36, %v6212_v17 }
 0x25e   :  { %3272 = vmatpush.msrb.mxu2 %v7267_v1  ;;  %3351 = vmatpush.msrb.mxu3 %v4914_v57  ;;  %v2102_v13 = vadd.f32 %v2101_v33, %v2061_v25  ;;  %v6435_v34 = vsel %vm2122_vm4, 1.0, %v7233_v21  ;;  %v7269_v25 = vld [vmem:[#allocation31_spill] sm:$0xff]  ;;  %v3051_v1 = vand.u32 4294901760, %v3050_v12  ;;  %v7273_v12 = vld [vmem:[#allocation40_spill] sm:$0xff] }
 0x25f   :  { %4049 = vmatpush.msrb.mxu0 %v7236_v55  ;;  %4093 = vmatpush.msrb.mxu1 %v5001_v37  ;;  %v6441_v23 = vadd.f32 %v6435_v34, %v6304_v53  ;;  %v7270_v53 = vld [vmem:[#allocation34_spill] sm:$0xff]  ;;  %v2119_v30 = vmul.f32 %v2117_v6, %v2115_v42  ;;  %v7274_v42 = vld [vmem:[#allocation48_spill] sm:$0xff] }
 0x260   :  { %3276 = vmatpush.msrb.mxu2 %v7269_v25  ;;  %3353 = vmatpush.msrb.mxu3 %v4933_v3  ;;  %v2111_v33 = vmul.f32 %v2109_v2, %v2102_v13  ;;  %v7271_v13 = vld [vmem:[#allocation85_spill] sm:$0xff]  ;;  %v7272_v2 = vld [vmem:[#allocation39_spill] sm:$0xff] }
 0x261   :  { %7268 = vst [vmem:[#allocation29_spill] sm:$0xff] %v6441_v23  ;;  %4052 = vmatpush.msrb.mxu0 %v7237_v50  ;;  %4095 = vmatpush.msrb.mxu1 %v5022_v29  ;;  %v6458_v23 = vsub.f32 %v4398_v56, %v4398_v56  ;;  %vm3852_vm5 = vcmp.gt.f32.partialorder %v7271_v13, 0.5 }
 0x262   :  { %3280 = vmatpush.msrb.mxu2 %v7270_v53  ;;  %3355 = vmatpush.msrb.mxu3 %v4958_v32  ;;  %v6456_v62 = vadd.f32 %v2111_v33, %v2105_v8  ;;  %v4399_v56 = vsel %vm3852_vm5, 1.0, %v7233_v21 }
 0x263   :  { %4055 = vmatpush.msrb.mxu0 %v7240_v51  ;;  %4097 = vmatpush.msrb.mxu1 %v5046_v7  ;;  %v6971_v6 = vand.u32 4294901760, %v6458_v23  ;;  %v6491_v33 = vsub.f32 %v4399_v56, %v4399_v56 }
 0x264   :  { %3052 = vmatmul.f32.gmra.mxu2 %v3051_v1  ;;  %3357 = vmatpush.msrb.mxu3 %v4976_v52  ;;  %v6464_v36 = vadd.f32 %v2119_v30, %v6456_v62  ;;  %v7275_v30 = vld [vmem:[#allocation52_spill] sm:$0xff] }
 0x265   :  { %3284 = vmatpush.msrb.mxu2 %v7272_v2  ;;  %4058 = vmatpush.msrb.mxu0 %v7242_v45 }
 0x266   :  { %4099 = vmatpush.msrb.mxu1 %v5055_v27  ;;  %4061 = vmatmul.f32.vlgmr.msrb.gmra.mxu0 %v6458_v23  ;;  %vm2123_vm6 = vcmp.gt.f32.partialorder %v6464_v36, 0.5 }
 0x267   :  { %3288 = vmatpush.msrb.mxu2 %v7273_v12  ;;  %3359 = vmatpush.msrb.mxu3 %v4982_v20  ;;  %v6476_v1 = vsel %vm2123_vm6, 1.0, %v7233_v21 }
 0x268   :  { %4101 = vmatpush.msrb.mxu1 %v5079_v10  ;;  %v6484_v8 = vadd.f32 %v6476_v1, %v6336_v14  ;;  %v7276_v14 = vld [vmem:[#allocation56_spill] sm:$0xff] }
 0x269   :  { %3292 = vmatpush.msrb.mxu2 %v7210_v31  ;;  %4105 = vmatmul.f32.vlgmr.msrb.gmra.mxu1 %v6971_v6  ;;  %v6972_v31 = vand.u32 4294901760, %v6491_v33  ;;  %v7277_v6 = vld [vmem:[#allocation58_spill] sm:$0xff] }
 0x26a   :  { %3361 = vmatpush.msrb.mxu3 %v5001_v37 }
 0x26b   :  { %3296 = vmatpush.msrb.mxu2 %v7274_v42 }
 0x26c   :  { %3363 = vmatpush.msrb.mxu3 %v5022_v29 }
 0x26d   :  { %3300 = vmatpush.msrb.mxu2 %v7275_v30  ;;  %v2304_v30 = vpop.f32.mrf.mxu3 }
 0x26e   :  { %3365 = vmatpush.msrb.mxu3 %v5046_v7  ;;  %4066 = vmatmul.f32.gmra.mxu0 %v6491_v33 }
 0x26f   :  { %3304 = vmatpush.msrb.mxu2 %v7276_v14  ;;  %v7278_v14 = vld [vmem:[#allocation88_spill] sm:$0xff] }
 0x270   :  { %3367 = vmatpush.msrb.mxu3 %v5055_v27 }
 0x271   :  { %3308 = vmatpush.msrb.mxu2 %v7277_v6  ;;  %4111 = vmatmul.f32.gmra.mxu1 %v6972_v31 }
 0x272   :  { %3369 = vmatpush.msrb.mxu3 %v5079_v10  ;;  %v2195_v56 = vpop.f32.mrf.mxu2 }
 0x273   :  { %3312 = vmatpush.msrb.mxu2 %v7245_v63  ;;  %4384 = vmatmul.msk.f32.vlgmr.msrb.gmra.mxu3 %vm3001_vm11, %v7052_v61  ;;  %v2196_v42 = vadd.f32 %v2195_v56, %v7278_v14 }
 0x274   :  { %3646 = vmatpush.msra.mxu3 %v4836_v24 }
 0x275   :  { %3316 = vmatpush.msrb.mxu2 %v7247_v43  ;;  %v2305_v6 = vadd.f32 %v2304_v30, %v2196_v42  ;;  %v2308_v30 = vpop.f32.mrf.mxu3 }
 0x276   :  { %3648 = vmatpush.msra.mxu3 %v4841_v26 }
 0x277   :  { %3320 = vmatpush.msrb.mxu2 %v7249_v59 }
 0x278   :  { %3650 = vmatpush.msra.mxu3 %v4853_v28 }
 0x279   :  { %3324 = vmatpush.msrb.mxu2 %v7250_v46 }
 0x27a   :  { %3652 = vmatpush.msra.mxu3 %v4870_v35 }
 0x27b   :  { %3328 = vmatpush.msrb.mxu2 %v7251_v0  ;;  %4385 = vmatmul.msk.f32.gmra.mxu3 %vm3002_vm12, %v7052_v61  ;;  %v2203_v56 = vpop.f32.mrf.mxu2 }
 0x27c   :  { %3654 = vmatpush.msra.mxu3 %v4888_v44  ;;  %4382 = vmatmul.msk.f32.vlgmr.msrb.gmra.mxu2 %vm3001_vm11, %v7052_v61  ;;  %v2204_v42 = vadd.f32 %v2203_v56, %v7278_v14 }
 0x27d   :  { %3588 = vmatpush.msra.mxu2 %v7252_v18  ;;  %v7282_v18 = vld [vmem:[#allocation33_spill] sm:$0xff] }
 0x27e   :  { %3656 = vmatpush.msra.mxu3 %v4897_v49  ;;  %v2309_v31 = vadd.f32 %v2308_v30, %v2204_v42  ;;  %v7284_v42 = vld [vmem:[#allocation42_spill] sm:$0xff] }
 0x27f   :  { %3591 = vmatpush.msra.mxu2 %v7162_v9  ;;  %v2362_v9 = vpop.f32.mrf.mxu0 }
 0x280   :  { %3658 = vmatpush.msra.mxu3 %v4914_v57 }
 0x281   :  { %3594 = vmatpush.msra.mxu2 %v7254_v19 }
 0x282   :  { %3660 = vmatpush.msra.mxu3 %v4933_v3 }
 0x283   :  { %3597 = vmatpush.msra.mxu2 %v7227_v5  ;;  %v2531_v5 = vmul.f32 %v6420_v39, %v6160_v47 }
 0x284   :  { %3662 = vmatpush.msra.mxu3 %v4958_v32  ;;  %4383 = vmatmul.msk.f32.gmra.mxu2 %vm3002_vm12, %v7052_v61 }
 0x285   :  { %3600 = vmatpush.msra.mxu2 %v7168_v38  ;;  %v2533_v56 = vsub.f32 1.0, %v2531_v5 }
 0x286   :  { %3664 = vmatpush.msra.mxu3 %v4976_v52 }
 0x287   :  { %3603 = vmatpush.msra.mxu2 %v7170_v60  ;;  %v2363_v60 = vadd.f32 %v2362_v9, %v2305_v6  ;;  %v7285_v9 = vld [vmem:[#allocation41_spill] sm:$0xff] }
 0x288   :  { %3666 = vmatpush.msra.mxu3 %v4982_v20 }
 0x289   :  { %3606 = vmatpush.msra.mxu2 %v7173_v41  ;;  %v2406_v41 = vpop.f32.mrf.mxu1 }
 0x28a   :  { %3668 = vmatpush.msra.mxu3 %v5001_v37 }
 0x28b   :  { %3609 = vmatpush.msra.mxu2 %v7176_v54  ;;  %v7279_v54 = vld [vmem:[#allocation37_spill] sm:$0xff] }
 0x28c   :  { %3670 = vmatpush.msra.mxu3 %v5022_v29  ;;  %v7280_v38 = vand.u32 4294901760, %v7279_v54 }
 0x28d   :  { %3612 = vmatpush.msra.mxu2 %v7178_v22  ;;  %v2407_v22 = vadd.f32 %v2406_v41, %v2363_v60  ;;  %v7286_v60 = vand.u32 4294901760, %v7285_v9 }
 0x28e   :  { %3672 = vmatpush.msra.mxu3 %v5046_v7 }
 0x28f   :  { %3615 = vmatpush.msra.mxu2 %v7259_v16  ;;  %v2522_v16 = vpop.f32.mrf.mxu3 }
 0x290   :  { %3674 = vmatpush.msra.mxu3 %v5055_v27 }
 0x291   :  { %3618 = vmatpush.msra.mxu2 %v7262_v4  ;;  %v7283_v4 = vld [vmem:[#allocation36_spill] sm:$0xff] }
 0x292   :  { %3676 = vmatpush.msra.mxu3 %v5079_v10 }
 0x293   :  { %3621 = vmatpush.msra.mxu2 %v7201_v58  ;;  %3680 = vmatmul.f32.vlgmr.msra.gmra.mxu3 %v7280_v38  ;;  %v2367_v58 = vpop.f32.mrf.mxu0  ;;  %v2539_v38 = vmul.f32 %v6420_v39, %v6212_v17 }
 0x294   :  { %3911 = vmatpush.msrb.mxu3 %v7281_v40  ;;  %v2368_v30 = vadd.f32 %v2367_v58, %v2309_v31  ;;  %v7288_v40 = vld [vmem:[#allocation47_spill] sm:$0xff] }
 0x295   :  { %3624 = vmatpush.msra.mxu2 %v7236_v55  ;;  %v2541_v55 = vsub.f32 1.0, %v6435_v34  ;;  %v2412_v34 = vpop.f32.mrf.mxu1 }
 0x296   :  { %3917 = vmatpush.msrb.mxu3 %v7282_v18  ;;  %v2481_v19 = vpop.f32.mrf.mxu2  ;;  %v7289_v18 = vld [vmem:[#allocation50_spill] sm:$0xff] }
 0x297   :  { %3627 = vmatpush.msra.mxu2 %v7237_v50  ;;  %v2482_v11 = vadd.f32 %v2481_v19, %v2407_v22  ;;  %v2529_v50 = vmul.f32 %v6412_v48, %v6194_v15  ;;  %v2413_v22 = vadd.f32 %v2412_v34, %v2368_v30  ;;  %v2532_v48 = vmul.f32 %v6464_v36, %v6160_v47  ;;  %v2526_v19 = vpop.f32.mrf.mxu3 }
 0x298   :  { %3923 = vmatpush.msrb.mxu3 %v7283_v4  ;;  %v2530_v30 = vmul.f32 %v6456_v62, %v6194_v15  ;;  %v7295_v62 = vld [vmem:[#allocation68_spill] sm:$0xff] }
 0x299   :  { %3630 = vmatpush.msra.mxu2 %v7240_v51  ;;  %v2523_v6 = vadd.f32 %v2522_v16, %v2482_v11  ;;  %v7287_v51 = vld [vmem:[#allocation46_spill] sm:$0xff]  ;;  %v2534_v58 = vsub.f32 1.0, %v2532_v48  ;;  %v7297_v48 = vld [vmem:[#allocation75_spill] sm:$0xff] }
 0x29a   :  { %3929 = vmatpush.msrb.mxu3 %v7284_v42  ;;  %v7290_v16 = vld [vmem:[#allocation54_spill] sm:$0xff]  ;;  %v7292_v42 = vld [vmem:[#allocation60_spill] sm:$0xff] }
 0x29b   :  { %3633 = vmatpush.msra.mxu2 %v7242_v45  ;;  %3686 = vmatmul.f32.gmra.mxu3 %v7286_v60  ;;  %v2535_v41 = vmul.f32 %v2533_v56, %v2523_v6  ;;  %v2543_v45 = vmul.f32 %v2541_v55, %v2539_v38  ;;  %v2542_v6 = vsub.f32 1.0, %v6476_v1  ;;  %v7291_v56 = vld [vmem:[#allocation29_spill] sm:$0xff]  ;;  %v7293_v1 = vld [vmem:[#allocation63_spill] sm:$0xff] }
 0x29c   :  { %3935 = vmatpush.msrb.mxu3 %v7287_v51  ;;  %3636 = vmatmul.f32.vlgmr.msra.gmra.mxu2 %v7279_v54  ;;  %v7294_v51 = vld [vmem:[#allocation64_spill] sm:$0xff] }
 0x29d   :  { %3858 = vmatpush.msrb.mxu2 %v4836_v24  ;;  %v6573_v31 = vadd.f32 %v2535_v41, %v2529_v50  ;;  %v2540_v50 = vmul.f32 %v6464_v36, %v6212_v17  ;;  %v2620_v36 = vpop.f32.mrf.mxu0 }
 0x29e   :  { %3941 = vmatpush.msrb.mxu3 %v7288_v40  ;;  %v7296_v40 = vld [vmem:[#allocation72_spill] sm:$0xff] }
 0x29f   :  { %3860 = vmatpush.msrb.mxu2 %v4841_v26  ;;  %v6580_v39 = vadd.f32 %v2543_v45, %v6573_v31  ;;  %v2485_v5 = vpop.f32.mrf.mxu2  ;;  %v2544_v38 = vmul.f32 %v2542_v6, %v2540_v50  ;;  %v7303_v50 = vand.u32 4294901760, %v6491_v33 }
 0x2a0   :  { %3947 = vmatpush.msrb.mxu3 %v7289_v18  ;;  %v2486_v54 = vadd.f32 %v2485_v5, %v2413_v22  ;;  %v2729_v22 = vpop.f32.mrf.mxu1  ;;  %v7298_v5 = vld [vmem:[#allocation77_spill] sm:$0xff]  ;;  %v7299_v18 = vld [vmem:[#allocation79_spill] sm:$0xff] }
 0x2a1   :  { %3862 = vmatpush.msrb.mxu2 %v4853_v28  ;;  %vm2547_vm7 = vcmp.gt.f32.partialorder %v6580_v39, 0.5 }
 0x2a2   :  { %3953 = vmatpush.msrb.mxu3 %v7290_v16  ;;  %v6587_v11 = vsel %vm2547_vm7, 1.0, %v7233_v21  ;;  %v2527_v4 = vadd.f32 %v2526_v19, %v2486_v54  ;;  %v2621_v54 = vadd.f32 %v2620_v36, %v7278_v14  ;;  %v7301_v16 = vand.u32 4294901760, %v6458_v23 }
 0x2a3   :  { %3864 = vmatpush.msrb.mxu2 %v4870_v35  ;;  %v6593_v55 = vadd.f32 %v6587_v11, %v7291_v56 }
 0x2a4   :  { %3959 = vmatpush.msrb.mxu3 %v7292_v42  ;;  %3641 = vmatmul.f32.gmra.mxu2 %v7285_v9  ;;  %v2536_v60 = vmul.f32 %v2534_v58, %v2527_v4  ;;  %v3892_v4 = vsub.f32 %v6458_v23, %v7301_v16  ;;  %v2730_v6 = vadd.f32 %v2729_v22, %v2621_v54  ;;  %v7305_v16 = vld [vmem:[#allocation44_spill] sm:$0xff] }
 0x2a5   :  { %3866 = vmatpush.msrb.mxu2 %v4888_v44  ;;  %v2628_v19 = vpop.f32.mrf.mxu0 }
 0x2a6   :  { %3965 = vmatpush.msrb.mxu3 %v7293_v1  ;;  %v6603_v41 = vadd.f32 %v2536_v60, %v2530_v30  ;;  %v2629_v60 = vadd.f32 %v2628_v19, %v7278_v14  ;;  %v3900_v1 = vsub.f32 %v6491_v33, %v7303_v50  ;;  %v2964_v33 = vmul.f32 %v6580_v39, %v6212_v17 }
 0x2a7   :  { %3868 = vmatpush.msrb.mxu2 %v4897_v49 }
 0x2a8   :  { %3971 = vmatpush.msrb.mxu3 %v7294_v51  ;;  %v6608_v9 = vadd.f32 %v2544_v38, %v6603_v41  ;;  %v2733_v58 = vpop.f32.mrf.mxu1  ;;  %v7304_v51 = vld [vmem:[#allocation27_spill] sm:$0xff] }
 0x2a9   :  { %3870 = vmatpush.msrb.mxu2 %v4914_v57  ;;  %v2734_v22 = vadd.f32 %v2733_v58, %v2629_v60 }
 0x2aa   :  { %3977 = vmatpush.msrb.mxu3 %v7295_v62  ;;  %vm2548_vm8 = vcmp.gt.f32.partialorder %v6608_v9, 0.5  ;;  %v2966_v62 = vsub.f32 1.0, %v6587_v11 }
 0x2ab   :  { %3872 = vmatpush.msrb.mxu2 %v4933_v3  ;;  %v6615_v34 = vsel %vm2548_vm8, 1.0, %v7233_v21 }
 0x2ac   :  { %v6619_v45 = vadd.f32 %v6615_v34, %v6484_v8  ;;  %3983 = vmatpush.msrb.mxu3 %v7296_v40 }
 0x2ad   :  { %3874 = vmatpush.msrb.mxu2 %v4958_v32  ;;  %v2906_v23 = vpop.f32.mrf.mxu0 }
 0x2ae   :  { %3989 = vmatpush.msrb.mxu3 %v7297_v48  ;;  %v2954_v48 = vmul.f32 %v6573_v31, %v6194_v15 }
 0x2af   :  { %3876 = vmatpush.msrb.mxu2 %v4976_v52 }
 0x2b0   :  { %3995 = vmatpush.msrb.mxu3 %v7298_v5  ;;  %v2831_v42 = vpop.f32.mrf.mxu3  ;;  %v2947_v38 = vpop.f32.mrf.mxu1 }
 0x2b1   :  { %3878 = vmatpush.msrb.mxu2 %v4982_v20 }
 0x2b2   :  { %4001 = vmatpush.msrb.mxu3 %v7299_v18 }
 0x2b3   :  { %3880 = vmatpush.msrb.mxu2 %v5001_v37  ;;  %4400 = vmatmul.msk.f32.vlgmr.msrb.gmra.mxu3 %vm3851_vm3, %v7052_v61 }
 0x2b4   :  { %4189 = vmatpush.msra.mxu3 %v4836_v24  ;;  %v3893_v24 = vand.u32 4294901760, %v3892_v4 }
 0x2b5   :  { %3882 = vmatpush.msrb.mxu2 %v5022_v29  ;;  %v2910_v54 = vpop.f32.mrf.mxu0 }
 0x2b6   :  { %4191 = vmatpush.msra.mxu3 %v4841_v26 }
 0x2b7   :  { %3884 = vmatpush.msrb.mxu2 %v5046_v7 }
 0x2b8   :  { %4193 = vmatpush.msra.mxu3 %v4853_v28  ;;  %v7302_v28 = vld [vmem:[#allocation24_spill] sm:$0xff]  ;;  %v2837_v11 = vpop.f32.mrf.mxu3  ;;  %v2951_v19 = vpop.f32.mrf.mxu1 }
 0x2b9   :  { %3886 = vmatpush.msrb.mxu2 %v5055_v27 }
 0x2ba   :  { %4195 = vmatpush.msra.mxu3 %v4870_v35  ;;  %v2787_v56 = vpop.f32.mrf.mxu2  ;;  %v2956_v35 = vmul.f32 %v6580_v39, %v6160_v47  ;;  %v2957_v39 = vmul.f32 %v6608_v9, %v6160_v47 }
 0x2bb   :  { %3888 = vmatpush.msrb.mxu2 %v5079_v10  ;;  %4401 = vmatmul.msk.f32.gmra.mxu3 %vm3852_vm5, %v7052_v61  ;;  %v2788_v26 = vadd.f32 %v2787_v56, %v2730_v6  ;;  %v7306_v6 = vld [vmem:[#allocation48_spill] sm:$0xff] }
 0x2bc   :  { %4197 = vmatpush.msra.mxu3 %v4888_v44  ;;  %3894 = vmatmul.f32.vlgmr.msrb.gmra.mxu2 %v3893_v24  ;;  %v2958_v40 = vsub.f32 1.0, %v2956_v35  ;;  %v2959_v4 = vsub.f32 1.0, %v2957_v39  ;;  %v2965_v24 = vmul.f32 %v6608_v9, %v6212_v17 }
 0x2bd   :  { %4118 = vmatpush.msra.mxu2 %v7302_v28  ;;  %v2832_v30 = vadd.f32 %v2831_v42, %v2788_v26  ;;  %v7308_v26 = vld [vmem:[#allocation56_spill] sm:$0xff] }
 0x2be   :  { %4199 = vmatpush.msra.mxu3 %v4897_v49  ;;  %v3901_v49 = vand.u32 4294901760, %v3900_v1 }
 0x2bf   :  { %4122 = vmatpush.msra.mxu2 %v7304_v51  ;;  %v2907_v44 = vadd.f32 %v2906_v23, %v2832_v30  ;;  %v7309_v23 = vld [vmem:[#allocation58_spill] sm:$0xff] }
 0x2c0   :  { %4201 = vmatpush.msra.mxu3 %v4914_v57 }
 0x2c1   :  { %4126 = vmatpush.msra.mxu2 %v7269_v25  ;;  %v2948_v36 = vadd.f32 %v2947_v38, %v2907_v44 }
 0x2c2   :  { %4203 = vmatpush.msra.mxu3 %v4933_v3  ;;  %v2968_v3 = vmul.f32 %v2966_v62, %v2964_v33 }
 0x2c3   :  { %4130 = vmatpush.msra.mxu2 %v7270_v53  ;;  %v2960_v5 = vmul.f32 %v2958_v40, %v2948_v36  ;;  %v2792_v57 = vpop.f32.mrf.mxu2 }
 0x2c4   :  { %4205 = vmatpush.msra.mxu3 %v4958_v32  ;;  %3902 = vmatmul.f32.gmra.mxu2 %v3901_v49  ;;  %v2793_v25 = vadd.f32 %v2792_v57, %v2734_v22 }
 0x2c5   :  { %4134 = vmatpush.msra.mxu2 %v7272_v2  ;;  %v6668_v18 = vadd.f32 %v2960_v5, %v2954_v48  ;;  %v2967_v2 = vsub.f32 1.0, %v6615_v34  ;;  %v7307_v34 = vld [vmem:[#allocation52_spill] sm:$0xff] }
 0x2c6   :  { %4207 = vmatpush.msra.mxu3 %v4976_v52  ;;  %v2838_v31 = vadd.f32 %v2837_v11, %v2793_v25 }
 0x2c7   :  { %4138 = vmatpush.msra.mxu2 %v7273_v12  ;;  %v2970_v53 = vadd.f32 %v2968_v3, %v6668_v18  ;;  %v2969_v42 = vmul.f32 %v2967_v2, %v2965_v24  ;;  %v3379_v44 = vmul.f32 %v6668_v18, %v6194_v15 }
 0x2c8   :  { %4209 = vmatpush.msra.mxu3 %v4982_v20  ;;  %v2911_v32 = vadd.f32 %v2910_v54, %v2838_v31  ;;  %v2955_v20 = vmul.f32 %v6603_v41, %v6194_v15 }
 0x2c9   :  { %4142 = vmatpush.msra.mxu2 %v7305_v16  ;;  %vm2972_vm9 = vcmp.gt.f32.partialorder %v2970_v53, 0.5  ;;  %v3381_v8 = vmul.f32 %v2970_v53, %v6160_v47  ;;  %v3389_v36 = vmul.f32 %v2970_v53, %v6212_v17 }
 0x2ca   :  { %4211 = vmatpush.msra.mxu3 %v5001_v37  ;;  %v2952_v52 = vadd.f32 %v2951_v19, %v2911_v32  ;;  %v4376_v58 = vsel %vm2972_vm9, 1.0, %v7233_v21 }
 0x2cb   :  { %4146 = vmatpush.msra.mxu2 %v7306_v6  ;;  %v6682_v12 = vadd.f32 %v4376_v58, %v6593_v55  ;;  %v3383_v1 = vsub.f32 1.0, %v3381_v8  ;;  %v3391_v38 = vsub.f32 1.0, %v4376_v58 }
 0x2cc   :  { %v2961_v56 = vmul.f32 %v2959_v4, %v2952_v52  ;;  %4213 = vmatpush.msra.mxu3 %v5022_v29 }
 0x2cd   :  { %4150 = vmatpush.msra.mxu2 %v7307_v34  ;;  %v3393_v49 = vmul.f32 %v3391_v38, %v3389_v36 }
 0x2ce   :  { %4215 = vmatpush.msra.mxu3 %v5046_v7  ;;  %v2963_v37 = vadd.f32 %v2961_v56, %v2955_v20 }
 0x2cf   :  { %4154 = vmatpush.msra.mxu2 %v7308_v26 }
 0x2d0   :  { %4217 = vmatpush.msra.mxu3 %v5055_v27  ;;  %v2971_v55 = vadd.f32 %v2969_v42, %v2963_v37  ;;  %v3380_v18 = vmul.f32 %v2963_v37, %v6194_v15 }
 0x2d1   :  { %4158 = vmatpush.msra.mxu2 %v7309_v23 }
 0x2d2   :  { %4219 = vmatpush.msra.mxu3 %v5079_v10  ;;  %vm2973_vm10 = vcmp.gt.f32.partialorder %v2971_v55, 0.5  ;;  %v3382_v33 = vmul.f32 %v2971_v55, %v6160_v47  ;;  %v3390_v53 = vmul.f32 %v2971_v55, %v6212_v17 }
 0x2d3   :  { %4162 = vmatpush.msra.mxu2 %v7245_v63  ;;  %4404 = vmatmul.msk.f32.vlgmr.msra.gmra.mxu3 %vm3851_vm3, %v7052_v61  ;;  %v4377_v29 = vsel %vm2973_vm10, 1.0, %v7233_v21 }
 0x2d4   :  { %v2979_v7 = vadd.f32 %v4377_v29, %v6619_v45  ;;  %v3154_v10 = vpop.f32.mrf.mxu3  ;;  %v3256_v45 = vpop.f32.mrf.mxu1  ;;  %v3384_v31 = vsub.f32 1.0, %v3382_v33  ;;  %v3392_v39 = vsub.f32 1.0, %v4377_v29 }
 0x2d5   :  { %4166 = vmatpush.msra.mxu2 %v7247_v43  ;;  %v3212_v43 = vpop.f32.mrf.mxu0 }
 0x2d6   :  { %v3394_v2 = vmul.f32 %v3392_v39, %v3390_v53 }
 0x2d7   :  { %4170 = vmatpush.msra.mxu2 %v7249_v59 }
 0x2d9   :  { %4174 = vmatpush.msra.mxu2 %v7250_v46 }
 0x2db   :  { %4178 = vmatpush.msra.mxu2 %v7251_v0  ;;  %4405 = vmatmul.msk.f32.gmra.mxu3 %vm3852_vm5, %v7052_v61 }
 0x2dc   :  { %4402 = vmatmul.msk.f32.vlgmr.msra.gmra.mxu2 %vm3851_vm3, %v7052_v61  ;;  %v3158_v46 = vpop.f32.mrf.mxu3  ;;  %v3262_v40 = vpop.f32.mrf.mxu1 }
 0x2de   :  { %v3045_v27 = vpop.f32.mrf.mxu2 }
 0x2df   :  { %v3046_v63 = vadd.f32 %v3045_v27, %v7278_v14 }
 0x2e1   :  { %v3155_v59 = vadd.f32 %v3154_v10, %v3046_v63 }
 0x2e3   :  { %v3213_v9 = vadd.f32 %v3212_v43, %v3155_v59 }
 0x2e4   :  { %4403 = vmatmul.msk.f32.gmra.mxu2 %vm3852_vm5, %v7052_v61  ;;  %v3217_v61 = vpop.f32.mrf.mxu0  ;;  %v3579_v58 = vpop.f32.mrf.mxu1 }
 0x2e5   :  { %v3257_v30 = vadd.f32 %v3256_v45, %v3213_v9 }
 0x2e7   :  { %v3053_v0 = vpop.f32.mrf.mxu2 }
 0x2e8   :  { %v3054_v41 = vadd.f32 %v3053_v0, %v7278_v14 }
 0x2ea   :  { %v3159_v28 = vadd.f32 %v3158_v46, %v3054_v41 }
 0x2ec   :  { %v3218_v51 = vadd.f32 %v3217_v61, %v3159_v28  ;;  %v3470_v52 = vpop.f32.mrf.mxu0  ;;  %v3583_v34 = vpop.f32.mrf.mxu1 }
 0x2ed   :  { %v3471_v56 = vadd.f32 %v3470_v52, %v7278_v14 }
 0x2ee   :  { %v3263_v48 = vadd.f32 %v3262_v40, %v3218_v51 }
 0x2ef   :  { %v3580_v42 = vadd.f32 %v3579_v58, %v3471_v56 }
 0x2f4   :  { %v3478_v24 = vpop.f32.mrf.mxu0  ;;  %v3797_v27 = vpop.f32.mrf.mxu1 }
 0x2f6   :  { %v3372_v35 = vpop.f32.mrf.mxu3 }
 0x2fc   :  { %v3756_v55 = vpop.f32.mrf.mxu0  ;;  %v3801_v38 = vpop.f32.mrf.mxu1 }
 0x2fe   :  { %v3376_v11 = vpop.f32.mrf.mxu3 }
 0x2ff   :  { %v3331_v60 = vpop.f32.mrf.mxu2 }
 0x300   :  { %v3332_v13 = vadd.f32 %v3331_v60, %v3257_v30 }
 0x302   :  { %v3373_v50 = vadd.f32 %v3372_v35, %v3332_v13 }
 0x304   :  { %v3385_v62 = vmul.f32 %v3383_v1, %v3373_v50  ;;  %v3760_v61 = vpop.f32.mrf.mxu0  ;;  %v4106_v52 = vpop.f32.mrf.mxu1 }
 0x306   :  { %v3387_v22 = vadd.f32 %v3385_v62, %v3379_v44 }
 0x307   :  { %v3335_v5 = vpop.f32.mrf.mxu2 }
 0x308   :  { %v3395_v57 = vadd.f32 %v3393_v49, %v3387_v22  ;;  %v3336_v25 = vadd.f32 %v3335_v5, %v3263_v48  ;;  %v3804_v41 = vmul.f32 %v3387_v22, %v6194_v15 }
 0x30a   :  { %vm3397_vm11 = vcmp.gt.f32.partialorder %v3395_v57, 0.5  ;;  %v3377_v3 = vadd.f32 %v3376_v11, %v3336_v25  ;;  %v3806_v10 = vmul.f32 %v3395_v57, %v6160_v47  ;;  %v3814_v9 = vmul.f32 %v3395_v57, %v6212_v17 }
 0x30b   :  { %v4386_v54 = vsel %vm3397_vm11, 1.0, %v7233_v21 }
 0x30c   :  { %v3386_v32 = vmul.f32 %v3384_v31, %v3377_v3  ;;  %v3403_v19 = vadd.f32 %v4386_v54, %v6682_v12  ;;  %v3479_v12 = vadd.f32 %v3478_v24, %v7278_v14  ;;  %v3816_v59 = vsub.f32 1.0, %v4386_v54  ;;  %v4062_v54 = vpop.f32.mrf.mxu0 }
 0x30e   :  { %v3388_v16 = vadd.f32 %v3386_v32, %v3380_v18  ;;  %v3584_v43 = vadd.f32 %v3583_v34, %v3479_v12  ;;  %v3818_v13 = vmul.f32 %v3816_v59, %v3814_v9 }
 0x310   :  { %v3396_v4 = vadd.f32 %v3394_v2, %v3388_v16  ;;  %v3805_v40 = vmul.f32 %v3388_v16, %v6194_v15 }
 0x312   :  { %vm3398_vm12 = vcmp.gt.f32.partialorder %v3396_v4, 0.5  ;;  %v3807_v35 = vmul.f32 %v3396_v4, %v6160_v47  ;;  %v3815_v22 = vmul.f32 %v3396_v4, %v6212_v17 }
 0x313   :  { %v4387_v6 = vsel %vm3398_vm12, 1.0, %v7233_v21 }
 0x314   :  { %v3404_v20 = vadd.f32 %v4387_v6, %v2979_v7  ;;  %v3808_v7 = vsub.f32 1.0, %v3806_v10  ;;  %v3817_v51 = vsub.f32 1.0, %v4387_v6  ;;  %v3809_v62 = vsub.f32 1.0, %v3807_v35 }
 0x316   :  { %v3681_v37 = vpop.f32.mrf.mxu3  ;;  %v3819_v5 = vmul.f32 %v3817_v51, %v3815_v22 }
 0x31e   :  { %v3687_v30 = vpop.f32.mrf.mxu3 }
 0x31f   :  { %v3637_v26 = vpop.f32.mrf.mxu2 }
 0x320   :  { %v3638_v23 = vadd.f32 %v3637_v26, %v3580_v42 }
 0x322   :  { %v3682_v29 = vadd.f32 %v3681_v37, %v3638_v23 }
 0x324   :  { %v3757_v63 = vadd.f32 %v3756_v55, %v3682_v29 }
 0x326   :  { %v3798_v46 = vadd.f32 %v3797_v27, %v3757_v63 }
 0x327   :  { %v3642_v0 = vpop.f32.mrf.mxu2 }
 0x328   :  { %v3810_v45 = vmul.f32 %v3808_v7, %v3798_v46  ;;  %v3643_v28 = vadd.f32 %v3642_v0, %v3584_v43 }
 0x32a   :  { %v3688_v8 = vadd.f32 %v3687_v30, %v3643_v28  ;;  %v3812_v60 = vadd.f32 %v3810_v45, %v3804_v41 }
 0x32c   :  { %v3761_v50 = vadd.f32 %v3760_v61, %v3688_v8  ;;  %v3820_v1 = vadd.f32 %v3818_v13, %v3812_v60  ;;  %v4229_v23 = vmul.f32 %v3812_v60, %v6194_v15 }
 0x32e   :  { %v3802_v44 = vadd.f32 %v3801_v38, %v3761_v50  ;;  %vm3822_vm13 = vcmp.gt.f32.partialorder %v3820_v1, 0.5  ;;  %v4231_v58 = vmul.f32 %v3820_v1, %v6160_v47  ;;  %v4239_v12 = vmul.f32 %v3820_v1, %v6212_v17 }
 0x32f   :  { %v4396_v36 = vsel %vm3822_vm13, 1.0, %v7233_v21 }
 0x330   :  { %v3811_v49 = vmul.f32 %v3809_v62, %v3802_v44  ;;  %v3828_v48 = vadd.f32 %v4396_v36, %v3403_v19  ;;  %v4233_v42 = vsub.f32 1.0, %v4231_v58  ;;  %v4241_v37 = vsub.f32 1.0, %v4396_v36 }
 0x332   :  { %v3813_v33 = vadd.f32 %v3811_v49, %v3805_v40  ;;  %v4243_v10 = vmul.f32 %v4241_v37, %v4239_v12 }
 0x334   :  { %v3821_v57 = vadd.f32 %v3819_v5, %v3813_v33  ;;  %v4230_v28 = vmul.f32 %v3813_v33, %v6194_v15 }
 0x336   :  { %vm3823_vm14 = vcmp.gt.f32.partialorder %v3821_v57, 0.5  ;;  %v4004_v3 = vpop.f32.mrf.mxu3  ;;  %v4232_v63 = vmul.f32 %v3821_v57, %v6160_v47  ;;  %v4240_v8 = vmul.f32 %v3821_v57, %v6212_v17 }
 0x337   :  { %v4397_v25 = vsel %vm3823_vm14, 1.0, %v7233_v21 }
 0x338   :  { %v3829_v11 = vadd.f32 %v4397_v25, %v3404_v20  ;;  %v4067_v20 = vpop.f32.mrf.mxu0  ;;  %v4234_v41 = vsub.f32 1.0, %v4232_v63  ;;  %v4242_v9 = vsub.f32 1.0, %v4397_v25 }
 0x33a   :  { %v4244_v13 = vmul.f32 %v4242_v9, %v4240_v8 }
 0x33e   :  { %v4008_v32 = vpop.f32.mrf.mxu3 }
 0x33f   :  { %v3895_v31 = vpop.f32.mrf.mxu2 }
 0x340   :  { %v3896_v39 = vadd.f32 %v3895_v31, %v7278_v14 }
 0x342   :  { %v4005_v18 = vadd.f32 %v4004_v3, %v3896_v39 }
 0x344   :  { %v4063_v2 = vadd.f32 %v4062_v54, %v4005_v18 }
 0x346   :  { %v4107_v4 = vadd.f32 %v4106_v52, %v4063_v2 }
 0x347   :  { %v3903_v53 = vpop.f32.mrf.mxu2 }
 0x348   :  { %v3904_v16 = vadd.f32 %v3903_v53, %v7278_v14  ;;  %v4112_v14 = vpop.f32.mrf.mxu1 }
 0x34a   :  { %v4009_v19 = vadd.f32 %v4008_v32, %v3904_v16 }
 0x34c   :  { %v4068_v26 = vadd.f32 %v4067_v20, %v4009_v19 }
 0x34e   :  { %v4113_v27 = vadd.f32 %v4112_v14, %v4068_v26 }
 0x356   :  { %v4222_v6 = vpop.f32.mrf.mxu3 }
 0x35e   :  { %v4226_v7 = vpop.f32.mrf.mxu3 }
 0x35f   :  { %v4181_v24 = vpop.f32.mrf.mxu2 }
 0x360   :  { %v4182_v56 = vadd.f32 %v4181_v24, %v4107_v4 }
 0x362   :  { %v4223_v34 = vadd.f32 %v4222_v6, %v4182_v56 }
 0x364   :  { %v4235_v55 = vmul.f32 %v4233_v42, %v4223_v34 }
 0x366   :  { %v4237_v29 = vadd.f32 %v4235_v55, %v4229_v23 }
 0x367   :  { %v4185_v43 = vpop.f32.mrf.mxu2 }
 0x368   :  { %v4245_v59 = vadd.f32 %v4243_v10, %v4237_v29  ;;  %v4186_v46 = vadd.f32 %v4185_v43, %v4113_v27 }
 0x36a   :  { %vm4247_vm15 = vcmp.gt.f32.partialorder %v4245_v59, 0.5  ;;  %v4227_v0 = vadd.f32 %v4226_v7, %v4186_v46 }
 0x36b   :  { %v4406_v45 = vsel %vm4247_vm15, 1.0, %v7233_v21 }
 0x36c   :  { %v4236_v30 = vmul.f32 %v4234_v41, %v4227_v0  ;;  %v4253_v35 = vadd.f32 %v4406_v45, %v3828_v48 }
 0x36e   :  { %v4238_v60 = vadd.f32 %v4236_v30, %v4230_v28  ;;  %v4255_v61 = vmul.f32 0.125, %v4253_v35 }
 0x370   :  { %v4246_v47 = vadd.f32 %v4244_v13, %v4238_v60  ;;  %4257 = vst [vmem:[#allocation12] sm:$0xff] %v4255_v61 }
 0x372   :  { %vm4248_vm0 = vcmp.gt.f32.partialorder %v4246_v47, 0.5 }
 0x373   :  { %v4407_v50 = vsel %vm4248_vm0, 1.0, %v7233_v21 }
 0x374   :  { %v4254_v1 = vadd.f32 %v4407_v50, %v3829_v11 }
 0x376   :  { %v4256_v15 = vmul.f32 0.125, %v4254_v1 }
 0x378   :  { %4258 = vst [vmem:[#allocation12 + $0x8] sm:$0xff] %v4256_v15 }
 0x379   :  { %4271 = dma.vmem_to_hbm [thread:$0]  %s4264_s4, 256, %s4266_s21, [#allocation5], %s4612_s26, %s4612_s26, %s4613_s27  }
 0x37a   :  { %4609 = dma.done.wait [#allocation5], 256  }
 0x37b   :  { %4610 = vsyncadd [#allocation5], 4294967040 }
 0x37c   :  { %4276 = vsyncpa [#allocation4], 1 }
 0x37d   :  { %4277 = vsyncpa [#allocation7], 1 }
 0x37e   :  { %4278 = vsyncpa [#allocation10], 1 }
 0x37f   :  { %4279 = vsyncpa [#allocation5], 1 }

</bundles_post_ra>
